<compile_context>
chip_gen: v5e
topology: v5e:2x2
jax: 0.10.0
libtpu: 0.0.40
codegen_flags: <defaults>
</compile_context>

<pallas_src>
import functools

import jax
import jax.numpy as jnp
from jax.experimental import pallas as pl
from jax.experimental.pallas import tpu as pltpu

EPS = 1e-5          # BatchNorm2d default eps
NUM_STAGES = 3


def fused_kernel(w_ref, b_ref, g_ref, bt_ref, x_ref, o_ref, *, n, c, h, w):
    """All three stages fused; data never leaves VMEM between stages.

    w_ref : (S*C*C,) f32 SMEM  flattened per-stage conv weights
    b_ref, g_ref, bt_ref : (S*C,) f32 SMEM  conv bias / BN gamma / BN beta
    x_ref : (C, N, Hf, Wf) f32 VMEM  input, channel-major, already zero-padded
            to the final spatial size (Hf = H + 6, Wf = W + 6)
    o_ref : (C, N, Hf, Wf) f32 VMEM  final output (stage 3 fills it fully)
    """
    hf = h + 2 * NUM_STAGES
    wf = w + 2 * NUM_STAGES

    # Current activation: one (N, Hf, Wf) slab per channel, carried as values
    # across all three stages (tiny: < 20 vregs total).
    acts = [x_ref[ci] for ci in range(c)]

    # Hoisted iotas for the per-stage active-region masks (built once).
    row = jax.lax.broadcasted_iota(jnp.int32, (n, hf, wf), 1)
    col = jax.lax.broadcasted_iota(jnp.int32, (n, hf, wf), 2)

    for s in range(NUM_STAGES):
        off = NUM_STAGES - 1 - s            # 2, 1, 0
        size = h + 2 * (s + 1)              # H+2, H+4, H+6 (active extent)
        inv_count = 1.0 / float(n * size * size)
        last = s == NUM_STAGES - 1
        if last:
            mask = None                     # active region == full buffer
        else:
            mask = ((row >= off) & (row < off + size) &
                    (col >= off) & (col < off + size))

        new_acts = []
        for co in range(c):
            # ---- 1x1 conv as unrolled VPU FMAs with SMEM scalar weights ----
            base = (s * c + co) * c
            v = acts[0] * w_ref[base + 0]
            for k in range(1, c):
                v = v + acts[k] * w_ref[base + k]
            v = v + b_ref[s * c + co]

            # hardswish-style block: h = v * clip(v + 3, 0, 6) / 6
            hh = v * jnp.clip(v + 3.0, 0.0, 6.0) * (1.0 / 6.0)

            # ---- BatchNorm2d (training-mode batch stats, biased variance) ---
            # One-pass sum / sum-of-squares, padded-out region masked away and
            # divided by the exact element count of this stage's conv output.
            hm = hh if mask is None else jnp.where(mask, hh, 0.0)
            s1 = jnp.sum(hm, axis=(0, 1, 2), keepdims=True)          # (1,1,1)
            s2 = jnp.sum(hm * hm, axis=(0, 1, 2), keepdims=True)     # (1,1,1)
            mean = s1 * inv_count
            var = s2 * inv_count - mean * mean
            scale = jax.lax.rsqrt(var + EPS) * g_ref[s * c + co]
            bn = (hh - mean) * scale + bt_ref[s * c + co]

            # out = h * clip(bn, 0, 6) / 6 ; zero everything outside the active
            # region so it acts as the next stage's conv padding.
            out = hh * jnp.clip(bn, 0.0, 6.0) * (1.0 / 6.0)
            if mask is not None:
                out = jnp.where(mask, out, 0.0)
            new_acts.append(out)
        acts = new_acts

    # TODO(synk): BatchNorm running_mean/running_var buffer updates (training
    # side-effects) are not emulated; only the forward output is produced.
    for co in range(c):
        o_ref[co] = acts[co]


def _fused_forward(x_nchw, w_flat, b_flat, g_flat, bt_flat):
    n, c, h, w = x_nchw.shape
    hf, wf = h + 2 * NUM_STAGES, w + 2 * NUM_STAGES

    # Single entry-side layout op: NCHW -> channel-major + one pad to the
    # final spatial size (zeros double as per-stage conv padding in-kernel).
    x_c = jnp.transpose(x_nchw, (1, 0, 2, 3))
    x_c = jnp.pad(x_c, ((0, 0), (0, 0),
                        (NUM_STAGES, NUM_STAGES), (NUM_STAGES, NUM_STAGES)))

    smem = pl.BlockSpec(memory_space=pltpu.MemorySpace.SMEM)
    vmem = pl.BlockSpec(memory_space=pltpu.MemorySpace.VMEM)

    out_c = pl.pallas_call(
        functools.partial(fused_kernel, n=n, c=c, h=h, w=w),
        out_shape=jax.ShapeDtypeStruct((c, n, hf, wf), jnp.float32),
        in_specs=[smem, smem, smem, smem, vmem],
        out_specs=vmem,
    )(w_flat, b_flat, g_flat, bt_flat, x_c)

    return jnp.transpose(out_c, (1, 0, 2, 3))     # back to NCHW once at exit


@jax.jit
def model_forward(x, params):
    """x: NCHW float32. params: list of 3 dicts with w (C,C), b/gamma/beta (C,)."""
    w_flat = jnp.concatenate([p["w"].reshape(-1) for p in params])
    b_flat = jnp.concatenate([p["b"] for p in params])
    g_flat = jnp.concatenate([p["gamma"] for p in params])
    bt_flat = jnp.concatenate([p["beta"] for p in params])
    return _fused_forward(x, w_flat, b_flat, g_flat, bt_flat)


def make_params(key, num_stages=NUM_STAGES, channels=3):
    params = []
    for _ in range(num_stages):
        k_w, k_b, key = jax.random.split(key, 3)
        w = jax.random.normal(k_w, (channels, channels), jnp.float32) * 0.5
        b = jax.random.normal(k_b, (channels,), jnp.float32) * 0.1
        gamma = jnp.ones((channels,), jnp.float32)   # BatchNorm2d default init
        beta = jnp.zeros((channels,), jnp.float32)
        params.append({"w": w, "b": b, "gamma": gamma, "beta": beta})
    return params


if __name__ == "__main__":
    key = jax.random.PRNGKey(0)
    k_x, k_p = jax.random.split(key)
    # small shapes: batch=2, channels=3 (fixed by the module), spatial=16
    x = jax.random.normal(k_x, (2, 3, 16, 16), jnp.float32)
    params = make_params(k_p)

    out = jax.block_until_ready(model_forward(x, params))
    assert out.shape == (2, 3, 22, 22), out.shape   # each conv pads spatial by +2
    print("KERNEL_OK")
</pallas_src>

<mosaic_0001>
module attributes {stable_mosaic.version = 11 : i64} {
  func.func @fused_kernel(%arg0: memref<27xf32, #tpu.memory_space<smem>>, %arg1: memref<9xf32, #tpu.memory_space<smem>>, %arg2: memref<9xf32, #tpu.memory_space<smem>>, %arg3: memref<9xf32, #tpu.memory_space<smem>>, %arg4: memref<3x2x22x22xf32, #tpu.memory_space<vmem>>, %arg5: memref<3x2x22x22xf32, #tpu.memory_space<vmem>>) attributes {dimension_semantics = [], scalar_prefetch = 0 : i64, scratch_operands = 0 : i64, tpu.core_type = #tpu.core_type<tc>} {
    %c0 = arith.constant 0 : index
    %c0_0 = arith.constant 0 : index
    %c0_1 = arith.constant 0 : index
    %c0_2 = arith.constant 0 : index
    %0 = vector.load %arg4[%c0, %c0_0, %c0_1, %c0_2] : memref<3x2x22x22xf32, #tpu.memory_space<vmem>>, vector<1x2x22x22xf32>
    %1 = vector.shape_cast %0 : vector<1x2x22x22xf32> to vector<2x22x22xf32>
    %c1 = arith.constant 1 : index
    %c0_3 = arith.constant 0 : index
    %c0_4 = arith.constant 0 : index
    %c0_5 = arith.constant 0 : index
    %2 = vector.load %arg4[%c1, %c0_3, %c0_4, %c0_5] : memref<3x2x22x22xf32, #tpu.memory_space<vmem>>, vector<1x2x22x22xf32>
    %3 = vector.shape_cast %2 : vector<1x2x22x22xf32> to vector<2x22x22xf32>
    %c2 = arith.constant 2 : index
    %c0_6 = arith.constant 0 : index
    %c0_7 = arith.constant 0 : index
    %c0_8 = arith.constant 0 : index
    %4 = vector.load %arg4[%c2, %c0_6, %c0_7, %c0_8] : memref<3x2x22x22xf32, #tpu.memory_space<vmem>>, vector<1x2x22x22xf32>
    %5 = vector.shape_cast %4 : vector<1x2x22x22xf32> to vector<2x22x22xf32>
    %6 = tpu.iota {dimensions = array<i32: 1>} : vector<2x22x22xi32>
    %7 = tpu.iota {dimensions = array<i32: 2>} : vector<2x22x22xi32>
    %c2_i32 = arith.constant 2 : i32
    %8 = vector.broadcast %c2_i32 : i32 to vector<2x22x22xi32>
    %9 = arith.cmpi sge, %6, %8 : vector<2x22x22xi32>
    %c20_i32 = arith.constant 20 : i32
    %10 = vector.broadcast %c20_i32 : i32 to vector<2x22x22xi32>
    %11 = arith.cmpi slt, %6, %10 : vector<2x22x22xi32>
    %12 = arith.andi %9, %11 : vector<2x22x22xi1>
    %c2_i32_9 = arith.constant 2 : i32
    %13 = vector.broadcast %c2_i32_9 : i32 to vector<2x22x22xi32>
    %14 = arith.cmpi sge, %7, %13 : vector<2x22x22xi32>
    %15 = arith.andi %12, %14 : vector<2x22x22xi1>
    %c20_i32_10 = arith.constant 20 : i32
    %16 = vector.broadcast %c20_i32_10 : i32 to vector<2x22x22xi32>
    %17 = arith.cmpi slt, %7, %16 : vector<2x22x22xi32>
    %18 = arith.andi %15, %17 : vector<2x22x22xi1>
    %c0_11 = arith.constant 0 : index
    %19 = memref.load %arg0[%c0_11] : memref<27xf32, #tpu.memory_space<smem>>
    %20 = vector.broadcast %19 : f32 to vector<2x22x22xf32>
    %21 = arith.mulf %1, %20 : vector<2x22x22xf32>
    %c1_12 = arith.constant 1 : index
    %22 = memref.load %arg0[%c1_12] : memref<27xf32, #tpu.memory_space<smem>>
    %23 = vector.broadcast %22 : f32 to vector<2x22x22xf32>
    %24 = arith.mulf %3, %23 : vector<2x22x22xf32>
    %25 = arith.addf %21, %24 : vector<2x22x22xf32>
    %c2_13 = arith.constant 2 : index
    %26 = memref.load %arg0[%c2_13] : memref<27xf32, #tpu.memory_space<smem>>
    %27 = vector.broadcast %26 : f32 to vector<2x22x22xf32>
    %28 = arith.mulf %5, %27 : vector<2x22x22xf32>
    %29 = arith.addf %25, %28 : vector<2x22x22xf32>
    %c0_14 = arith.constant 0 : index
    %30 = memref.load %arg1[%c0_14] : memref<9xf32, #tpu.memory_space<smem>>
    %31 = vector.broadcast %30 : f32 to vector<2x22x22xf32>
    %32 = arith.addf %29, %31 : vector<2x22x22xf32>
    %cst = arith.constant 3.000000e+00 : f32
    %33 = vector.broadcast %cst : f32 to vector<2x22x22xf32>
    %34 = arith.addf %32, %33 : vector<2x22x22xf32>
    %cst_15 = arith.constant 0.000000e+00 : f32
    %cst_16 = arith.constant 6.000000e+00 : f32
    %35 = vector.broadcast %cst_15 : f32 to vector<2x22x22xf32>
    %36 = arith.maximumf %35, %34 : vector<2x22x22xf32>
    %37 = vector.broadcast %cst_16 : f32 to vector<2x22x22xf32>
    %38 = arith.minimumf %37, %36 : vector<2x22x22xf32>
    %39 = arith.mulf %32, %38 : vector<2x22x22xf32>
    %cst_17 = arith.constant 0.166666672 : f32
    %40 = vector.broadcast %cst_17 : f32 to vector<2x22x22xf32>
    %41 = arith.mulf %39, %40 : vector<2x22x22xf32>
    %cst_18 = arith.constant 0.000000e+00 : f32
    %42 = vector.broadcast %cst_18 : f32 to vector<2x22x22xf32>
    %43 = arith.select %18, %41, %42 : vector<2x22x22xi1>, vector<2x22x22xf32>
    %44 = vector.shape_cast %43 : vector<2x22x22xf32> to vector<1x2x22x22xf32>
    %cst_19 = arith.constant dense<0.000000e+00> : vector<1xf32>
    %45 = vector.multi_reduction <add>, %44, %cst_19 [1, 2, 3] : vector<1x2x22x22xf32> to vector<1xf32>
    %46 = vector.shape_cast %45 : vector<1xf32> to vector<1x1x1x1xf32>
    %47 = vector.extract %46[0, 0, 0, 0] : f32 from vector<1x1x1x1xf32>
    %48 = vector.broadcast %47 : f32 to vector<1x1x1xf32>
    %49 = arith.mulf %43, %43 : vector<2x22x22xf32>
    %50 = vector.shape_cast %49 : vector<2x22x22xf32> to vector<1x2x22x22xf32>
    %cst_20 = arith.constant dense<0.000000e+00> : vector<1xf32>
    %51 = vector.multi_reduction <add>, %50, %cst_20 [1, 2, 3] : vector<1x2x22x22xf32> to vector<1xf32>
    %52 = vector.shape_cast %51 : vector<1xf32> to vector<1x1x1x1xf32>
    %53 = vector.extract %52[0, 0, 0, 0] : f32 from vector<1x1x1x1xf32>
    %54 = vector.broadcast %53 : f32 to vector<1x1x1xf32>
    %cst_21 = arith.constant 0.00154320989 : f32
    %55 = vector.broadcast %cst_21 : f32 to vector<1x1x1xf32>
    %56 = arith.mulf %48, %55 : vector<1x1x1xf32>
    %cst_22 = arith.constant 0.00154320989 : f32
    %57 = vector.broadcast %cst_22 : f32 to vector<1x1x1xf32>
    %58 = arith.mulf %54, %57 : vector<1x1x1xf32>
    %59 = arith.mulf %56, %56 : vector<1x1x1xf32>
    %60 = arith.subf %58, %59 : vector<1x1x1xf32>
    %cst_23 = arith.constant 9.99999974E-6 : f32
    %61 = vector.broadcast %cst_23 : f32 to vector<1x1x1xf32>
    %62 = arith.addf %60, %61 : vector<1x1x1xf32>
    %63 = math.rsqrt %62 : vector<1x1x1xf32>
    %c0_24 = arith.constant 0 : index
    %64 = memref.load %arg2[%c0_24] : memref<9xf32, #tpu.memory_space<smem>>
    %65 = vector.broadcast %64 : f32 to vector<1x1x1xf32>
    %66 = arith.mulf %63, %65 : vector<1x1x1xf32>
    %67 = vector.broadcast %56 : vector<1x1x1xf32> to vector<2x22x22xf32>
    %68 = arith.subf %41, %67 : vector<2x22x22xf32>
    %69 = vector.broadcast %66 : vector<1x1x1xf32> to vector<2x22x22xf32>
    %70 = arith.mulf %68, %69 : vector<2x22x22xf32>
    %c0_25 = arith.constant 0 : index
    %71 = memref.load %arg3[%c0_25] : memref<9xf32, #tpu.memory_space<smem>>
    %72 = vector.broadcast %71 : f32 to vector<2x22x22xf32>
    %73 = arith.addf %70, %72 : vector<2x22x22xf32>
    %cst_26 = arith.constant 0.000000e+00 : f32
    %cst_27 = arith.constant 6.000000e+00 : f32
    %74 = vector.broadcast %cst_26 : f32 to vector<2x22x22xf32>
    %75 = arith.maximumf %74, %73 : vector<2x22x22xf32>
    %76 = vector.broadcast %cst_27 : f32 to vector<2x22x22xf32>
    %77 = arith.minimumf %76, %75 : vector<2x22x22xf32>
    %78 = arith.mulf %41, %77 : vector<2x22x22xf32>
    %cst_28 = arith.constant 0.166666672 : f32
    %79 = vector.broadcast %cst_28 : f32 to vector<2x22x22xf32>
    %80 = arith.mulf %78, %79 : vector<2x22x22xf32>
    %cst_29 = arith.constant 0.000000e+00 : f32
    %81 = vector.broadcast %cst_29 : f32 to vector<2x22x22xf32>
    %82 = arith.select %18, %80, %81 : vector<2x22x22xi1>, vector<2x22x22xf32>
    %c3 = arith.constant 3 : index
    %83 = memref.load %arg0[%c3] : memref<27xf32, #tpu.memory_space<smem>>
    %84 = vector.broadcast %83 : f32 to vector<2x22x22xf32>
    %85 = arith.mulf %1, %84 : vector<2x22x22xf32>
    %c4 = arith.constant 4 : index
    %86 = memref.load %arg0[%c4] : memref<27xf32, #tpu.memory_space<smem>>
    %87 = vector.broadcast %86 : f32 to vector<2x22x22xf32>
    %88 = arith.mulf %3, %87 : vector<2x22x22xf32>
    %89 = arith.addf %85, %88 : vector<2x22x22xf32>
    %c5 = arith.constant 5 : index
    %90 = memref.load %arg0[%c5] : memref<27xf32, #tpu.memory_space<smem>>
    %91 = vector.broadcast %90 : f32 to vector<2x22x22xf32>
    %92 = arith.mulf %5, %91 : vector<2x22x22xf32>
    %93 = arith.addf %89, %92 : vector<2x22x22xf32>
    %c1_30 = arith.constant 1 : index
    %94 = memref.load %arg1[%c1_30] : memref<9xf32, #tpu.memory_space<smem>>
    %95 = vector.broadcast %94 : f32 to vector<2x22x22xf32>
    %96 = arith.addf %93, %95 : vector<2x22x22xf32>
    %cst_31 = arith.constant 3.000000e+00 : f32
    %97 = vector.broadcast %cst_31 : f32 to vector<2x22x22xf32>
    %98 = arith.addf %96, %97 : vector<2x22x22xf32>
    %cst_32 = arith.constant 0.000000e+00 : f32
    %cst_33 = arith.constant 6.000000e+00 : f32
    %99 = vector.broadcast %cst_32 : f32 to vector<2x22x22xf32>
    %100 = arith.maximumf %99, %98 : vector<2x22x22xf32>
    %101 = vector.broadcast %cst_33 : f32 to vector<2x22x22xf32>
    %102 = arith.minimumf %101, %100 : vector<2x22x22xf32>
    %103 = arith.mulf %96, %102 : vector<2x22x22xf32>
    %cst_34 = arith.constant 0.166666672 : f32
    %104 = vector.broadcast %cst_34 : f32 to vector<2x22x22xf32>
    %105 = arith.mulf %103, %104 : vector<2x22x22xf32>
    %cst_35 = arith.constant 0.000000e+00 : f32
    %106 = vector.broadcast %cst_35 : f32 to vector<2x22x22xf32>
    %107 = arith.select %18, %105, %106 : vector<2x22x22xi1>, vector<2x22x22xf32>
    %108 = vector.shape_cast %107 : vector<2x22x22xf32> to vector<1x2x22x22xf32>
    %cst_36 = arith.constant dense<0.000000e+00> : vector<1xf32>
    %109 = vector.multi_reduction <add>, %108, %cst_36 [1, 2, 3] : vector<1x2x22x22xf32> to vector<1xf32>
    %110 = vector.shape_cast %109 : vector<1xf32> to vector<1x1x1x1xf32>
    %111 = vector.extract %110[0, 0, 0, 0] : f32 from vector<1x1x1x1xf32>
    %112 = vector.broadcast %111 : f32 to vector<1x1x1xf32>
    %113 = arith.mulf %107, %107 : vector<2x22x22xf32>
    %114 = vector.shape_cast %113 : vector<2x22x22xf32> to vector<1x2x22x22xf32>
    %cst_37 = arith.constant dense<0.000000e+00> : vector<1xf32>
    %115 = vector.multi_reduction <add>, %114, %cst_37 [1, 2, 3] : vector<1x2x22x22xf32> to vector<1xf32>
    %116 = vector.shape_cast %115 : vector<1xf32> to vector<1x1x1x1xf32>
    %117 = vector.extract %116[0, 0, 0, 0] : f32 from vector<1x1x1x1xf32>
    %118 = vector.broadcast %117 : f32 to vector<1x1x1xf32>
    %cst_38 = arith.constant 0.00154320989 : f32
    %119 = vector.broadcast %cst_38 : f32 to vector<1x1x1xf32>
    %120 = arith.mulf %112, %119 : vector<1x1x1xf32>
    %cst_39 = arith.constant 0.00154320989 : f32
    %121 = vector.broadcast %cst_39 : f32 to vector<1x1x1xf32>
    %122 = arith.mulf %118, %121 : vector<1x1x1xf32>
    %123 = arith.mulf %120, %120 : vector<1x1x1xf32>
    %124 = arith.subf %122, %123 : vector<1x1x1xf32>
    %cst_40 = arith.constant 9.99999974E-6 : f32
    %125 = vector.broadcast %cst_40 : f32 to vector<1x1x1xf32>
    %126 = arith.addf %124, %125 : vector<1x1x1xf32>
    %127 = math.rsqrt %126 : vector<1x1x1xf32>
    %c1_41 = arith.constant 1 : index
    %128 = memref.load %arg2[%c1_41] : memref<9xf32, #tpu.memory_space<smem>>
    %129 = vector.broadcast %128 : f32 to vector<1x1x1xf32>
    %130 = arith.mulf %127, %129 : vector<1x1x1xf32>
    %131 = vector.broadcast %120 : vector<1x1x1xf32> to vector<2x22x22xf32>
    %132 = arith.subf %105, %131 : vector<2x22x22xf32>
    %133 = vector.broadcast %130 : vector<1x1x1xf32> to vector<2x22x22xf32>
    %134 = arith.mulf %132, %133 : vector<2x22x22xf32>
    %c1_42 = arith.constant 1 : index
    %135 = memref.load %arg3[%c1_42] : memref<9xf32, #tpu.memory_space<smem>>
    %136 = vector.broadcast %135 : f32 to vector<2x22x22xf32>
    %137 = arith.addf %134, %136 : vector<2x22x22xf32>
    %cst_43 = arith.constant 0.000000e+00 : f32
    %cst_44 = arith.constant 6.000000e+00 : f32
    %138 = vector.broadcast %cst_43 : f32 to vector<2x22x22xf32>
    %139 = arith.maximumf %138, %137 : vector<2x22x22xf32>
    %140 = vector.broadcast %cst_44 : f32 to vector<2x22x22xf32>
    %141 = arith.minimumf %140, %139 : vector<2x22x22xf32>
    %142 = arith.mulf %105, %141 : vector<2x22x22xf32>
    %cst_45 = arith.constant 0.166666672 : f32
    %143 = vector.broadcast %cst_45 : f32 to vector<2x22x22xf32>
    %144 = arith.mulf %142, %143 : vector<2x22x22xf32>
    %cst_46 = arith.constant 0.000000e+00 : f32
    %145 = vector.broadcast %cst_46 : f32 to vector<2x22x22xf32>
    %146 = arith.select %18, %144, %145 : vector<2x22x22xi1>, vector<2x22x22xf32>
    %c6 = arith.constant 6 : index
    %147 = memref.load %arg0[%c6] : memref<27xf32, #tpu.memory_space<smem>>
    %148 = vector.broadcast %147 : f32 to vector<2x22x22xf32>
    %149 = arith.mulf %1, %148 : vector<2x22x22xf32>
    %c7 = arith.constant 7 : index
    %150 = memref.load %arg0[%c7] : memref<27xf32, #tpu.memory_space<smem>>
    %151 = vector.broadcast %150 : f32 to vector<2x22x22xf32>
    %152 = arith.mulf %3, %151 : vector<2x22x22xf32>
    %153 = arith.addf %149, %152 : vector<2x22x22xf32>
    %c8 = arith.constant 8 : index
    %154 = memref.load %arg0[%c8] : memref<27xf32, #tpu.memory_space<smem>>
    %155 = vector.broadcast %154 : f32 to vector<2x22x22xf32>
    %156 = arith.mulf %5, %155 : vector<2x22x22xf32>
    %157 = arith.addf %153, %156 : vector<2x22x22xf32>
    %c2_47 = arith.constant 2 : index
    %158 = memref.load %arg1[%c2_47] : memref<9xf32, #tpu.memory_space<smem>>
    %159 = vector.broadcast %158 : f32 to vector<2x22x22xf32>
    %160 = arith.addf %157, %159 : vector<2x22x22xf32>
    %cst_48 = arith.constant 3.000000e+00 : f32
    %161 = vector.broadcast %cst_48 : f32 to vector<2x22x22xf32>
    %162 = arith.addf %160, %161 : vector<2x22x22xf32>
    %cst_49 = arith.constant 0.000000e+00 : f32
    %cst_50 = arith.constant 6.000000e+00 : f32
    %163 = vector.broadcast %cst_49 : f32 to vector<2x22x22xf32>
    %164 = arith.maximumf %163, %162 : vector<2x22x22xf32>
    %165 = vector.broadcast %cst_50 : f32 to vector<2x22x22xf32>
    %166 = arith.minimumf %165, %164 : vector<2x22x22xf32>
    %167 = arith.mulf %160, %166 : vector<2x22x22xf32>
    %cst_51 = arith.constant 0.166666672 : f32
    %168 = vector.broadcast %cst_51 : f32 to vector<2x22x22xf32>
    %169 = arith.mulf %167, %168 : vector<2x22x22xf32>
    %cst_52 = arith.constant 0.000000e+00 : f32
    %170 = vector.broadcast %cst_52 : f32 to vector<2x22x22xf32>
    %171 = arith.select %18, %169, %170 : vector<2x22x22xi1>, vector<2x22x22xf32>
    %172 = vector.shape_cast %171 : vector<2x22x22xf32> to vector<1x2x22x22xf32>
    %cst_53 = arith.constant dense<0.000000e+00> : vector<1xf32>
    %173 = vector.multi_reduction <add>, %172, %cst_53 [1, 2, 3] : vector<1x2x22x22xf32> to vector<1xf32>
    %174 = vector.shape_cast %173 : vector<1xf32> to vector<1x1x1x1xf32>
    %175 = vector.extract %174[0, 0, 0, 0] : f32 from vector<1x1x1x1xf32>
    %176 = vector.broadcast %175 : f32 to vector<1x1x1xf32>
    %177 = arith.mulf %171, %171 : vector<2x22x22xf32>
    %178 = vector.shape_cast %177 : vector<2x22x22xf32> to vector<1x2x22x22xf32>
    %cst_54 = arith.constant dense<0.000000e+00> : vector<1xf32>
    %179 = vector.multi_reduction <add>, %178, %cst_54 [1, 2, 3] : vector<1x2x22x22xf32> to vector<1xf32>
    %180 = vector.shape_cast %179 : vector<1xf32> to vector<1x1x1x1xf32>
    %181 = vector.extract %180[0, 0, 0, 0] : f32 from vector<1x1x1x1xf32>
    %182 = vector.broadcast %181 : f32 to vector<1x1x1xf32>
    %cst_55 = arith.constant 0.00154320989 : f32
    %183 = vector.broadcast %cst_55 : f32 to vector<1x1x1xf32>
    %184 = arith.mulf %176, %183 : vector<1x1x1xf32>
    %cst_56 = arith.constant 0.00154320989 : f32
    %185 = vector.broadcast %cst_56 : f32 to vector<1x1x1xf32>
    %186 = arith.mulf %182, %185 : vector<1x1x1xf32>
    %187 = arith.mulf %184, %184 : vector<1x1x1xf32>
    %188 = arith.subf %186, %187 : vector<1x1x1xf32>
    %cst_57 = arith.constant 9.99999974E-6 : f32
    %189 = vector.broadcast %cst_57 : f32 to vector<1x1x1xf32>
    %190 = arith.addf %188, %189 : vector<1x1x1xf32>
    %191 = math.rsqrt %190 : vector<1x1x1xf32>
    %c2_58 = arith.constant 2 : index
    %192 = memref.load %arg2[%c2_58] : memref<9xf32, #tpu.memory_space<smem>>
    %193 = vector.broadcast %192 : f32 to vector<1x1x1xf32>
    %194 = arith.mulf %191, %193 : vector<1x1x1xf32>
    %195 = vector.broadcast %184 : vector<1x1x1xf32> to vector<2x22x22xf32>
    %196 = arith.subf %169, %195 : vector<2x22x22xf32>
    %197 = vector.broadcast %194 : vector<1x1x1xf32> to vector<2x22x22xf32>
    %198 = arith.mulf %196, %197 : vector<2x22x22xf32>
    %c2_59 = arith.constant 2 : index
    %199 = memref.load %arg3[%c2_59] : memref<9xf32, #tpu.memory_space<smem>>
    %200 = vector.broadcast %199 : f32 to vector<2x22x22xf32>
    %201 = arith.addf %198, %200 : vector<2x22x22xf32>
    %cst_60 = arith.constant 0.000000e+00 : f32
    %cst_61 = arith.constant 6.000000e+00 : f32
    %202 = vector.broadcast %cst_60 : f32 to vector<2x22x22xf32>
    %203 = arith.maximumf %202, %201 : vector<2x22x22xf32>
    %204 = vector.broadcast %cst_61 : f32 to vector<2x22x22xf32>
    %205 = arith.minimumf %204, %203 : vector<2x22x22xf32>
    %206 = arith.mulf %169, %205 : vector<2x22x22xf32>
    %cst_62 = arith.constant 0.166666672 : f32
    %207 = vector.broadcast %cst_62 : f32 to vector<2x22x22xf32>
    %208 = arith.mulf %206, %207 : vector<2x22x22xf32>
    %cst_63 = arith.constant 0.000000e+00 : f32
    %209 = vector.broadcast %cst_63 : f32 to vector<2x22x22xf32>
    %210 = arith.select %18, %208, %209 : vector<2x22x22xi1>, vector<2x22x22xf32>
    %c1_i32 = arith.constant 1 : i32
    %211 = vector.broadcast %c1_i32 : i32 to vector<2x22x22xi32>
    %212 = arith.cmpi sge, %6, %211 : vector<2x22x22xi32>
    %c21_i32 = arith.constant 21 : i32
    %213 = vector.broadcast %c21_i32 : i32 to vector<2x22x22xi32>
    %214 = arith.cmpi slt, %6, %213 : vector<2x22x22xi32>
    %215 = arith.andi %212, %214 : vector<2x22x22xi1>
    %c1_i32_64 = arith.constant 1 : i32
    %216 = vector.broadcast %c1_i32_64 : i32 to vector<2x22x22xi32>
    %217 = arith.cmpi sge, %7, %216 : vector<2x22x22xi32>
    %218 = arith.andi %215, %217 : vector<2x22x22xi1>
    %c21_i32_65 = arith.constant 21 : i32
    %219 = vector.broadcast %c21_i32_65 : i32 to vector<2x22x22xi32>
    %220 = arith.cmpi slt, %7, %219 : vector<2x22x22xi32>
    %221 = arith.andi %218, %220 : vector<2x22x22xi1>
    %c9 = arith.constant 9 : index
    %222 = memref.load %arg0[%c9] : memref<27xf32, #tpu.memory_space<smem>>
    %223 = vector.broadcast %222 : f32 to vector<2x22x22xf32>
    %224 = arith.mulf %82, %223 : vector<2x22x22xf32>
    %c10 = arith.constant 10 : index
    %225 = memref.load %arg0[%c10] : memref<27xf32, #tpu.memory_space<smem>>
    %226 = vector.broadcast %225 : f32 to vector<2x22x22xf32>
    %227 = arith.mulf %146, %226 : vector<2x22x22xf32>
    %228 = arith.addf %224, %227 : vector<2x22x22xf32>
    %c11 = arith.constant 11 : index
    %229 = memref.load %arg0[%c11] : memref<27xf32, #tpu.memory_space<smem>>
    %230 = vector.broadcast %229 : f32 to vector<2x22x22xf32>
    %231 = arith.mulf %210, %230 : vector<2x22x22xf32>
    %232 = arith.addf %228, %231 : vector<2x22x22xf32>
    %c3_66 = arith.constant 3 : index
    %233 = memref.load %arg1[%c3_66] : memref<9xf32, #tpu.memory_space<smem>>
    %234 = vector.broadcast %233 : f32 to vector<2x22x22xf32>
    %235 = arith.addf %232, %234 : vector<2x22x22xf32>
    %cst_67 = arith.constant 3.000000e+00 : f32
    %236 = vector.broadcast %cst_67 : f32 to vector<2x22x22xf32>
    %237 = arith.addf %235, %236 : vector<2x22x22xf32>
    %cst_68 = arith.constant 0.000000e+00 : f32
    %cst_69 = arith.constant 6.000000e+00 : f32
    %238 = vector.broadcast %cst_68 : f32 to vector<2x22x22xf32>
    %239 = arith.maximumf %238, %237 : vector<2x22x22xf32>
    %240 = vector.broadcast %cst_69 : f32 to vector<2x22x22xf32>
    %241 = arith.minimumf %240, %239 : vector<2x22x22xf32>
    %242 = arith.mulf %235, %241 : vector<2x22x22xf32>
    %cst_70 = arith.constant 0.166666672 : f32
    %243 = vector.broadcast %cst_70 : f32 to vector<2x22x22xf32>
    %244 = arith.mulf %242, %243 : vector<2x22x22xf32>
    %cst_71 = arith.constant 0.000000e+00 : f32
    %245 = vector.broadcast %cst_71 : f32 to vector<2x22x22xf32>
    %246 = arith.select %221, %244, %245 : vector<2x22x22xi1>, vector<2x22x22xf32>
    %247 = vector.shape_cast %246 : vector<2x22x22xf32> to vector<1x2x22x22xf32>
    %cst_72 = arith.constant dense<0.000000e+00> : vector<1xf32>
    %248 = vector.multi_reduction <add>, %247, %cst_72 [1, 2, 3] : vector<1x2x22x22xf32> to vector<1xf32>
    %249 = vector.shape_cast %248 : vector<1xf32> to vector<1x1x1x1xf32>
    %250 = vector.extract %249[0, 0, 0, 0] : f32 from vector<1x1x1x1xf32>
    %251 = vector.broadcast %250 : f32 to vector<1x1x1xf32>
    %252 = arith.mulf %246, %246 : vector<2x22x22xf32>
    %253 = vector.shape_cast %252 : vector<2x22x22xf32> to vector<1x2x22x22xf32>
    %cst_73 = arith.constant dense<0.000000e+00> : vector<1xf32>
    %254 = vector.multi_reduction <add>, %253, %cst_73 [1, 2, 3] : vector<1x2x22x22xf32> to vector<1xf32>
    %255 = vector.shape_cast %254 : vector<1xf32> to vector<1x1x1x1xf32>
    %256 = vector.extract %255[0, 0, 0, 0] : f32 from vector<1x1x1x1xf32>
    %257 = vector.broadcast %256 : f32 to vector<1x1x1xf32>
    %cst_74 = arith.constant 1.250000e-03 : f32
    %258 = vector.broadcast %cst_74 : f32 to vector<1x1x1xf32>
    %259 = arith.mulf %251, %258 : vector<1x1x1xf32>
    %cst_75 = arith.constant 1.250000e-03 : f32
    %260 = vector.broadcast %cst_75 : f32 to vector<1x1x1xf32>
    %261 = arith.mulf %257, %260 : vector<1x1x1xf32>
    %262 = arith.mulf %259, %259 : vector<1x1x1xf32>
    %263 = arith.subf %261, %262 : vector<1x1x1xf32>
    %cst_76 = arith.constant 9.99999974E-6 : f32
    %264 = vector.broadcast %cst_76 : f32 to vector<1x1x1xf32>
    %265 = arith.addf %263, %264 : vector<1x1x1xf32>
    %266 = math.rsqrt %265 : vector<1x1x1xf32>
    %c3_77 = arith.constant 3 : index
    %267 = memref.load %arg2[%c3_77] : memref<9xf32, #tpu.memory_space<smem>>
    %268 = vector.broadcast %267 : f32 to vector<1x1x1xf32>
    %269 = arith.mulf %266, %268 : vector<1x1x1xf32>
    %270 = vector.broadcast %259 : vector<1x1x1xf32> to vector<2x22x22xf32>
    %271 = arith.subf %244, %270 : vector<2x22x22xf32>
    %272 = vector.broadcast %269 : vector<1x1x1xf32> to vector<2x22x22xf32>
    %273 = arith.mulf %271, %272 : vector<2x22x22xf32>
    %c3_78 = arith.constant 3 : index
    %274 = memref.load %arg3[%c3_78] : memref<9xf32, #tpu.memory_space<smem>>
    %275 = vector.broadcast %274 : f32 to vector<2x22x22xf32>
    %276 = arith.addf %273, %275 : vector<2x22x22xf32>
    %cst_79 = arith.constant 0.000000e+00 : f32
    %cst_80 = arith.constant 6.000000e+00 : f32
    %277 = vector.broadcast %cst_79 : f32 to vector<2x22x22xf32>
    %278 = arith.maximumf %277, %276 : vector<2x22x22xf32>
    %279 = vector.broadcast %cst_80 : f32 to vector<2x22x22xf32>
    %280 = arith.minimumf %279, %278 : vector<2x22x22xf32>
    %281 = arith.mulf %244, %280 : vector<2x22x22xf32>
    %cst_81 = arith.constant 0.166666672 : f32
    %282 = vector.broadcast %cst_81 : f32 to vector<2x22x22xf32>
    %283 = arith.mulf %281, %282 : vector<2x22x22xf32>
    %cst_82 = arith.constant 0.000000e+00 : f32
    %284 = vector.broadcast %cst_82 : f32 to vector<2x22x22xf32>
    %285 = arith.select %221, %283, %284 : vector<2x22x22xi1>, vector<2x22x22xf32>
    %c12 = arith.constant 12 : index
    %286 = memref.load %arg0[%c12] : memref<27xf32, #tpu.memory_space<smem>>
    %287 = vector.broadcast %286 : f32 to vector<2x22x22xf32>
    %288 = arith.mulf %82, %287 : vector<2x22x22xf32>
    %c13 = arith.constant 13 : index
    %289 = memref.load %arg0[%c13] : memref<27xf32, #tpu.memory_space<smem>>
    %290 = vector.broadcast %289 : f32 to vector<2x22x22xf32>
    %291 = arith.mulf %146, %290 : vector<2x22x22xf32>
    %292 = arith.addf %288, %291 : vector<2x22x22xf32>
    %c14 = arith.constant 14 : index
    %293 = memref.load %arg0[%c14] : memref<27xf32, #tpu.memory_space<smem>>
    %294 = vector.broadcast %293 : f32 to vector<2x22x22xf32>
    %295 = arith.mulf %210, %294 : vector<2x22x22xf32>
    %296 = arith.addf %292, %295 : vector<2x22x22xf32>
    %c4_83 = arith.constant 4 : index
    %297 = memref.load %arg1[%c4_83] : memref<9xf32, #tpu.memory_space<smem>>
    %298 = vector.broadcast %297 : f32 to vector<2x22x22xf32>
    %299 = arith.addf %296, %298 : vector<2x22x22xf32>
    %cst_84 = arith.constant 3.000000e+00 : f32
    %300 = vector.broadcast %cst_84 : f32 to vector<2x22x22xf32>
    %301 = arith.addf %299, %300 : vector<2x22x22xf32>
    %cst_85 = arith.constant 0.000000e+00 : f32
    %cst_86 = arith.constant 6.000000e+00 : f32
    %302 = vector.broadcast %cst_85 : f32 to vector<2x22x22xf32>
    %303 = arith.maximumf %302, %301 : vector<2x22x22xf32>
    %304 = vector.broadcast %cst_86 : f32 to vector<2x22x22xf32>
    %305 = arith.minimumf %304, %303 : vector<2x22x22xf32>
    %306 = arith.mulf %299, %305 : vector<2x22x22xf32>
    %cst_87 = arith.constant 0.166666672 : f32
    %307 = vector.broadcast %cst_87 : f32 to vector<2x22x22xf32>
    %308 = arith.mulf %306, %307 : vector<2x22x22xf32>
    %cst_88 = arith.constant 0.000000e+00 : f32
    %309 = vector.broadcast %cst_88 : f32 to vector<2x22x22xf32>
    %310 = arith.select %221, %308, %309 : vector<2x22x22xi1>, vector<2x22x22xf32>
    %311 = vector.shape_cast %310 : vector<2x22x22xf32> to vector<1x2x22x22xf32>
    %cst_89 = arith.constant dense<0.000000e+00> : vector<1xf32>
    %312 = vector.multi_reduction <add>, %311, %cst_89 [1, 2, 3] : vector<1x2x22x22xf32> to vector<1xf32>
    %313 = vector.shape_cast %312 : vector<1xf32> to vector<1x1x1x1xf32>
    %314 = vector.extract %313[0, 0, 0, 0] : f32 from vector<1x1x1x1xf32>
    %315 = vector.broadcast %314 : f32 to vector<1x1x1xf32>
    %316 = arith.mulf %310, %310 : vector<2x22x22xf32>
    %317 = vector.shape_cast %316 : vector<2x22x22xf32> to vector<1x2x22x22xf32>
    %cst_90 = arith.constant dense<0.000000e+00> : vector<1xf32>
    %318 = vector.multi_reduction <add>, %317, %cst_90 [1, 2, 3] : vector<1x2x22x22xf32> to vector<1xf32>
    %319 = vector.shape_cast %318 : vector<1xf32> to vector<1x1x1x1xf32>
    %320 = vector.extract %319[0, 0, 0, 0] : f32 from vector<1x1x1x1xf32>
    %321 = vector.broadcast %320 : f32 to vector<1x1x1xf32>
    %cst_91 = arith.constant 1.250000e-03 : f32
    %322 = vector.broadcast %cst_91 : f32 to vector<1x1x1xf32>
    %323 = arith.mulf %315, %322 : vector<1x1x1xf32>
    %cst_92 = arith.constant 1.250000e-03 : f32
    %324 = vector.broadcast %cst_92 : f32 to vector<1x1x1xf32>
    %325 = arith.mulf %321, %324 : vector<1x1x1xf32>
    %326 = arith.mulf %323, %323 : vector<1x1x1xf32>
    %327 = arith.subf %325, %326 : vector<1x1x1xf32>
    %cst_93 = arith.constant 9.99999974E-6 : f32
    %328 = vector.broadcast %cst_93 : f32 to vector<1x1x1xf32>
    %329 = arith.addf %327, %328 : vector<1x1x1xf32>
    %330 = math.rsqrt %329 : vector<1x1x1xf32>
    %c4_94 = arith.constant 4 : index
    %331 = memref.load %arg2[%c4_94] : memref<9xf32, #tpu.memory_space<smem>>
    %332 = vector.broadcast %331 : f32 to vector<1x1x1xf32>
    %333 = arith.mulf %330, %332 : vector<1x1x1xf32>
    %334 = vector.broadcast %323 : vector<1x1x1xf32> to vector<2x22x22xf32>
    %335 = arith.subf %308, %334 : vector<2x22x22xf32>
    %336 = vector.broadcast %333 : vector<1x1x1xf32> to vector<2x22x22xf32>
    %337 = arith.mulf %335, %336 : vector<2x22x22xf32>
    %c4_95 = arith.constant 4 : index
    %338 = memref.load %arg3[%c4_95] : memref<9xf32, #tpu.memory_space<smem>>
    %339 = vector.broadcast %338 : f32 to vector<2x22x22xf32>
    %340 = arith.addf %337, %339 : vector<2x22x22xf32>
    %cst_96 = arith.constant 0.000000e+00 : f32
    %cst_97 = arith.constant 6.000000e+00 : f32
    %341 = vector.broadcast %cst_96 : f32 to vector<2x22x22xf32>
    %342 = arith.maximumf %341, %340 : vector<2x22x22xf32>
    %343 = vector.broadcast %cst_97 : f32 to vector<2x22x22xf32>
    %344 = arith.minimumf %343, %342 : vector<2x22x22xf32>
    %345 = arith.mulf %308, %344 : vector<2x22x22xf32>
    %cst_98 = arith.constant 0.166666672 : f32
    %346 = vector.broadcast %cst_98 : f32 to vector<2x22x22xf32>
    %347 = arith.mulf %345, %346 : vector<2x22x22xf32>
    %cst_99 = arith.constant 0.000000e+00 : f32
    %348 = vector.broadcast %cst_99 : f32 to vector<2x22x22xf32>
    %349 = arith.select %221, %347, %348 : vector<2x22x22xi1>, vector<2x22x22xf32>
    %c15 = arith.constant 15 : index
    %350 = memref.load %arg0[%c15] : memref<27xf32, #tpu.memory_space<smem>>
    %351 = vector.broadcast %350 : f32 to vector<2x22x22xf32>
    %352 = arith.mulf %82, %351 : vector<2x22x22xf32>
    %c16 = arith.constant 16 : index
    %353 = memref.load %arg0[%c16] : memref<27xf32, #tpu.memory_space<smem>>
    %354 = vector.broadcast %353 : f32 to vector<2x22x22xf32>
    %355 = arith.mulf %146, %354 : vector<2x22x22xf32>
    %356 = arith.addf %352, %355 : vector<2x22x22xf32>
    %c17 = arith.constant 17 : index
    %357 = memref.load %arg0[%c17] : memref<27xf32, #tpu.memory_space<smem>>
    %358 = vector.broadcast %357 : f32 to vector<2x22x22xf32>
    %359 = arith.mulf %210, %358 : vector<2x22x22xf32>
    %360 = arith.addf %356, %359 : vector<2x22x22xf32>
    %c5_100 = arith.constant 5 : index
    %361 = memref.load %arg1[%c5_100] : memref<9xf32, #tpu.memory_space<smem>>
    %362 = vector.broadcast %361 : f32 to vector<2x22x22xf32>
    %363 = arith.addf %360, %362 : vector<2x22x22xf32>
    %cst_101 = arith.constant 3.000000e+00 : f32
    %364 = vector.broadcast %cst_101 : f32 to vector<2x22x22xf32>
    %365 = arith.addf %363, %364 : vector<2x22x22xf32>
    %cst_102 = arith.constant 0.000000e+00 : f32
    %cst_103 = arith.constant 6.000000e+00 : f32
    %366 = vector.broadcast %cst_102 : f32 to vector<2x22x22xf32>
    %367 = arith.maximumf %366, %365 : vector<2x22x22xf32>
    %368 = vector.broadcast %cst_103 : f32 to vector<2x22x22xf32>
    %369 = arith.minimumf %368, %367 : vector<2x22x22xf32>
    %370 = arith.mulf %363, %369 : vector<2x22x22xf32>
    %cst_104 = arith.constant 0.166666672 : f32
    %371 = vector.broadcast %cst_104 : f32 to vector<2x22x22xf32>
    %372 = arith.mulf %370, %371 : vector<2x22x22xf32>
    %cst_105 = arith.constant 0.000000e+00 : f32
    %373 = vector.broadcast %cst_105 : f32 to vector<2x22x22xf32>
    %374 = arith.select %221, %372, %373 : vector<2x22x22xi1>, vector<2x22x22xf32>
    %375 = vector.shape_cast %374 : vector<2x22x22xf32> to vector<1x2x22x22xf32>
    %cst_106 = arith.constant dense<0.000000e+00> : vector<1xf32>
    %376 = vector.multi_reduction <add>, %375, %cst_106 [1, 2, 3] : vector<1x2x22x22xf32> to vector<1xf32>
    %377 = vector.shape_cast %376 : vector<1xf32> to vector<1x1x1x1xf32>
    %378 = vector.extract %377[0, 0, 0, 0] : f32 from vector<1x1x1x1xf32>
    %379 = vector.broadcast %378 : f32 to vector<1x1x1xf32>
    %380 = arith.mulf %374, %374 : vector<2x22x22xf32>
    %381 = vector.shape_cast %380 : vector<2x22x22xf32> to vector<1x2x22x22xf32>
    %cst_107 = arith.constant dense<0.000000e+00> : vector<1xf32>
    %382 = vector.multi_reduction <add>, %381, %cst_107 [1, 2, 3] : vector<1x2x22x22xf32> to vector<1xf32>
    %383 = vector.shape_cast %382 : vector<1xf32> to vector<1x1x1x1xf32>
    %384 = vector.extract %383[0, 0, 0, 0] : f32 from vector<1x1x1x1xf32>
    %385 = vector.broadcast %384 : f32 to vector<1x1x1xf32>
    %cst_108 = arith.constant 1.250000e-03 : f32
    %386 = vector.broadcast %cst_108 : f32 to vector<1x1x1xf32>
    %387 = arith.mulf %379, %386 : vector<1x1x1xf32>
    %cst_109 = arith.constant 1.250000e-03 : f32
    %388 = vector.broadcast %cst_109 : f32 to vector<1x1x1xf32>
    %389 = arith.mulf %385, %388 : vector<1x1x1xf32>
    %390 = arith.mulf %387, %387 : vector<1x1x1xf32>
    %391 = arith.subf %389, %390 : vector<1x1x1xf32>
    %cst_110 = arith.constant 9.99999974E-6 : f32
    %392 = vector.broadcast %cst_110 : f32 to vector<1x1x1xf32>
    %393 = arith.addf %391, %392 : vector<1x1x1xf32>
    %394 = math.rsqrt %393 : vector<1x1x1xf32>
    %c5_111 = arith.constant 5 : index
    %395 = memref.load %arg2[%c5_111] : memref<9xf32, #tpu.memory_space<smem>>
    %396 = vector.broadcast %395 : f32 to vector<1x1x1xf32>
    %397 = arith.mulf %394, %396 : vector<1x1x1xf32>
    %398 = vector.broadcast %387 : vector<1x1x1xf32> to vector<2x22x22xf32>
    %399 = arith.subf %372, %398 : vector<2x22x22xf32>
    %400 = vector.broadcast %397 : vector<1x1x1xf32> to vector<2x22x22xf32>
    %401 = arith.mulf %399, %400 : vector<2x22x22xf32>
    %c5_112 = arith.constant 5 : index
    %402 = memref.load %arg3[%c5_112] : memref<9xf32, #tpu.memory_space<smem>>
    %403 = vector.broadcast %402 : f32 to vector<2x22x22xf32>
    %404 = arith.addf %401, %403 : vector<2x22x22xf32>
    %cst_113 = arith.constant 0.000000e+00 : f32
    %cst_114 = arith.constant 6.000000e+00 : f32
    %405 = vector.broadcast %cst_113 : f32 to vector<2x22x22xf32>
    %406 = arith.maximumf %405, %404 : vector<2x22x22xf32>
    %407 = vector.broadcast %cst_114 : f32 to vector<2x22x22xf32>
    %408 = arith.minimumf %407, %406 : vector<2x22x22xf32>
    %409 = arith.mulf %372, %408 : vector<2x22x22xf32>
    %cst_115 = arith.constant 0.166666672 : f32
    %410 = vector.broadcast %cst_115 : f32 to vector<2x22x22xf32>
    %411 = arith.mulf %409, %410 : vector<2x22x22xf32>
    %cst_116 = arith.constant 0.000000e+00 : f32
    %412 = vector.broadcast %cst_116 : f32 to vector<2x22x22xf32>
    %413 = arith.select %221, %411, %412 : vector<2x22x22xi1>, vector<2x22x22xf32>
    %c18 = arith.constant 18 : index
    %414 = memref.load %arg0[%c18] : memref<27xf32, #tpu.memory_space<smem>>
    %415 = vector.broadcast %414 : f32 to vector<2x22x22xf32>
    %416 = arith.mulf %285, %415 : vector<2x22x22xf32>
    %c19 = arith.constant 19 : index
    %417 = memref.load %arg0[%c19] : memref<27xf32, #tpu.memory_space<smem>>
    %418 = vector.broadcast %417 : f32 to vector<2x22x22xf32>
    %419 = arith.mulf %349, %418 : vector<2x22x22xf32>
    %420 = arith.addf %416, %419 : vector<2x22x22xf32>
    %c20 = arith.constant 20 : index
    %421 = memref.load %arg0[%c20] : memref<27xf32, #tpu.memory_space<smem>>
    %422 = vector.broadcast %421 : f32 to vector<2x22x22xf32>
    %423 = arith.mulf %413, %422 : vector<2x22x22xf32>
    %424 = arith.addf %420, %423 : vector<2x22x22xf32>
    %c6_117 = arith.constant 6 : index
    %425 = memref.load %arg1[%c6_117] : memref<9xf32, #tpu.memory_space<smem>>
    %426 = vector.broadcast %425 : f32 to vector<2x22x22xf32>
    %427 = arith.addf %424, %426 : vector<2x22x22xf32>
    %cst_118 = arith.constant 3.000000e+00 : f32
    %428 = vector.broadcast %cst_118 : f32 to vector<2x22x22xf32>
    %429 = arith.addf %427, %428 : vector<2x22x22xf32>
    %cst_119 = arith.constant 0.000000e+00 : f32
    %cst_120 = arith.constant 6.000000e+00 : f32
    %430 = vector.broadcast %cst_119 : f32 to vector<2x22x22xf32>
    %431 = arith.maximumf %430, %429 : vector<2x22x22xf32>
    %432 = vector.broadcast %cst_120 : f32 to vector<2x22x22xf32>
    %433 = arith.minimumf %432, %431 : vector<2x22x22xf32>
    %434 = arith.mulf %427, %433 : vector<2x22x22xf32>
    %cst_121 = arith.constant 0.166666672 : f32
    %435 = vector.broadcast %cst_121 : f32 to vector<2x22x22xf32>
    %436 = arith.mulf %434, %435 : vector<2x22x22xf32>
    %437 = vector.shape_cast %436 : vector<2x22x22xf32> to vector<1x2x22x22xf32>
    %cst_122 = arith.constant dense<0.000000e+00> : vector<1xf32>
    %438 = vector.multi_reduction <add>, %437, %cst_122 [1, 2, 3] : vector<1x2x22x22xf32> to vector<1xf32>
    %439 = vector.shape_cast %438 : vector<1xf32> to vector<1x1x1x1xf32>
    %440 = vector.extract %439[0, 0, 0, 0] : f32 from vector<1x1x1x1xf32>
    %441 = vector.broadcast %440 : f32 to vector<1x1x1xf32>
    %442 = arith.mulf %436, %436 : vector<2x22x22xf32>
    %443 = vector.shape_cast %442 : vector<2x22x22xf32> to vector<1x2x22x22xf32>
    %cst_123 = arith.constant dense<0.000000e+00> : vector<1xf32>
    %444 = vector.multi_reduction <add>, %443, %cst_123 [1, 2, 3] : vector<1x2x22x22xf32> to vector<1xf32>
    %445 = vector.shape_cast %444 : vector<1xf32> to vector<1x1x1x1xf32>
    %446 = vector.extract %445[0, 0, 0, 0] : f32 from vector<1x1x1x1xf32>
    %447 = vector.broadcast %446 : f32 to vector<1x1x1xf32>
    %cst_124 = arith.constant 0.00103305781 : f32
    %448 = vector.broadcast %cst_124 : f32 to vector<1x1x1xf32>
    %449 = arith.mulf %441, %448 : vector<1x1x1xf32>
    %cst_125 = arith.constant 0.00103305781 : f32
    %450 = vector.broadcast %cst_125 : f32 to vector<1x1x1xf32>
    %451 = arith.mulf %447, %450 : vector<1x1x1xf32>
    %452 = arith.mulf %449, %449 : vector<1x1x1xf32>
    %453 = arith.subf %451, %452 : vector<1x1x1xf32>
    %cst_126 = arith.constant 9.99999974E-6 : f32
    %454 = vector.broadcast %cst_126 : f32 to vector<1x1x1xf32>
    %455 = arith.addf %453, %454 : vector<1x1x1xf32>
    %456 = math.rsqrt %455 : vector<1x1x1xf32>
    %c6_127 = arith.constant 6 : index
    %457 = memref.load %arg2[%c6_127] : memref<9xf32, #tpu.memory_space<smem>>
    %458 = vector.broadcast %457 : f32 to vector<1x1x1xf32>
    %459 = arith.mulf %456, %458 : vector<1x1x1xf32>
    %460 = vector.broadcast %449 : vector<1x1x1xf32> to vector<2x22x22xf32>
    %461 = arith.subf %436, %460 : vector<2x22x22xf32>
    %462 = vector.broadcast %459 : vector<1x1x1xf32> to vector<2x22x22xf32>
    %463 = arith.mulf %461, %462 : vector<2x22x22xf32>
    %c6_128 = arith.constant 6 : index
    %464 = memref.load %arg3[%c6_128] : memref<9xf32, #tpu.memory_space<smem>>
    %465 = vector.broadcast %464 : f32 to vector<2x22x22xf32>
    %466 = arith.addf %463, %465 : vector<2x22x22xf32>
    %cst_129 = arith.constant 0.000000e+00 : f32
    %cst_130 = arith.constant 6.000000e+00 : f32
    %467 = vector.broadcast %cst_129 : f32 to vector<2x22x22xf32>
    %468 = arith.maximumf %467, %466 : vector<2x22x22xf32>
    %469 = vector.broadcast %cst_130 : f32 to vector<2x22x22xf32>
    %470 = arith.minimumf %469, %468 : vector<2x22x22xf32>
    %471 = arith.mulf %436, %470 : vector<2x22x22xf32>
    %cst_131 = arith.constant 0.166666672 : f32
    %472 = vector.broadcast %cst_131 : f32 to vector<2x22x22xf32>
    %473 = arith.mulf %471, %472 : vector<2x22x22xf32>
    %c21 = arith.constant 21 : index
    %474 = memref.load %arg0[%c21] : memref<27xf32, #tpu.memory_space<smem>>
    %475 = vector.broadcast %474 : f32 to vector<2x22x22xf32>
    %476 = arith.mulf %285, %475 : vector<2x22x22xf32>
    %c22 = arith.constant 22 : index
    %477 = memref.load %arg0[%c22] : memref<27xf32, #tpu.memory_space<smem>>
    %478 = vector.broadcast %477 : f32 to vector<2x22x22xf32>
    %479 = arith.mulf %349, %478 : vector<2x22x22xf32>
    %480 = arith.addf %476, %479 : vector<2x22x22xf32>
    %c23 = arith.constant 23 : index
    %481 = memref.load %arg0[%c23] : memref<27xf32, #tpu.memory_space<smem>>
    %482 = vector.broadcast %481 : f32 to vector<2x22x22xf32>
    %483 = arith.mulf %413, %482 : vector<2x22x22xf32>
    %484 = arith.addf %480, %483 : vector<2x22x22xf32>
    %c7_132 = arith.constant 7 : index
    %485 = memref.load %arg1[%c7_132] : memref<9xf32, #tpu.memory_space<smem>>
    %486 = vector.broadcast %485 : f32 to vector<2x22x22xf32>
    %487 = arith.addf %484, %486 : vector<2x22x22xf32>
    %cst_133 = arith.constant 3.000000e+00 : f32
    %488 = vector.broadcast %cst_133 : f32 to vector<2x22x22xf32>
    %489 = arith.addf %487, %488 : vector<2x22x22xf32>
    %cst_134 = arith.constant 0.000000e+00 : f32
    %cst_135 = arith.constant 6.000000e+00 : f32
    %490 = vector.broadcast %cst_134 : f32 to vector<2x22x22xf32>
    %491 = arith.maximumf %490, %489 : vector<2x22x22xf32>
    %492 = vector.broadcast %cst_135 : f32 to vector<2x22x22xf32>
    %493 = arith.minimumf %492, %491 : vector<2x22x22xf32>
    %494 = arith.mulf %487, %493 : vector<2x22x22xf32>
    %cst_136 = arith.constant 0.166666672 : f32
    %495 = vector.broadcast %cst_136 : f32 to vector<2x22x22xf32>
    %496 = arith.mulf %494, %495 : vector<2x22x22xf32>
    %497 = vector.shape_cast %496 : vector<2x22x22xf32> to vector<1x2x22x22xf32>
    %cst_137 = arith.constant dense<0.000000e+00> : vector<1xf32>
    %498 = vector.multi_reduction <add>, %497, %cst_137 [1, 2, 3] : vector<1x2x22x22xf32> to vector<1xf32>
    %499 = vector.shape_cast %498 : vector<1xf32> to vector<1x1x1x1xf32>
    %500 = vector.extract %499[0, 0, 0, 0] : f32 from vector<1x1x1x1xf32>
    %501 = vector.broadcast %500 : f32 to vector<1x1x1xf32>
    %502 = arith.mulf %496, %496 : vector<2x22x22xf32>
    %503 = vector.shape_cast %502 : vector<2x22x22xf32> to vector<1x2x22x22xf32>
    %cst_138 = arith.constant dense<0.000000e+00> : vector<1xf32>
    %504 = vector.multi_reduction <add>, %503, %cst_138 [1, 2, 3] : vector<1x2x22x22xf32> to vector<1xf32>
    %505 = vector.shape_cast %504 : vector<1xf32> to vector<1x1x1x1xf32>
    %506 = vector.extract %505[0, 0, 0, 0] : f32 from vector<1x1x1x1xf32>
    %507 = vector.broadcast %506 : f32 to vector<1x1x1xf32>
    %cst_139 = arith.constant 0.00103305781 : f32
    %508 = vector.broadcast %cst_139 : f32 to vector<1x1x1xf32>
    %509 = arith.mulf %501, %508 : vector<1x1x1xf32>
    %cst_140 = arith.constant 0.00103305781 : f32
    %510 = vector.broadcast %cst_140 : f32 to vector<1x1x1xf32>
    %511 = arith.mulf %507, %510 : vector<1x1x1xf32>
    %512 = arith.mulf %509, %509 : vector<1x1x1xf32>
    %513 = arith.subf %511, %512 : vector<1x1x1xf32>
    %cst_141 = arith.constant 9.99999974E-6 : f32
    %514 = vector.broadcast %cst_141 : f32 to vector<1x1x1xf32>
    %515 = arith.addf %513, %514 : vector<1x1x1xf32>
    %516 = math.rsqrt %515 : vector<1x1x1xf32>
    %c7_142 = arith.constant 7 : index
    %517 = memref.load %arg2[%c7_142] : memref<9xf32, #tpu.memory_space<smem>>
    %518 = vector.broadcast %517 : f32 to vector<1x1x1xf32>
    %519 = arith.mulf %516, %518 : vector<1x1x1xf32>
    %520 = vector.broadcast %509 : vector<1x1x1xf32> to vector<2x22x22xf32>
    %521 = arith.subf %496, %520 : vector<2x22x22xf32>
    %522 = vector.broadcast %519 : vector<1x1x1xf32> to vector<2x22x22xf32>
    %523 = arith.mulf %521, %522 : vector<2x22x22xf32>
    %c7_143 = arith.constant 7 : index
    %524 = memref.load %arg3[%c7_143] : memref<9xf32, #tpu.memory_space<smem>>
    %525 = vector.broadcast %524 : f32 to vector<2x22x22xf32>
    %526 = arith.addf %523, %525 : vector<2x22x22xf32>
    %cst_144 = arith.constant 0.000000e+00 : f32
    %cst_145 = arith.constant 6.000000e+00 : f32
    %527 = vector.broadcast %cst_144 : f32 to vector<2x22x22xf32>
    %528 = arith.maximumf %527, %526 : vector<2x22x22xf32>
    %529 = vector.broadcast %cst_145 : f32 to vector<2x22x22xf32>
    %530 = arith.minimumf %529, %528 : vector<2x22x22xf32>
    %531 = arith.mulf %496, %530 : vector<2x22x22xf32>
    %cst_146 = arith.constant 0.166666672 : f32
    %532 = vector.broadcast %cst_146 : f32 to vector<2x22x22xf32>
    %533 = arith.mulf %531, %532 : vector<2x22x22xf32>
    %c24 = arith.constant 24 : index
    %534 = memref.load %arg0[%c24] : memref<27xf32, #tpu.memory_space<smem>>
    %535 = vector.broadcast %534 : f32 to vector<2x22x22xf32>
    %536 = arith.mulf %285, %535 : vector<2x22x22xf32>
    %c25 = arith.constant 25 : index
    %537 = memref.load %arg0[%c25] : memref<27xf32, #tpu.memory_space<smem>>
    %538 = vector.broadcast %537 : f32 to vector<2x22x22xf32>
    %539 = arith.mulf %349, %538 : vector<2x22x22xf32>
    %540 = arith.addf %536, %539 : vector<2x22x22xf32>
    %c26 = arith.constant 26 : index
    %541 = memref.load %arg0[%c26] : memref<27xf32, #tpu.memory_space<smem>>
    %542 = vector.broadcast %541 : f32 to vector<2x22x22xf32>
    %543 = arith.mulf %413, %542 : vector<2x22x22xf32>
    %544 = arith.addf %540, %543 : vector<2x22x22xf32>
    %c8_147 = arith.constant 8 : index
    %545 = memref.load %arg1[%c8_147] : memref<9xf32, #tpu.memory_space<smem>>
    %546 = vector.broadcast %545 : f32 to vector<2x22x22xf32>
    %547 = arith.addf %544, %546 : vector<2x22x22xf32>
    %cst_148 = arith.constant 3.000000e+00 : f32
    %548 = vector.broadcast %cst_148 : f32 to vector<2x22x22xf32>
    %549 = arith.addf %547, %548 : vector<2x22x22xf32>
    %cst_149 = arith.constant 0.000000e+00 : f32
    %cst_150 = arith.constant 6.000000e+00 : f32
    %550 = vector.broadcast %cst_149 : f32 to vector<2x22x22xf32>
    %551 = arith.maximumf %550, %549 : vector<2x22x22xf32>
    %552 = vector.broadcast %cst_150 : f32 to vector<2x22x22xf32>
    %553 = arith.minimumf %552, %551 : vector<2x22x22xf32>
    %554 = arith.mulf %547, %553 : vector<2x22x22xf32>
    %cst_151 = arith.constant 0.166666672 : f32
    %555 = vector.broadcast %cst_151 : f32 to vector<2x22x22xf32>
    %556 = arith.mulf %554, %555 : vector<2x22x22xf32>
    %557 = vector.shape_cast %556 : vector<2x22x22xf32> to vector<1x2x22x22xf32>
    %cst_152 = arith.constant dense<0.000000e+00> : vector<1xf32>
    %558 = vector.multi_reduction <add>, %557, %cst_152 [1, 2, 3] : vector<1x2x22x22xf32> to vector<1xf32>
    %559 = vector.shape_cast %558 : vector<1xf32> to vector<1x1x1x1xf32>
    %560 = vector.extract %559[0, 0, 0, 0] : f32 from vector<1x1x1x1xf32>
    %561 = vector.broadcast %560 : f32 to vector<1x1x1xf32>
    %562 = arith.mulf %556, %556 : vector<2x22x22xf32>
    %563 = vector.shape_cast %562 : vector<2x22x22xf32> to vector<1x2x22x22xf32>
    %cst_153 = arith.constant dense<0.000000e+00> : vector<1xf32>
    %564 = vector.multi_reduction <add>, %563, %cst_153 [1, 2, 3] : vector<1x2x22x22xf32> to vector<1xf32>
    %565 = vector.shape_cast %564 : vector<1xf32> to vector<1x1x1x1xf32>
    %566 = vector.extract %565[0, 0, 0, 0] : f32 from vector<1x1x1x1xf32>
    %567 = vector.broadcast %566 : f32 to vector<1x1x1xf32>
    %cst_154 = arith.constant 0.00103305781 : f32
    %568 = vector.broadcast %cst_154 : f32 to vector<1x1x1xf32>
    %569 = arith.mulf %561, %568 : vector<1x1x1xf32>
    %cst_155 = arith.constant 0.00103305781 : f32
    %570 = vector.broadcast %cst_155 : f32 to vector<1x1x1xf32>
    %571 = arith.mulf %567, %570 : vector<1x1x1xf32>
    %572 = arith.mulf %569, %569 : vector<1x1x1xf32>
    %573 = arith.subf %571, %572 : vector<1x1x1xf32>
    %cst_156 = arith.constant 9.99999974E-6 : f32
    %574 = vector.broadcast %cst_156 : f32 to vector<1x1x1xf32>
    %575 = arith.addf %573, %574 : vector<1x1x1xf32>
    %576 = math.rsqrt %575 : vector<1x1x1xf32>
    %c8_157 = arith.constant 8 : index
    %577 = memref.load %arg2[%c8_157] : memref<9xf32, #tpu.memory_space<smem>>
    %578 = vector.broadcast %577 : f32 to vector<1x1x1xf32>
    %579 = arith.mulf %576, %578 : vector<1x1x1xf32>
    %580 = vector.broadcast %569 : vector<1x1x1xf32> to vector<2x22x22xf32>
    %581 = arith.subf %556, %580 : vector<2x22x22xf32>
    %582 = vector.broadcast %579 : vector<1x1x1xf32> to vector<2x22x22xf32>
    %583 = arith.mulf %581, %582 : vector<2x22x22xf32>
    %c8_158 = arith.constant 8 : index
    %584 = memref.load %arg3[%c8_158] : memref<9xf32, #tpu.memory_space<smem>>
    %585 = vector.broadcast %584 : f32 to vector<2x22x22xf32>
    %586 = arith.addf %583, %585 : vector<2x22x22xf32>
    %cst_159 = arith.constant 0.000000e+00 : f32
    %cst_160 = arith.constant 6.000000e+00 : f32
    %587 = vector.broadcast %cst_159 : f32 to vector<2x22x22xf32>
    %588 = arith.maximumf %587, %586 : vector<2x22x22xf32>
    %589 = vector.broadcast %cst_160 : f32 to vector<2x22x22xf32>
    %590 = arith.minimumf %589, %588 : vector<2x22x22xf32>
    %591 = arith.mulf %556, %590 : vector<2x22x22xf32>
    %cst_161 = arith.constant 0.166666672 : f32
    %592 = vector.broadcast %cst_161 : f32 to vector<2x22x22xf32>
    %593 = arith.mulf %591, %592 : vector<2x22x22xf32>
    %c0_162 = arith.constant 0 : index
    %c0_163 = arith.constant 0 : index
    %c0_164 = arith.constant 0 : index
    %c0_165 = arith.constant 0 : index
    %594 = vector.load %arg5[%c0_162, %c0_163, %c0_164, %c0_165] : memref<3x2x22x22xf32, #tpu.memory_space<vmem>>, vector<1x2x22x22xf32>
    %595 = vector.shape_cast %594 : vector<1x2x22x22xf32> to vector<2x22x22xf32>
    %596 = vector.shape_cast %473 : vector<2x22x22xf32> to vector<1x2x22x22xf32>
    tpu.vector_store %arg5[%c0_162, %c0_163, %c0_164, %c0_165], %596 {strides = array<i32>} : memref<3x2x22x22xf32, #tpu.memory_space<vmem>>, vector<1x2x22x22xf32>,
    %c1_166 = arith.constant 1 : index
    %c0_167 = arith.constant 0 : index
    %c0_168 = arith.constant 0 : index
    %c0_169 = arith.constant 0 : index
    %597 = vector.load %arg5[%c1_166, %c0_167, %c0_168, %c0_169] : memref<3x2x22x22xf32, #tpu.memory_space<vmem>>, vector<1x2x22x22xf32>
    %598 = vector.shape_cast %597 : vector<1x2x22x22xf32> to vector<2x22x22xf32>
    %599 = vector.shape_cast %533 : vector<2x22x22xf32> to vector<1x2x22x22xf32>
    tpu.vector_store %arg5[%c1_166, %c0_167, %c0_168, %c0_169], %599 {strides = array<i32>} : memref<3x2x22x22xf32, #tpu.memory_space<vmem>>, vector<1x2x22x22xf32>,
    %c2_170 = arith.constant 2 : index
    %c0_171 = arith.constant 0 : index
    %c0_172 = arith.constant 0 : index
    %c0_173 = arith.constant 0 : index
    %600 = vector.load %arg5[%c2_170, %c0_171, %c0_172, %c0_173] : memref<3x2x22x22xf32, #tpu.memory_space<vmem>>, vector<1x2x22x22xf32>
    %601 = vector.shape_cast %600 : vector<1x2x22x22xf32> to vector<2x22x22xf32>
    %602 = vector.shape_cast %593 : vector<2x22x22xf32> to vector<1x2x22x22xf32>
    tpu.vector_store %arg5[%c2_170, %c0_171, %c0_172, %c0_173], %602 {strides = array<i32>} : memref<3x2x22x22xf32, #tpu.memory_space<vmem>>, vector<1x2x22x22xf32>,
    return
  }
}

</mosaic_0001>

<bundles_post_ra>
// kernel: model_forward.1
= control target key start
LH: loop header
LB: loop body
LE: loop exit
PB: predicated region body
PF: predicated region fallthrough
CT: control target
= control target key end

     0   :  { %10 = vsyncpa [#allocation3], 0  ;;  %s3661_s0 = inlined_call_operand.vmem [shape: f32[27], index: 0, kind: input, shape index: {}]   ;;  %s3662_s1 = inlined_call_operand.vmem [shape: f32[9], index: 1, kind: input, shape index: {}]   ;;  %s3663_s2 = inlined_call_operand.vmem [shape: f32[9], index: 2, kind: input, shape index: {}]   ;;  %s3664_s3 = inlined_call_operand.vmem [shape: f32[9], index: 3, kind: input, shape index: {}]   ;;  %s3665_s4 = inlined_call_operand.vmem [shape: f32[3,2,22,22], index: 4, kind: input, shape index: {}]   ;;  %s3666_s5 = inlined_call_operand.vmem [shape: f32[3,2,22,22], index: 5, kind: output, shape index: {}]  }
   0x1   :  { %11 = vsyncpa [#allocation5], 0  ;;  %s27_s20 = sshll.u32 %s3662_s1, 4  ;;  %s28_s20 = int_to_ptr.vmem [resolvable:$true] %s27_s20 }
   0x2   :  { %12 = vsyncpa [#allocation8], 0  ;;  %s18_s23 = sshll.u32 %s3661_s0, 4  ;;  %s2071_s24 = smov [#allocation4]   ;;  %s19_s23 = int_to_ptr.vmem [resolvable:$true] %s18_s23 }
   0x3   :  { %30 = dma.vmem_to_smem %s28_s20, 16, %s2071_s24, [#allocation5]  }
   0x4   :  { %s2072_s25 = smov [#allocation2]   ;;  %s36_s28 = sshll.u32 %s3663_s2, 4  ;;  %s37_s28 = int_to_ptr.vmem [resolvable:$true] %s36_s28 }
   0x5   :  { %21 = dma.vmem_to_smem %s19_s23, 16, %s2072_s25, [#allocation3]  }
   0x6   :  { %s45_s1 = sshll.u32 %s3664_s3, 4  ;;  %s2073_s6 = smov [#allocation6]   ;;  %s46_s1 = int_to_ptr.vmem [resolvable:$true] %s45_s1 }
   0x7   :  { %39 = dma.vmem_to_smem %s37_s28, 16, %s2073_s6, [#allocation5]  }
   0x8   :  { %s2074_s7 = smov [#allocation7]  }
   0x9   :  { %48 = dma.vmem_to_smem %s46_s1, 16, %s2074_s7, [#allocation8]  }
   0xa   :  { %2065 = dma.done.wait [#allocation3], 16  }
   0xb   :  { %2066 = vsyncadd [#allocation3], 4294967280 }
   0xc   :  { %2067 = dma.done.wait [#allocation5], 32  }
   0xd   :  { %2068 = vsyncadd [#allocation5], 4294967264 }
   0xe   :  { %2069 = dma.done.wait [#allocation8], 16  }
   0xf   :  { %2070 = vsyncadd [#allocation8], 4294967280 }
  0x10   :  { %67 = sfence }
  0x11   :  { %s1905_s0 = sld [smem:[#allocation2 + $0x6]]  ;;  %v2120_v0 = vld [vmem:[%s3665_s4] sm:$0xff]  ;;  %v2125_v1 = vld [vmem:[%s3665_s4 + $0x8] sm:$0xff]  ;;  %v2130_v2 = vld [vmem:[%s3665_s4 + $0x10] sm:$0x3f]  ;;  %v88_v4 = vlaneseq  ;;  %vm191_vm4 = vcmask 179200  }
  0x12   :  { %s1906_s8 = sld [smem:[#allocation2 + $0x7]]  ;;  %v2135_v3 = vld [vmem:[%s3665_s4 + $0x18] sm:$0xff]  ;;  %v2140_v5 = vld [vmem:[%s3665_s4 + $0x20] sm:$0xff]  ;;  %v2145_v6 = vld [vmem:[%s3665_s4 + $0x28] sm:$0x3f]  ;;  %vm195_vm5 = vcmask 177152  }
  0x13   :  { %v2150_v7 = vld [vmem:[%s3665_s4 + $0x30] sm:$0xff]  ;;  %s2152_s21 = sld [smem:[#allocation2 + $0x8]]  ;;  %v2157_v8 = vld [vmem:[%s3665_s4 + $0x38] sm:$0xff]  ;;  %v2162_v9 = vld [vmem:[%s3665_s4 + $0x40] sm:$0x3f]  ;;  %v2185_v18 = vshrl.u32 %v88_v4, 7 }
  0x14   :  { %v2167_v10 = vld [vmem:[%s3665_s4 + $0x48] sm:$0xff]  ;;  %s2169_s28 = sld [smem:[#allocation4 + $0x2]]  ;;  %v2174_v12 = vld [vmem:[%s3665_s4 + $0x50] sm:$0xff]  ;;  %v2179_v13 = vld [vmem:[%s3665_s4 + $0x58] sm:$0x3f]  ;;  %v2215_v30 = vand.u32 127, %v88_v4 }
  0x15   :  { %3681 = vst [vmem:[#allocation12_spill] sm:$0xff] %v2185_v18  ;;  %s2189_s7 = sld [smem:[#allocation2 + $0x3]]  ;;  %v2194_v22 = vld [vmem:[%s3665_s4 + $0x60] sm:$0xff]  ;;  %v2203_v27 = vld [vmem:[%s3665_s4 + $0x68] sm:$0xff]  ;;  %v2208_v28 = vld [vmem:[%s3665_s4 + $0x70] sm:$0x3f] }
  0x16   :  { %v2213_v29 = vld [vmem:[%s3665_s4 + $0x78] sm:$0xff]  ;;  %3682 = vst [vmem:[#allocation13_spill] sm:$0xff] %v2215_v30  ;;  %v2222_v33 = vld [vmem:[%s3665_s4 + $0x80] sm:$0xff]  ;;  %v2227_v34 = vld [vmem:[%s3665_s4 + $0x88] sm:$0x3f]  ;;  %v2230_v39 = vadd.s32 16, %v2185_v18 }
  0x17   :  { %v506_v11 = vstv %s1905_s0  ;;  %s2233_s17 = sld [smem:[#allocation2 + $0x4]]  ;;  %vm94_vm0 = vcmp.ge.s32.totalorder %v2185_v18, 2  ;;  %vm103_vm1 = vcmp.ge.s32.totalorder %v2215_v30, 2  ;;  %vm107_vm3 = vcmp.lt.s32.totalorder %v2215_v30, 20 }
  0x18   :  { %v507_v14 = vmul.f32 %v506_v11, %v2120_v0  ;;  %v508_v15 = vmul.f32 %v506_v11, %v2125_v1  ;;  %v509_v16 = vmul.f32 %v506_v11, %v2130_v2  ;;  %v510_v17 = vmul.f32 %v506_v11, %v2135_v3  ;;  %3683 = vst [vmem:[#allocation14_spill] sm:$0xff] %v2230_v39  ;;  %vm104_vm6 = vmand %vm94_vm0, %vm103_vm1  ;;  %s2289_s4 = sld [smem:[#allocation2 + $0x5]] }
  0x19   :  { %v511_v19 = vmul.f32 %v506_v11, %v2140_v5  ;;  %v512_v20 = vmul.f32 %v506_v11, %v2145_v6  ;;  %v514_v21 = vstv %s1906_s8  ;;  %v528_v42 = vstv %s2152_s21  ;;  %vm2265_vm8 = vmand %vm104_vm6, %vm107_vm3  ;;  %s2315_s18 = sld [smem:[#allocation4 + $0x1]] }
  0x1a   :  { %v515_v23 = vmul.f32 %v2150_v7, %v514_v21  ;;  %v516_v24 = vmul.f32 %v2157_v8, %v514_v21  ;;  %v517_v25 = vmul.f32 %v2162_v9, %v514_v21  ;;  %v518_v26 = vmul.f32 %v2167_v10, %v514_v21  ;;  %vm2275_vm9 = vmand %vm103_vm1, %vm107_vm3  ;;  %s2335_s19 = sld [smem:[#allocation2]] }
  0x1b   :  { %v519_v31 = vmul.f32 %v2174_v12, %v514_v21  ;;  %v520_v32 = vmul.f32 %v2179_v13, %v514_v21  ;;  %v529_v43 = vmul.f32 %v2194_v22, %v528_v42  ;;  %v530_v44 = vmul.f32 %v2203_v27, %v528_v42  ;;  %s2348_s20 = sld [smem:[#allocation2 + $0x1]] }
  0x1c   :  { %v521_v35 = vadd.f32 %v515_v23, %v507_v14  ;;  %v522_v36 = vadd.f32 %v516_v24, %v508_v15  ;;  %v523_v37 = vadd.f32 %v517_v25, %v509_v16  ;;  %v524_v38 = vadd.f32 %v518_v26, %v510_v17  ;;  %s2368_s21 = sld [smem:[#allocation2 + $0x2]] }
  0x1d   :  { %v525_v40 = vadd.f32 %v519_v31, %v511_v19  ;;  %v526_v41 = vadd.f32 %v520_v32, %v512_v20  ;;  %v531_v45 = vmul.f32 %v2208_v28, %v528_v42  ;;  %v532_v46 = vmul.f32 %v2213_v29, %v528_v42  ;;  %s2371_s22 = sld [smem:[#allocation4]] }
  0x1e   :  { %v533_v47 = vmul.f32 %v2222_v33, %v528_v42  ;;  %v534_v48 = vmul.f32 %v2227_v34, %v528_v42  ;;  %v542_v49 = vstv %s2169_s28  ;;  %v535_v50 = vadd.f32 %v529_v43, %v521_v35  ;;  %s2527_s29 = sld [smem:[#allocation6]] }
  0x1f   :  { %v536_v51 = vadd.f32 %v530_v44, %v522_v36  ;;  %v537_v52 = vadd.f32 %v531_v45, %v523_v37  ;;  %v538_v53 = vadd.f32 %v532_v46, %v524_v38  ;;  %v310_v56 = vstv %s2189_s7  ;;  %s2531_s30 = sld [smem:[#allocation6 + $0x1]] }
  0x20   :  { %v539_v54 = vadd.f32 %v533_v47, %v525_v40  ;;  %v540_v55 = vadd.f32 %v534_v48, %v526_v41  ;;  %v543_v57 = vadd.f32 %v542_v49, %v535_v50  ;;  %vm99_vm2 = vcmp.lt.s32.totalorder %v2230_v39, 20  ;;  %s271_s1 = sld [smem:[#allocation7]] }
  0x21   :  { %v544_v58 = vadd.f32 %v542_v49, %v536_v51  ;;  %v545_v59 = vadd.f32 %v542_v49, %v537_v52  ;;  %v546_v60 = vadd.f32 %v542_v49, %v538_v53  ;;  %v311_v17 = vmul.f32 %v310_v56, %v2120_v0  ;;  %vm2259_vm7 = vmand %vm99_vm2, %vm103_vm1  ;;  %s1904_s6 = sld [smem:[#allocation7 + $0x1]] }
  0x22   :  { %v547_v61 = vadd.f32 %v542_v49, %v539_v54  ;;  %v548_v62 = vadd.f32 %v542_v49, %v540_v55  ;;  %v549_v63 = vadd.f32 3.0, %v543_v57  ;;  %v318_v19 = vstv %s2233_s17  ;;  %vm2283_vm10 = vmand %vm2259_vm7, %vm107_vm3  ;;  %s2535_s7 = sld [smem:[#allocation6 + $0x2]] }
  0x23   :  { %v550_v4 = vadd.f32 3.0, %v544_v58  ;;  %v551_v11 = vadd.f32 3.0, %v545_v59  ;;  %v552_v14 = vadd.f32 3.0, %v546_v60  ;;  %v312_v31 = vmul.f32 %v310_v56, %v2125_v1  ;;  %s2578_s0 = sld [smem:[#allocation7 + $0x2]] }
  0x24   :  { %v553_v15 = vadd.f32 3.0, %v547_v61  ;;  %v554_v16 = vadd.f32 3.0, %v548_v62  ;;  %v555_v20 = vmax.f32 %v549_v63, 0.0  ;;  %v313_v32 = vmul.f32 %v310_v56, %v2130_v2  ;;  %s2636_s2 = sld [smem:[#allocation2 + $0xc]] }
  0x25   :  { %v556_v21 = vmax.f32 %v550_v4, 0.0  ;;  %v557_v23 = vmax.f32 %v551_v11, 0.0  ;;  %v558_v24 = vmax.f32 %v552_v14, 0.0  ;;  %v314_v44 = vmul.f32 %v310_v56, %v2135_v3  ;;  %s2644_s9 = sld [smem:[#allocation2 + $0xd]] }
  0x26   :  { %v559_v25 = vmax.f32 %v553_v15, 0.0  ;;  %v560_v26 = vmax.f32 %v554_v16, 0.0  ;;  %v561_v36 = vmin.f32 %v555_v20, 6.0  ;;  %v315_v45 = vmul.f32 %v310_v56, %v2140_v5  ;;  %s2672_s3 = sld [smem:[#allocation2 + $0xe]] }
  0x27   :  { %v562_v37 = vmin.f32 %v556_v21, 6.0  ;;  %v563_v38 = vmin.f32 %v557_v23, 6.0  ;;  %v564_v40 = vmin.f32 %v558_v24, 6.0  ;;  %v316_v54 = vmul.f32 %v310_v56, %v2145_v6  ;;  %s2684_s8 = sld [smem:[#allocation4 + $0x4]] }
  0x28   :  { %v565_v42 = vmin.f32 %v559_v25, 6.0  ;;  %v566_v43 = vmin.f32 %v560_v26, 6.0  ;;  %v567_v47 = vmul.f32 %v561_v36, %v543_v57  ;;  %v319_v55 = vmul.f32 %v2150_v7, %v318_v19  ;;  %s2692_s10 = sld [smem:[#allocation2 + $0x9]] }
  0x29   :  { %v568_v48 = vmul.f32 %v562_v37, %v544_v58  ;;  %v569_v49 = vmul.f32 %v563_v38, %v545_v59  ;;  %v570_v50 = vmul.f32 %v564_v40, %v546_v60  ;;  %v320_v60 = vmul.f32 %v2157_v8, %v318_v19  ;;  %s2704_s11 = sld [smem:[#allocation2 + $0xa]] }
  0x2a   :  { %v571_v52 = vmul.f32 %v565_v42, %v547_v61  ;;  %v572_v53 = vmul.f32 %v566_v43, %v548_v62  ;;  %v2291_v57 = vmul.f32 0.16666667, %v567_v47  ;;  %v321_v56 = vmul.f32 %v2162_v9, %v318_v19  ;;  %s2774_s12 = sld [smem:[#allocation2 + $0xb]] }
  0x2b   :  { %v2293_v58 = vmul.f32 0.16666667, %v568_v48  ;;  %v2295_v59 = vmul.f32 0.16666667, %v569_v49  ;;  %v2298_v63 = vmul.f32 0.16666667, %v570_v50  ;;  %v322_v15 = vmul.f32 %v2167_v10, %v318_v19 }
  0x2c   :  { %v2300_v4 = vmul.f32 0.16666667, %v571_v52  ;;  %v2302_v61 = vmul.f32 0.16666667, %v572_v53  ;;  %v579_v62 = vsel %vm2265_vm8, %v2291_v57, 0.0  ;;  %v323_v26 = vmul.f32 %v2174_v12, %v318_v19  ;;  %s2798_s13 = sld [smem:[#allocation4 + $0x3]] }
  0x2d   :  { %v580_v11 = vsel %vm2275_vm9, %v2293_v58, 0.0  ;;  %v581_v14 = vsel %vm2283_vm10, %v2295_v59, 0.0  ;;  %v582_v16 = vsel %vm2265_vm8, %v2298_v63, 0.0  ;;  %v585_v23 = vsel %vm191_vm4, %v579_v62, 0.0  ;;  %s2818_s14 = sld [smem:[#allocation2 + $0xf]] }
  0x2e   :  { %3692 = vst [vmem:[#allocation15_spill] sm:$0xff] %v2300_v4  ;;  %v2323_v20 = vsel %vm2275_vm9, %v2300_v4, 0.0  ;;  %v2328_v21 = vsel %vm2283_vm10, %v2302_v61, 0.0  ;;  %v586_v24 = vsel %vm191_vm4, %v580_v11, 0.0  ;;  %v588_v25 = vsel %vm195_vm5, %v581_v14, 0.0  ;;  %s2861_s15 = sld [smem:[#allocation2 + $0x10]] }
  0x2f   :  { %3693 = vst [vmem:[#allocation16_spill] sm:$0xff] %v2302_v61  ;;  %v324_v35 = vmul.f32 %v2179_v13, %v318_v19  ;;  %v587_v36 = vadd.f32 %v586_v24, %v585_v23  ;;  %v325_v37 = vadd.f32 %v319_v55, %v311_v17  ;;  %v326_v38 = vadd.f32 %v320_v60, %v312_v31  ;;  %s2911_s16 = sld [smem:[#allocation2 + $0x11]] }
  0x30   :  { %v590_v40 = vsel %vm191_vm4, %v582_v16, 0.0  ;;  %v592_v42 = vsel %vm191_vm4, %v2323_v20, 0.0  ;;  %v594_v43 = vsel %vm195_vm5, %v2328_v21, 0.0  ;;  %v327_v47 = vadd.f32 %v321_v56, %v313_v32  ;;  %s2921_s17 = sld [smem:[#allocation4 + $0x5]] }
  0x31   :  { %v589_v48 = vadd.f32 %v588_v25, %v587_v36  ;;  %v2342_v49 = vmul.f32 %v579_v62, %v579_v62  ;;  %v2344_v19 = vmul.f32 %v580_v11, %v580_v11  ;;  %v2346_v50 = vmul.f32 %v581_v14, %v581_v14 }
  0x32   :  { %v328_v17 = vadd.f32 %v322_v15, %v314_v44  ;;  %v329_v31 = vadd.f32 %v323_v26, %v315_v45  ;;  %v330_v52 = vadd.f32 %v324_v35, %v316_v54  ;;  %v332_v53 = vstv %s2289_s4 }
  0x33   :  { %v591_v55 = vadd.f32 %v590_v40, %v589_v48  ;;  %v333_v60 = vmul.f32 %v2194_v22, %v332_v53  ;;  %v334_v32 = vmul.f32 %v2203_v27, %v332_v53  ;;  %v335_v56 = vmul.f32 %v2208_v28, %v332_v53 }
  0x34   :  { %v336_v62 = vmul.f32 %v2213_v29, %v332_v53  ;;  %v337_v11 = vmul.f32 %v2222_v33, %v332_v53  ;;  %v338_v14 = vmul.f32 %v2227_v34, %v332_v53  ;;  %v346_v23 = vstv %s2315_s18 }
  0x35   :  { %v593_v24 = vadd.f32 %v592_v42, %v591_v55  ;;  %v339_v44 = vadd.f32 %v333_v60, %v325_v37  ;;  %v340_v45 = vadd.f32 %v334_v32, %v326_v38  ;;  %v341_v54 = vadd.f32 %v335_v56, %v327_v47 }
  0x36   :  { %v342_v15 = vadd.f32 %v336_v62, %v328_v17  ;;  %v343_v25 = vadd.f32 %v337_v11, %v329_v31  ;;  %v344_v26 = vadd.f32 %v338_v14, %v330_v52  ;;  %v112_v35 = vstv %s2335_s19 }
  0x37   :  { %v595_v36 = vadd.f32 %v594_v43, %v593_v24  ;;  %v347_v40 = vadd.f32 %v346_v23, %v339_v44  ;;  %v348_v48 = vadd.f32 %v346_v23, %v340_v45  ;;  %v349_v39 = vadd.f32 %v346_v23, %v341_v54 }
  0x38   :  { %v2359_v30 = vmul.f32 %v582_v16, %v582_v16  ;;  %v350_v18 = vadd.f32 %v346_v23, %v342_v15  ;;  %v351_v61 = vadd.f32 %v346_v23, %v343_v25  ;;  %v352_v4 = vadd.f32 %v346_v23, %v344_v26 }
  0x39   :  { %596 = vadd.xlane.f32.xlu2 %v595_v36  ;;  %v353_v53 = vadd.f32 3.0, %v347_v40  ;;  %v354_v42 = vadd.f32 3.0, %v348_v48  ;;  %v355_v37 = vadd.f32 3.0, %v349_v39  ;;  %v120_v38 = vstv %s2348_s20  ;;  %s3003_s20 = sld [smem:[#allocation6 + $0x3]] }
  0x3a   :  { %v356_v47 = vadd.f32 3.0, %v350_v18  ;;  %v357_v17 = vadd.f32 3.0, %v351_v61  ;;  %v358_v55 = vadd.f32 3.0, %v352_v4  ;;  %v113_v31 = vmul.f32 %v112_v35, %v2120_v0 }
  0x3b   :  { %v359_v52 = vmax.f32 %v353_v53, 0.0  ;;  %v360_v43 = vmax.f32 %v354_v42, 0.0  ;;  %v361_v60 = vmax.f32 %v355_v37, 0.0  ;;  %v114_v32 = vmul.f32 %v112_v35, %v2125_v1 }
  0x3c   :  { %v362_v16 = vmax.f32 %v356_v47, 0.0  ;;  %v363_v56 = vmax.f32 %v357_v17, 0.0  ;;  %v364_v62 = vmax.f32 %v358_v55, 0.0  ;;  %v115_v11 = vmul.f32 %v112_v35, %v2130_v2 }
  0x3d   :  { %v365_v14 = vmin.f32 %v359_v52, 6.0  ;;  %v366_v23 = vmin.f32 %v360_v43, 6.0  ;;  %v367_v24 = vmin.f32 %v361_v60, 6.0  ;;  %v116_v44 = vmul.f32 %v112_v35, %v2135_v3 }
  0x3e   :  { %v368_v45 = vmin.f32 %v362_v16, 6.0  ;;  %v369_v54 = vmin.f32 %v363_v56, 6.0  ;;  %v370_v15 = vmin.f32 %v364_v62, 6.0  ;;  %v117_v0 = vmul.f32 %v112_v35, %v2140_v5 }
  0x3f   :  { %v371_v25 = vmul.f32 %v365_v14, %v347_v40  ;;  %v372_v26 = vmul.f32 %v366_v23, %v348_v48  ;;  %v373_v36 = vmul.f32 %v367_v24, %v349_v39  ;;  %v121_v1 = vmul.f32 %v2150_v7, %v120_v38 }
  0x40   :  { %v374_v53 = vmul.f32 %v368_v45, %v350_v18  ;;  %v375_v42 = vmul.f32 %v369_v54, %v351_v61  ;;  %v376_v2 = vmul.f32 %v370_v15, %v352_v4  ;;  %v122_v37 = vmul.f32 %v2157_v8, %v120_v38 }
  0x41   :  { %v2373_v3 = vmul.f32 0.16666667, %v371_v25  ;;  %v2375_v47 = vmul.f32 0.16666667, %v372_v26  ;;  %v2377_v17 = vmul.f32 0.16666667, %v373_v36  ;;  %v123_v5 = vmul.f32 %v2162_v9, %v120_v38 }
  0x42   :  { %v2380_v39 = vmul.f32 0.16666667, %v374_v53  ;;  %v2382_v7 = vmul.f32 0.16666667, %v375_v42  ;;  %v2384_v40 = vmul.f32 0.16666667, %v376_v2  ;;  %v124_v18 = vmul.f32 %v2167_v10, %v120_v38 }
  0x43   :  { %v2390_v8 = vsel %vm2265_vm8, %v2373_v3, 0.0  ;;  %v2395_v4 = vsel %vm2275_vm9, %v2375_v47, 0.0  ;;  %v2400_v9 = vsel %vm2283_vm10, %v2377_v17, 0.0  ;;  %v125_v61 = vmul.f32 %v2174_v12, %v120_v38 }
  0x44   :  { %v2406_v10 = vsel %vm2265_vm8, %v2380_v39, 0.0  ;;  %v2411_v48 = vsel %vm2275_vm9, %v2382_v7, 0.0  ;;  %v2416_v55 = vsel %vm2283_vm10, %v2384_v40, 0.0  ;;  %v389_v52 = vsel %vm191_vm4, %v2390_v8, 0.0 }
  0x45   :  { %v390_v12 = vsel %vm191_vm4, %v2395_v4, 0.0  ;;  %v392_v43 = vsel %vm195_vm5, %v2400_v9, 0.0  ;;  %v118_v60 = vmul.f32 %v112_v35, %v2145_v6  ;;  %v126_v16 = vmul.f32 %v2179_v13, %v120_v38 }
  0x46   :  { %v610_v56 = vmul.f32 %v2323_v20, %v2323_v20  ;;  %v2430_v62 = vmul.f32 %v2328_v21, %v2328_v21  ;;  %v391_v14 = vadd.f32 %v390_v12, %v389_v52  ;;  %v127_v23 = vadd.f32 %v121_v1, %v113_v31 }
  0x47   :  { %v394_v24 = vsel %vm191_vm4, %v2406_v10, 0.0  ;;  %v396_v45 = vsel %vm191_vm4, %v2411_v48, 0.0  ;;  %v398_v6 = vsel %vm195_vm5, %v2416_v55, 0.0  ;;  %v128_v35 = vadd.f32 %v122_v37, %v114_v32 }
  0x48   :  { %v393_v13 = vadd.f32 %v392_v43, %v391_v14  ;;  %v129_v38 = vadd.f32 %v123_v5, %v115_v11  ;;  %v130_v54 = vadd.f32 %v124_v18, %v116_v44  ;;  %v131_v20 = vadd.f32 %v125_v61, %v117_v0 }
  0x49   :  { %v132_v15 = vadd.f32 %v126_v16, %v118_v60  ;;  %v134_v25 = vstv %s2368_s21  ;;  %v148_v21 = vstv %s2371_s22  ;;  %v612_v31 = vsel %vm191_vm4, %v2342_v49, 0.0  ;;  %s1916_s21 = sld [smem:[#allocation7 + $0x3]] }
  0x4a   :  { %v395_v26 = vadd.f32 %v394_v24, %v393_v13  ;;  %v135_v36 = vmul.f32 %v2194_v22, %v134_v25  ;;  %v136_v1 = vmul.f32 %v2203_v27, %v134_v25  ;;  %v137_v53 = vmul.f32 %v2208_v28, %v134_v25 }
  0x4b   :  { %v138_v42 = vmul.f32 %v2213_v29, %v134_v25  ;;  %v139_v32 = vmul.f32 %v2222_v33, %v134_v25  ;;  %v140_v11 = vmul.f32 %v2227_v34, %v134_v25  ;;  %v613_v44 = vsel %vm191_vm4, %v2344_v19, 0.0 }
  0x4c   :  { %v397_v0 = vadd.f32 %v396_v45, %v395_v26  ;;  %v141_v2 = vadd.f32 %v135_v36, %v127_v23  ;;  %v142_v37 = vadd.f32 %v136_v1, %v128_v35  ;;  %v143_v49 = vadd.f32 %v137_v53, %v129_v38 }
  0x4d   :  { %v144_v5 = vadd.f32 %v138_v42, %v130_v54  ;;  %v145_v18 = vadd.f32 %v139_v32, %v131_v20  ;;  %v146_v22 = vadd.f32 %v140_v11, %v132_v15  ;;  %v614_v61 = vadd.f32 %v613_v44, %v612_v31 }
  0x4e   :  { %v399_v27 = vadd.f32 %v398_v6, %v397_v0  ;;  %v149_v52 = vadd.f32 %v148_v21, %v141_v2  ;;  %v150_v28 = vadd.f32 %v148_v21, %v142_v37  ;;  %v151_v12 = vadd.f32 %v148_v21, %v143_v49 }
  0x4f   :  { %v152_v29 = vadd.f32 %v148_v21, %v144_v5  ;;  %v153_v43 = vadd.f32 %v148_v21, %v145_v18  ;;  %v154_v33 = vadd.f32 %v148_v21, %v146_v22  ;;  %v615_v34 = vsel %vm195_vm5, %v2346_v50, 0.0 }
  0x50   :  { %400 = vadd.xlane.f32.xlu1 %v399_v27  ;;  %v155_v19 = vadd.f32 3.0, %v149_v52  ;;  %v156_v60 = vadd.f32 3.0, %v150_v28  ;;  %v157_v16 = vadd.f32 3.0, %v151_v12  ;;  %v616_v14 = vadd.f32 %v615_v34, %v614_v61 }
  0x51   :  { %v158_v23 = vadd.f32 3.0, %v152_v29  ;;  %v159_v24 = vadd.f32 3.0, %v153_v43  ;;  %v160_v45 = vadd.f32 3.0, %v154_v33  ;;  %v617_v6 = vsel %vm191_vm4, %v2359_v30, 0.0 }
  0x52   :  { %v161_v35 = vmax.f32 %v155_v19, 0.0  ;;  %v162_v13 = vmax.f32 %v156_v60, 0.0  ;;  %v163_v38 = vmax.f32 %v157_v16, 0.0  ;;  %v618_v54 = vadd.f32 %v617_v6, %v616_v14 }
  0x53   :  { %v164_v20 = vmax.f32 %v158_v23, 0.0  ;;  %v165_v15 = vmax.f32 %v159_v24, 0.0  ;;  %v166_v25 = vmax.f32 %v160_v45, 0.0  ;;  %v619_v50 = vsel %vm191_vm4, %v610_v56, 0.0 }
  0x54   :  { %v167_v21 = vmin.f32 %v161_v35, 6.0  ;;  %v168_v31 = vmin.f32 %v162_v13, 6.0  ;;  %v169_v26 = vmin.f32 %v163_v38, 6.0  ;;  %v620_v36 = vadd.f32 %v619_v50, %v618_v54 }
  0x55   :  { %v170_v1 = vmin.f32 %v164_v20, 6.0  ;;  %v171_v53 = vmin.f32 %v165_v15, 6.0  ;;  %v172_v42 = vmin.f32 %v166_v25, 6.0  ;;  %v621_v32 = vsel %vm195_vm5, %v2430_v62, 0.0 }
  0x56   :  { %v173_v30 = vmul.f32 %v167_v21, %v149_v52  ;;  %v174_v11 = vmul.f32 %v168_v31, %v150_v28  ;;  %v175_v44 = vmul.f32 %v169_v26, %v151_v12  ;;  %v622_v0 = vadd.f32 %v621_v32, %v620_v36 }
  0x57   :  { %v410_v2 = vmul.f32 %v2390_v8, %v2390_v8  ;;  %v176_v37 = vmul.f32 %v170_v1, %v152_v29  ;;  %v177_v49 = vmul.f32 %v171_v53, %v153_v43  ;;  %v178_v56 = vmul.f32 %v172_v42, %v154_v33 }
  0x58   :  { %v411_v5 = vmul.f32 %v2395_v4, %v2395_v4  ;;  %v2461_v18 = vmul.f32 0.16666667, %v173_v30  ;;  %v2463_v22 = vmul.f32 0.16666667, %v174_v11  ;;  %v2465_v61 = vmul.f32 0.16666667, %v175_v44  ;;  %623 = vadd.xlane.f32.xlu2 %v622_v0 }
  0x59   :  { %v412_v62 = vmul.f32 %v2400_v9, %v2400_v9  ;;  %v413_v27 = vmul.f32 %v2406_v10, %v2406_v10  ;;  %v2471_v8 = vmul.f32 0.16666667, %v176_v37  ;;  %v2473_v52 = vmul.f32 0.16666667, %v177_v49 }
  0x5a   :  { %v2475_v28 = vmul.f32 0.16666667, %v178_v56  ;;  %v185_v4 = vsel %vm2265_vm8, %v2461_v18, 0.0  ;;  %v186_v12 = vsel %vm2275_vm9, %v2463_v22, 0.0  ;;  %v187_v9 = vsel %vm2283_vm10, %v2465_v61, 0.0 }
  0x5b   :  { %v414_v10 = vmul.f32 %v2411_v48, %v2411_v48  ;;  %v188_v29 = vsel %vm2265_vm8, %v2471_v8, 0.0  ;;  %v192_v43 = vsel %vm191_vm4, %v185_v4, 0.0  ;;  %v416_v33 = vsel %vm191_vm4, %v410_v2, 0.0 }
  0x5c   :  { %v189_v34 = vsel %vm2275_vm9, %v2473_v52, 0.0  ;;  %v193_v19 = vsel %vm191_vm4, %v186_v12, 0.0  ;;  %v196_v60 = vsel %vm195_vm5, %v187_v9, 0.0  ;;  %v417_v16 = vsel %vm191_vm4, %v411_v5, 0.0 }
  0x5d   :  { %v415_v48 = vmul.f32 %v2416_v55, %v2416_v55  ;;  %v194_v14 = vadd.f32 %v193_v19, %v192_v43  ;;  %v214_v23 = vmul.f32 %v185_v4, %v185_v4  ;;  %v215_v24 = vmul.f32 %v186_v12, %v186_v12 }
  0x5e   :  { %v190_v45 = vsel %vm2283_vm10, %v2475_v28, 0.0  ;;  %v198_v6 = vsel %vm191_vm4, %v188_v29, 0.0  ;;  %v216_v35 = vmul.f32 %v187_v9, %v187_v9  ;;  %v217_v13 = vmul.f32 %v188_v29, %v188_v29 }
  0x5f   :  { %v197_v38 = vadd.f32 %v196_v60, %v194_v14  ;;  %v200_v54 = vsel %vm191_vm4, %v189_v34, 0.0  ;;  %v418_v20 = vadd.f32 %v417_v16, %v416_v33  ;;  %v419_v15 = vsel %vm195_vm5, %v412_v62, 0.0 }
  0x60   :  { %v218_v25 = vmul.f32 %v189_v34, %v189_v34  ;;  %v421_v55 = vsel %vm191_vm4, %v413_v27, 0.0  ;;  %v220_v50 = vsel %vm191_vm4, %v214_v23, 0.0  ;;  %v221_v21 = vsel %vm191_vm4, %v215_v24, 0.0 }
  0x61   :  { %v199_v31 = vadd.f32 %v198_v6, %v197_v38  ;;  %v420_v26 = vadd.f32 %v419_v15, %v418_v20  ;;  %v222_v36 = vadd.f32 %v221_v21, %v220_v50  ;;  %v223_v1 = vsel %vm195_vm5, %v216_v35, 0.0 }
  0x62   :  { %v202_v53 = vsel %vm195_vm5, %v190_v45, 0.0  ;;  %v423_v42 = vsel %vm191_vm4, %v414_v10, 0.0  ;;  %v225_v32 = vsel %vm191_vm4, %v217_v13, 0.0  ;;  %v219_v0 = vmul.f32 %v190_v45, %v190_v45 }
  0x63   :  { %v201_v30 = vadd.f32 %v200_v54, %v199_v31  ;;  %v422_v11 = vadd.f32 %v421_v55, %v420_v26  ;;  %v224_v44 = vadd.f32 %v223_v1, %v222_v36  ;;  %v425_v2 = vsel %vm195_vm5, %v415_v48, 0.0 }
  0x64   :  { %v227_v37 = vsel %vm191_vm4, %v218_v25, 0.0  ;;  %v229_v4 = vsel %vm195_vm5, %v219_v0, 0.0 }
  0x65   :  { %v203_v49 = vadd.f32 %v202_v53, %v201_v30  ;;  %v424_v56 = vadd.f32 %v423_v42, %v422_v11  ;;  %v226_v5 = vadd.f32 %v225_v32, %v224_v44 }
  0x67   :  { %204 = vadd.xlane.f32.xlu0 %v203_v49  ;;  %v426_v62 = vadd.f32 %v425_v2, %v424_v56  ;;  %v228_v27 = vadd.f32 %v227_v37, %v226_v5 }
  0x69   :  { %427 = vadd.xlane.f32.xlu1 %v426_v62  ;;  %v230_v12 = vadd.f32 %v229_v4, %v228_v27 }
  0x6f   :  { %231 = vadd.xlane.f32.xlu0 %v230_v12 }
  0xac   :  { %v597_v9 = vpop.xlane.xlu2 %596 }
  0xad   :  { %v598_v60 = vrot.slane %v597_v9, 4 }
  0xaf   :  { %v599_v35 = vadd.f32 %v598_v60, %v597_v9 }
  0xb1   :  { %v600_v50 = vrot.slane %v599_v35, 2 }
  0xb3   :  { %v601_v42 = vadd.f32 %v600_v50, %v599_v35 }
  0xb5   :  { %v602_v2 = vrot.slane %v601_v42, 1 }
  0xb7   :  { %v603_v62 = vadd.f32 %v602_v2, %v601_v42 }
  0xc3   :  { %v401_v10 = vpop.xlane.xlu1 %400 }
  0xc4   :  { %v402_v43 = vrot.slane %v401_v10, 4 }
  0xc6   :  { %v403_v23 = vadd.f32 %v402_v43, %v401_v10 }
  0xc8   :  { %v404_v54 = vrot.slane %v403_v23, 2 }
  0xca   :  { %v405_v36 = vadd.f32 %v404_v54, %v403_v23 }
  0xcb   :  { %v624_v29 = vpop.xlane.xlu2 %623 }
  0xcc   :  { %v625_v19 = vrot.slane %v624_v29, 4  ;;  %v406_v11 = vrot.slane %v405_v36, 1 }
  0xce   :  { %v626_v45 = vadd.f32 %v625_v19, %v624_v29  ;;  %v407_v56 = vadd.f32 %v406_v11, %v405_v36 }
  0xd0   :  { %v627_v15 = vrot.slane %v626_v45, 2 }
  0xd2   :  { %v628_v53 = vadd.f32 %v627_v15, %v626_v45 }
  0xd4   :  { %v629_v0 = vrot.slane %v628_v53, 1 }
  0xd6   :  { %v630_v5 = vadd.f32 %v629_v0, %v628_v53  ;;  %v2552_v0 = vstv %s1904_s6  ;;  %s3081_s6 = sld [smem:[#allocation2 + $0x17]] }
  0xda   :  { %v205_v33 = vpop.xlane.xlu0 %204 }
  0xdb   :  { %v206_v34 = vrot.slane %v205_v33, 4 }
  0xdc   :  { %v428_v16 = vpop.xlane.xlu1 %427 }
  0xdd   :  { %v207_v48 = vadd.f32 %v206_v34, %v205_v33  ;;  %v429_v14 = vrot.slane %v428_v16, 4 }
  0xdf   :  { %v208_v24 = vrot.slane %v207_v48, 2  ;;  %v430_v6 = vadd.f32 %v429_v14, %v428_v16 }
  0xe1   :  { %v431_v13 = vrot.slane %v430_v6, 2  ;;  %v209_v38 = vadd.f32 %v208_v24, %v207_v48 }
  0xe2   :  { %v232_v20 = vpop.xlane.xlu0 %231 }
  0xe3   :  { %v233_v25 = vrot.slane %v232_v20, 4  ;;  %v210_v55 = vrot.slane %v209_v38, 1  ;;  %v432_v26 = vadd.f32 %v431_v13, %v430_v6 }
  0xe5   :  { %v234_v21 = vadd.f32 %v233_v25, %v232_v20  ;;  %v211_v31 = vadd.f32 %v210_v55, %v209_v38  ;;  %v433_v30 = vrot.slane %v432_v26, 1 }
  0xe7   :  { %v235_v1 = vrot.slane %v234_v21, 2  ;;  %1959 = vpush %v211_v31  ;;  %v434_v49 = vadd.f32 %v433_v30, %v432_v26  ;;  %v453_v30 = vstv %s2531_s30  ;;  %s3072_s30 = sld [smem:[#allocation2 + $0x12]] }
  0xe9   :  { %v236_v32 = vadd.f32 %v235_v1, %v234_v21  ;;  %v257_v21 = vstv %s2527_s29  ;;  %s3064_s29 = sld [smem:[#allocation2 + $0x15]] }
  0xeb   :  { %v237_v44 = vrot.slane %v236_v32, 1 }
  0xed   :  { %v238_v37 = vadd.f32 %v237_v44, %v236_v32  ;;  %v272_v32 = vstv %s271_s1  ;;  %s3077_s1 = sld [smem:[#allocation2 + $0x16]] }
  0xef   :  { %1961 = vpush %v238_v37 }
  0xf0   :  { %1963 = vpush %v407_v56 }
  0xf1   :  { %1965 = vpush %v434_v49 }
  0xf2   :  { %1967 = vpush %v603_v62 }
  0xf3   :  { %1969 = vpush %v630_v5  ;;  %v649_v5 = vstv %s2535_s7  ;;  %s3085_s7 = sld [smem:[#allocation4 + $0x7]] }
 0x118   :  { %s1960_s23 = spop %1959 }
 0x119   :  { %v213_v27 = vstv %s1960_s23  ;;  %s3007_s23 = sld [smem:[#allocation6 + $0x4]] }
 0x11a   :  { %v2517_v4 = vmul.f32 0.0015432099, %v213_v27 }
 0x11c   :  { %v243_v10 = vmul.f32 %v2517_v4, %v2517_v4  ;;  %v259_v55 = vsub.f32 %v2461_v18, %v2517_v4  ;;  %v260_v50 = vsub.f32 %v2463_v22, %v2517_v4  ;;  %v261_v31 = vsub.f32 %v2465_v61, %v2517_v4 }
 0x11d   :  { %v262_v26 = vsub.f32 %v2471_v8, %v2517_v4  ;;  %v263_v53 = vsub.f32 %v2473_v52, %v2517_v4  ;;  %v264_v42 = vsub.f32 %v2475_v28, %v2517_v4 }
 0x120   :  { %s1962_s24 = spop %1961 }
 0x121   :  { %v240_v12 = vstv %s1962_s24  ;;  %s1964_s25 = spop %1963  ;;  %s3009_s24 = sld [smem:[#allocation7 + $0x4]] }
 0x122   :  { %v242_v9 = vmul.f32 0.0015432099, %v240_v12  ;;  %v409_v29 = vstv %s1964_s25  ;;  %s1966_s26 = spop %1965  ;;  %s3014_s25 = sld [smem:[#allocation6 + $0x5]] }
 0x123   :  { %v2521_v43 = vmul.f32 0.0015432099, %v409_v29  ;;  %v436_v33 = vstv %s1966_s26  ;;  %s1968_s27 = spop %1967  ;;  %s3018_s26 = sld [smem:[#allocation7 + $0x5]] }
 0x124   :  { %v244_v34 = vsub.f32 %v242_v9, %v243_v10  ;;  %v605_v19 = vstv %s1968_s27  ;;  %s1970_s28 = spop %1969  ;;  %v438_v16 = vmul.f32 0.0015432099, %v436_v33 }
 0x125   :  { %v439_v48 = vmul.f32 %v2521_v43, %v2521_v43  ;;  %v2525_v14 = vmul.f32 0.0015432099, %v605_v19  ;;  %v632_v23 = vstv %s1970_s28  ;;  %v455_v37 = vsub.f32 %v2373_v3, %v2521_v43 }
 0x126   :  { %v245_v60 = vadd.f32 1e-05, %v244_v34  ;;  %v634_v6 = vmul.f32 0.0015432099, %v632_v23  ;;  %v456_v49 = vsub.f32 %v2375_v47, %v2521_v43  ;;  %v457_v56 = vsub.f32 %v2377_v17, %v2521_v43 }
 0x127   :  { %v440_v24 = vsub.f32 %v438_v16, %v439_v48  ;;  %v635_v35 = vmul.f32 %v2525_v14, %v2525_v14  ;;  %v458_v12 = vsub.f32 %v2380_v39, %v2521_v43  ;;  %v459_v9 = vsub.f32 %v2382_v7, %v2521_v43 }
 0x128   :  { %1999 = vrsqrt.f32 %v245_v60  ;;  %vm252_vm12 = vweird.f32 %v245_v60  ;;  %v460_v10 = vsub.f32 %v2384_v40, %v2521_v43  ;;  %v651_v29 = vsub.f32 %v2291_v57, %v2525_v14 }
 0x129   :  { %v441_v45 = vadd.f32 1e-05, %v440_v24  ;;  %v636_v13 = vsub.f32 %v634_v6, %v635_v35  ;;  %v652_v16 = vsub.f32 %v2293_v58, %v2525_v14  ;;  %v653_v48 = vsub.f32 %v2295_v59, %v2525_v14 }
 0x12b   :  { %2001 = vrsqrt.f32 %v441_v45  ;;  %v2533_v54 = vadd.f32 1e-05, %v636_v13  ;;  %vm448_vm15 = vweird.f32 %v441_v45 }
 0x12d   :  { %2003 = vrsqrt.f32 %v2533_v54  ;;  %vm644_vm0 = vweird.f32 %v2533_v54 }
 0x12e   :  { %v2000_v38 = vpop.eup %1999 }
 0x12f   :  { %v247_v20 = vmul.f32 %v2000_v38, %v245_v60  ;;  %vm253_vm11 = vweird.f32 %v2000_v38 }
 0x130   :  { %vm254_vm13 = vmor %vm252_vm12, %vm253_vm11 }
 0x131   :  { %v248_v15 = vmul.f32 %v2000_v38, %v247_v20  ;;  %v2002_v25 = vpop.eup %2001 }
 0x132   :  { %v443_v1 = vmul.f32 %v2002_v25, %v441_v45  ;;  %vm449_vm14 = vweird.f32 %v2002_v25 }
 0x133   :  { %v249_v36 = vmul.f32 0.5, %v248_v15  ;;  %v2554_v2 = vpop.eup %2003  ;;  %vm450_vm2 = vmor %vm448_vm15, %vm449_vm14 }
 0x134   :  { %v444_v44 = vmul.f32 %v2002_v25, %v443_v1  ;;  %v639_v4 = vmul.f32 %v2554_v2, %v2533_v54  ;;  %vm645_vm1 = vweird.f32 %v2554_v2 }
 0x135   :  { %v250_v11 = vsub.f32 1.5, %v249_v36  ;;  %vm646_vm3 = vmor %vm644_vm0, %vm645_vm1 }
 0x136   :  { %v445_v27 = vmul.f32 0.5, %v444_v44  ;;  %v640_v19 = vmul.f32 %v2554_v2, %v639_v4 }
 0x137   :  { %v251_v62 = vmul.f32 %v2000_v38, %v250_v11 }
 0x138   :  { %v446_v34 = vsub.f32 1.5, %v445_v27  ;;  %v641_v43 = vmul.f32 0.5, %v640_v19 }
 0x139   :  { %v255_v33 = vsel %vm254_vm13, %v2000_v38, %v251_v62 }
 0x13a   :  { %v258_v60 = vmul.f32 %v257_v21, %v255_v33  ;;  %v447_v23 = vmul.f32 %v2002_v25, %v446_v34  ;;  %v642_v38 = vsub.f32 1.5, %v641_v43 }
 0x13c   :  { %v265_v24 = vmul.f32 %v259_v55, %v258_v60  ;;  %v266_v6 = vmul.f32 %v260_v50, %v258_v60  ;;  %v267_v35 = vmul.f32 %v261_v31, %v258_v60  ;;  %v268_v13 = vmul.f32 %v262_v26, %v258_v60  ;;  %v3694_v31 = vld [vmem:[#allocation15_spill] sm:$0xff]  ;;  %v3695_v26 = vld [vmem:[#allocation16_spill] sm:$0xff] }
 0x13d   :  { %v451_v45 = vsel %vm450_vm2, %v2002_v25, %v447_v23  ;;  %v269_v20 = vmul.f32 %v263_v53, %v258_v60  ;;  %v270_v15 = vmul.f32 %v264_v42, %v258_v60  ;;  %v643_v44 = vmul.f32 %v2554_v2, %v642_v38 }
 0x13e   :  { %v273_v21 = vadd.f32 %v272_v32, %v265_v24  ;;  %v274_v36 = vadd.f32 %v272_v32, %v266_v6  ;;  %v454_v1 = vmul.f32 %v453_v30, %v451_v45  ;;  %v275_v11 = vadd.f32 %v272_v32, %v267_v35 }
 0x13f   :  { %v276_v62 = vadd.f32 %v272_v32, %v268_v13  ;;  %v277_v27 = vadd.f32 %v272_v32, %v269_v20  ;;  %v278_v4 = vadd.f32 %v272_v32, %v270_v15  ;;  %v654_v50 = vsub.f32 %v2298_v63, %v2525_v14 }
 0x140   :  { %v461_v55 = vmul.f32 %v455_v37, %v454_v1  ;;  %v655_v25 = vsub.f32 %v3694_v31, %v2525_v14  ;;  %v656_v53 = vsub.f32 %v3695_v26, %v2525_v14  ;;  %v647_v42 = vsel %vm646_vm3, %v2554_v2, %v643_v44 }
 0x141   :  { %v279_v30 = vmax.f32 %v273_v21, 0.0  ;;  %v280_v33 = vmax.f32 %v274_v36, 0.0  ;;  %v281_v32 = vmax.f32 %v275_v11, 0.0  ;;  %v462_v37 = vmul.f32 %v456_v49, %v454_v1 }
 0x142   :  { %v463_v34 = vmul.f32 %v457_v56, %v454_v1  ;;  %v282_v19 = vmax.f32 %v276_v62, 0.0  ;;  %v2596_v60 = vstv %s2578_s0  ;;  %v283_v23 = vmax.f32 %v277_v27, 0.0  ;;  %s3178_s0 = sld [smem:[#allocation2 + $0x13]] }
 0x143   :  { %v284_v43 = vmax.f32 %v278_v4, 0.0  ;;  %v285_v24 = vmin.f32 %v279_v30, 6.0  ;;  %v286_v6 = vmin.f32 %v280_v33, 6.0  ;;  %v464_v35 = vmul.f32 %v458_v12, %v454_v1 }
 0x144   :  { %v469_v13 = vadd.f32 %v2552_v0, %v461_v55  ;;  %v650_v45 = vmul.f32 %v649_v5, %v647_v42  ;;  %v287_v54 = vmin.f32 %v281_v32, 6.0  ;;  %v288_v38 = vmin.f32 %v282_v19, 6.0 }
 0x145   :  { %v289_v20 = vmin.f32 %v283_v23, 6.0  ;;  %v290_v2 = vmin.f32 %v284_v43, 6.0  ;;  %v291_v15 = vmul.f32 %v285_v24, %v2461_v18  ;;  %v292_v49 = vmul.f32 %v286_v6, %v2463_v22 }
 0x146   :  { %v293_v56 = vmul.f32 %v287_v54, %v2465_v61  ;;  %v465_v21 = vmul.f32 %v459_v9, %v454_v1  ;;  %v466_v36 = vmul.f32 %v460_v10, %v454_v1  ;;  %v294_v11 = vmul.f32 %v288_v38, %v2471_v8 }
 0x147   :  { %v295_v44 = vmul.f32 %v289_v20, %v2473_v52  ;;  %v296_v12 = vmul.f32 %v290_v2, %v2475_v28  ;;  %v297_v62 = vmul.f32 0.16666667, %v291_v15  ;;  %v470_v5 = vadd.f32 %v2552_v0, %v462_v37 }
 0x148   :  { %v298_v27 = vmul.f32 0.16666667, %v292_v49  ;;  %v471_v4 = vadd.f32 %v2552_v0, %v463_v34  ;;  %v472_v18 = vadd.f32 %v2552_v0, %v464_v35  ;;  %v657_v22 = vmul.f32 %v651_v29, %v650_v45 }
 0x149   :  { %v658_v61 = vmul.f32 %v652_v16, %v650_v45  ;;  %v299_v9 = vmul.f32 0.16666667, %v293_v56  ;;  %v473_v8 = vadd.f32 %v2552_v0, %v465_v21  ;;  %v659_v52 = vmul.f32 %v653_v48, %v650_v45 }
 0x14a   :  { %v300_v28 = vmul.f32 0.16666667, %v294_v11  ;;  %v301_v10 = vmul.f32 0.16666667, %v295_v44  ;;  %v474_v1 = vadd.f32 %v2552_v0, %v466_v36  ;;  %v302_v55 = vmul.f32 0.16666667, %v296_v12 }
 0x14b   :  { %v2618_v42 = vsel %vm2265_vm8, %v297_v62, 0.0  ;;  %v2622_v29 = vsel %vm2275_vm9, %v298_v27, 0.0  ;;  %v475_v16 = vmax.f32 %v469_v13, 0.0  ;;  %v476_v30 = vmax.f32 %v470_v5, 0.0 }
 0x14c   :  { %v477_v33 = vmax.f32 %v471_v4, 0.0  ;;  %v478_v32 = vmax.f32 %v472_v18, 0.0  ;;  %v479_v37 = vmax.f32 %v473_v8, 0.0  ;;  %v2626_v14 = vsel %vm2283_vm10, %v299_v9, 0.0 }
 0x14d   :  { %v480_v48 = vmax.f32 %v474_v1, 0.0  ;;  %v481_v0 = vmin.f32 %v475_v16, 6.0  ;;  %v660_v34 = vmul.f32 %v654_v50, %v650_v45  ;;  %v482_v19 = vmin.f32 %v476_v30, 6.0 }
 0x14e   :  { %v483_v23 = vmin.f32 %v477_v33, 6.0  ;;  %v484_v43 = vmin.f32 %v478_v32, 6.0  ;;  %v485_v24 = vmin.f32 %v479_v37, 6.0  ;;  %v661_v54 = vmul.f32 %v655_v25, %v650_v45 }
 0x14f   :  { %v486_v6 = vmin.f32 %v480_v48, 6.0  ;;  %v487_v35 = vmul.f32 %v481_v0, %v2373_v3  ;;  %v662_v13 = vmul.f32 %v656_v53, %v650_v45  ;;  %v488_v38 = vmul.f32 %v482_v19, %v2375_v47 }
 0x150   :  { %v489_v20 = vmul.f32 %v483_v23, %v2377_v17  ;;  %v490_v2 = vmul.f32 %v484_v43, %v2380_v39  ;;  %v491_v15 = vmul.f32 %v485_v24, %v2382_v7  ;;  %v665_v56 = vadd.f32 %v2596_v60, %v657_v22 }
 0x151   :  { %v492_v49 = vmul.f32 %v486_v6, %v2384_v40  ;;  %v493_v50 = vmul.f32 0.16666667, %v487_v35  ;;  %v666_v21 = vadd.f32 %v2596_v60, %v658_v61  ;;  %v2640_v3 = vsel %vm2265_vm8, %v300_v28, 0.0 }
 0x152   :  { %v494_v47 = vmul.f32 0.16666667, %v488_v38  ;;  %v667_v17 = vadd.f32 %v2596_v60, %v659_v52  ;;  %v668_v39 = vadd.f32 %v2596_v60, %v660_v34  ;;  %v2648_v7 = vsel %vm2275_vm9, %v301_v10, 0.0 }
 0x153   :  { %v495_v40 = vmul.f32 0.16666667, %v489_v20  ;;  %v496_v25 = vmul.f32 0.16666667, %v490_v2  ;;  %v669_v53 = vadd.f32 %v2596_v60, %v661_v54  ;;  %v2653_v45 = vsel %vm2283_vm10, %v302_v55, 0.0 }
 0x154   :  { %v497_v36 = vmul.f32 0.16666667, %v491_v15  ;;  %v498_v11 = vmul.f32 0.16666667, %v492_v49  ;;  %v670_v44 = vadd.f32 %v2596_v60, %v662_v13  ;;  %v2658_v12 = vsel %vm2265_vm8, %v493_v50, 0.0 }
 0x155   :  { %v2662_v62 = vsel %vm2275_vm9, %v494_v47, 0.0  ;;  %v671_v5 = vmax.f32 %v665_v56, 0.0  ;;  %v672_v27 = vmax.f32 %v666_v21, 0.0  ;;  %v673_v4 = vmax.f32 %v667_v17, 0.0  ;;  %v3696_v47 = vld [vmem:[#allocation12_spill] sm:$0xff]  ;;  %v3697_v17 = vld [vmem:[#allocation13_spill] sm:$0xff] }
 0x156   :  { %v674_v18 = vmax.f32 %v668_v39, 0.0  ;;  %v675_v22 = vmax.f32 %v669_v53, 0.0  ;;  %v676_v61 = vmax.f32 %v670_v44, 0.0  ;;  %v2666_v9 = vsel %vm2283_vm10, %v495_v40, 0.0 }
 0x157   :  { %v2670_v60 = vsel %vm2265_vm8, %v496_v25, 0.0  ;;  %v677_v8 = vmin.f32 %v671_v5, 6.0  ;;  %v678_v52 = vmin.f32 %v672_v27, 6.0  ;;  %v679_v28 = vmin.f32 %v673_v4, 6.0  ;;  %v3698_v5 = vld [vmem:[#allocation14_spill] sm:$0xff] }
 0x158   :  { %v680_v10 = vmin.f32 %v674_v18, 6.0  ;;  %v681_v1 = vmin.f32 %v675_v22, 6.0  ;;  %v682_v55 = vmin.f32 %v676_v61, 6.0  ;;  %v2676_v16 = vsel %vm2275_vm9, %v497_v36, 0.0 }
 0x159   :  { %v2680_v30 = vsel %vm2283_vm10, %v498_v11, 0.0  ;;  %v683_v33 = vmul.f32 %v677_v8, %v2291_v57  ;;  %v684_v32 = vmul.f32 %v678_v52, %v2293_v58  ;;  %v685_v37 = vmul.f32 %v679_v28, %v2295_v59 }
 0x15a   :  { %v686_v48 = vmul.f32 %v680_v10, %v2298_v63  ;;  %v687_v0 = vmul.f32 %v681_v1, %v3694_v31  ;;  %v688_v34 = vmul.f32 %v682_v55, %v3695_v26  ;;  %v915_v43 = vstv %s2636_s2  ;;  %s3270_s2 = sld [smem:[#allocation2 + $0x14]] }
 0x15b   :  { %v689_v19 = vmul.f32 0.16666667, %v683_v33  ;;  %v690_v23 = vmul.f32 0.16666667, %v684_v32  ;;  %v923_v24 = vstv %s2644_s9  ;;  %v691_v6 = vmul.f32 0.16666667, %v685_v37 }
 0x15c   :  { %v692_v57 = vmul.f32 0.16666667, %v686_v48  ;;  %v693_v35 = vmul.f32 0.16666667, %v687_v0  ;;  %v916_v58 = vmul.f32 %v915_v43, %v2618_v42  ;;  %v694_v54 = vmul.f32 0.16666667, %v688_v34 }
 0x15d   :  { %v2697_v59 = vsel %vm2265_vm8, %v689_v19, 0.0  ;;  %v2701_v63 = vsel %vm2275_vm9, %v690_v23, 0.0  ;;  %v917_v31 = vmul.f32 %v915_v43, %v2622_v29  ;;  %v2708_v26 = vsel %vm2283_vm10, %v691_v6, 0.0  ;;  %s3343_s9 = sld [smem:[#allocation2 + $0x18]] }
 0x15e   :  { %v2712_v13 = vsel %vm2265_vm8, %v692_v57, 0.0  ;;  %v2716_v38 = vsel %vm2275_vm9, %v693_v35, 0.0  ;;  %v918_v20 = vmul.f32 %v915_v43, %v2626_v14  ;;  %v2721_v2 = vsel %vm2283_vm10, %v694_v54, 0.0 }
 0x15f   :  { %v919_v15 = vmul.f32 %v915_v43, %v2640_v3  ;;  %v920_v49 = vmul.f32 %v915_v43, %v2648_v7  ;;  %v921_v41 = vmul.f32 %v915_v43, %v2653_v45  ;;  %v924_v50 = vmul.f32 %v923_v24, %v2658_v12 }
 0x160   :  { %v925_v56 = vmul.f32 %v923_v24, %v2662_v62  ;;  %v926_v46 = vmul.f32 %v923_v24, %v2666_v9  ;;  %v927_v21 = vmul.f32 %v923_v24, %v2670_v60  ;;  %vm701_vm6 = vcmp.ge.s32.totalorder %v3696_v47, 1 }
 0x161   :  { %vm710_vm7 = vcmp.ge.s32.totalorder %v3697_v17, 1  ;;  %v928_v51 = vmul.f32 %v923_v24, %v2676_v16  ;;  %v929_v39 = vmul.f32 %v923_v24, %v2680_v30  ;;  %v937_v40 = vstv %s2672_s3  ;;  %s3347_s3 = sld [smem:[#allocation4 + $0x6]] }
 0x162   :  { %v951_v25 = vstv %s2684_s8  ;;  %v930_v53 = vadd.f32 %v924_v50, %v916_v58  ;;  %v931_v36 = vadd.f32 %v925_v56, %v917_v31  ;;  %v932_v11 = vadd.f32 %v926_v46, %v918_v20  ;;  %vm711_vm10 = vmand %vm701_vm6, %vm710_vm7  ;;  %s3388_s8 = sld [smem:[#allocation2 + $0x19]] }
 0x163   :  { %v933_v44 = vadd.f32 %v927_v21, %v919_v15  ;;  %vm706_vm8 = vcmp.lt.s32.totalorder %v3698_v5, 21  ;;  %v934_v27 = vadd.f32 %v928_v51, %v920_v49  ;;  %v935_v4 = vadd.f32 %v929_v39, %v921_v41 }
 0x164   :  { %v938_v18 = vmul.f32 %v937_v40, %v2697_v59  ;;  %v939_v22 = vmul.f32 %v937_v40, %v2701_v63  ;;  %vm714_vm9 = vcmp.lt.s32.totalorder %v3697_v17, 21  ;;  %v940_v61 = vmul.f32 %v937_v40, %v2708_v26  ;;  %vm2762_vm11 = vmand %vm706_vm8, %vm710_vm7 }
 0x165   :  { %v941_v8 = vmul.f32 %v937_v40, %v2712_v13  ;;  %v942_v52 = vmul.f32 %v937_v40, %v2716_v38  ;;  %v943_v28 = vmul.f32 %v937_v40, %v2721_v2  ;;  %v719_v55 = vstv %s2692_s10  ;;  %vm2768_vm12 = vmand %vm711_vm10, %vm714_vm9  ;;  %s3396_s10 = sld [smem:[#allocation2 + $0x1a]] }
 0x166   :  { %v944_v10 = vadd.f32 %v938_v18, %v930_v53  ;;  %v945_v1 = vadd.f32 %v939_v22, %v931_v36  ;;  %v727_v33 = vstv %s2704_s11  ;;  %v946_v32 = vadd.f32 %v940_v61, %v932_v11  ;;  %vm2780_vm13 = vmand %vm710_vm7, %vm714_vm9  ;;  %s3419_s11 = sld [smem:[#allocation4 + $0x8]] }
 0x167   :  { %v947_v37 = vadd.f32 %v941_v8, %v933_v44  ;;  %v948_v48 = vadd.f32 %v942_v52, %v934_v27  ;;  %v949_v0 = vadd.f32 %v943_v28, %v935_v4  ;;  %v720_v23 = vmul.f32 %v719_v55, %v2618_v42  ;;  %vm2788_vm14 = vmand %vm2762_vm11, %vm714_vm9 }
 0x168   :  { %v952_v34 = vadd.f32 %v951_v25, %v944_v10  ;;  %v953_v19 = vadd.f32 %v951_v25, %v945_v1  ;;  %v721_v43 = vmul.f32 %v719_v55, %v2622_v29  ;;  %v954_v24 = vadd.f32 %v951_v25, %v946_v32 }
 0x169   :  { %v955_v6 = vadd.f32 %v951_v25, %v947_v37  ;;  %v956_v57 = vadd.f32 %v951_v25, %v948_v48  ;;  %v957_v35 = vadd.f32 %v951_v25, %v949_v0  ;;  %v722_v31 = vmul.f32 %v719_v55, %v2626_v14 }
 0x16a   :  { %v958_v58 = vadd.f32 3.0, %v952_v34  ;;  %v959_v54 = vadd.f32 3.0, %v953_v19  ;;  %v723_v20 = vmul.f32 %v719_v55, %v2640_v3  ;;  %v960_v15 = vadd.f32 3.0, %v954_v24 }
 0x16b   :  { %v961_v49 = vadd.f32 3.0, %v955_v6  ;;  %v962_v41 = vadd.f32 3.0, %v956_v57  ;;  %v963_v50 = vadd.f32 3.0, %v957_v35  ;;  %v724_v21 = vmul.f32 %v719_v55, %v2648_v7 }
 0x16c   :  { %v964_v56 = vmax.f32 %v958_v58, 0.0  ;;  %v965_v46 = vmax.f32 %v959_v54, 0.0  ;;  %v725_v51 = vmul.f32 %v719_v55, %v2653_v45  ;;  %v966_v39 = vmax.f32 %v960_v15, 0.0 }
 0x16d   :  { %v967_v40 = vmax.f32 %v961_v49, 0.0  ;;  %v968_v25 = vmax.f32 %v962_v41, 0.0  ;;  %v969_v53 = vmax.f32 %v963_v50, 0.0  ;;  %v728_v44 = vmul.f32 %v727_v33, %v2658_v12 }
 0x16e   :  { %v970_v36 = vmin.f32 %v964_v56, 6.0  ;;  %v971_v11 = vmin.f32 %v965_v46, 6.0  ;;  %v729_v27 = vmul.f32 %v727_v33, %v2662_v62  ;;  %v972_v47 = vmin.f32 %v966_v39, 6.0 }
 0x16f   :  { %v973_v18 = vmin.f32 %v967_v40, 6.0  ;;  %v974_v22 = vmin.f32 %v968_v25, 6.0  ;;  %v975_v61 = vmin.f32 %v969_v53, 6.0  ;;  %v730_v10 = vmul.f32 %v727_v33, %v2666_v9 }
 0x170   :  { %v976_v52 = vmul.f32 %v970_v36, %v952_v34  ;;  %v977_v28 = vmul.f32 %v971_v11, %v953_v19  ;;  %v731_v5 = vmul.f32 %v727_v33, %v2670_v60  ;;  %v978_v55 = vmul.f32 %v972_v47, %v954_v24 }
 0x171   :  { %v979_v32 = vmul.f32 %v973_v18, %v955_v6  ;;  %v980_v37 = vmul.f32 %v974_v22, %v956_v57  ;;  %v981_v48 = vmul.f32 %v975_v61, %v957_v35  ;;  %v732_v58 = vmul.f32 %v727_v33, %v2676_v16 }
 0x172   :  { %v2792_v34 = vmul.f32 0.16666667, %v976_v52  ;;  %v2794_v19 = vmul.f32 0.16666667, %v977_v28  ;;  %v733_v54 = vmul.f32 %v727_v33, %v2680_v30  ;;  %v2800_v24 = vmul.f32 0.16666667, %v978_v55 }
 0x173   :  { %v2802_v6 = vmul.f32 0.16666667, %v979_v32  ;;  %v2804_v17 = vmul.f32 0.16666667, %v980_v37  ;;  %v734_v57 = vadd.f32 %v728_v44, %v720_v23  ;;  %v2806_v35 = vmul.f32 0.16666667, %v981_v48 }
 0x174   :  { %v2811_v15 = vsel %vm2768_vm12, %v2792_v34, 0.0  ;;  %v2816_v33 = vsel %vm2780_vm13, %v2794_v19, 0.0  ;;  %v735_v49 = vadd.f32 %v729_v27, %v721_v43  ;;  %v2823_v23 = vsel %vm2788_vm14, %v2800_v24, 0.0 }
 0x175   :  { %3707 = vst [vmem:[#allocation15_spill] sm:$0xff] %v2804_v17  ;;  %v2828_v41 = vsel %vm2768_vm12, %v2802_v6, 0.0  ;;  %v2833_v50 = vsel %vm2780_vm13, %v2804_v17, 0.0  ;;  %v994_v43 = vsel %vm191_vm4, %v2811_v15, 0.0  ;;  %v2840_v56 = vsel %vm2788_vm14, %v2806_v35, 0.0 }
 0x176   :  { %3708 = vst [vmem:[#allocation16_spill] sm:$0xff] %v2806_v35  ;;  %v995_v46 = vsel %vm191_vm4, %v2816_v33, 0.0  ;;  %v997_v39 = vsel %vm195_vm5, %v2823_v23, 0.0  ;;  %v999_v40 = vsel %vm191_vm4, %v2828_v41, 0.0  ;;  %v1001_v53 = vsel %vm191_vm4, %v2833_v50, 0.0 }
 0x177   :  { %v996_v25 = vadd.f32 %v995_v46, %v994_v43  ;;  %v1003_v36 = vsel %vm195_vm5, %v2840_v56, 0.0  ;;  %v736_v11 = vadd.f32 %v730_v10, %v722_v31  ;;  %v737_v44 = vadd.f32 %v731_v5, %v723_v20 }
 0x178   :  { %v738_v27 = vadd.f32 %v732_v58, %v724_v21  ;;  %v739_v4 = vadd.f32 %v733_v54, %v725_v51  ;;  %v741_v47 = vstv %s2774_s12  ;;  %v755_v37 = vstv %s2798_s13 }
 0x179   :  { %v998_v18 = vadd.f32 %v997_v39, %v996_v25  ;;  %v742_v22 = vmul.f32 %v741_v47, %v2697_v59  ;;  %v743_v61 = vmul.f32 %v741_v47, %v2701_v63  ;;  %v744_v52 = vmul.f32 %v741_v47, %v2708_v26 }
 0x17a   :  { %v745_v28 = vmul.f32 %v741_v47, %v2712_v13  ;;  %v746_v55 = vmul.f32 %v741_v47, %v2716_v38  ;;  %v747_v32 = vmul.f32 %v741_v47, %v2721_v2  ;;  %v1111_v58 = vstv %s2818_s14 }
 0x17b   :  { %v1000_v31 = vadd.f32 %v999_v40, %v998_v18  ;;  %v748_v20 = vadd.f32 %v742_v22, %v734_v57  ;;  %v749_v21 = vadd.f32 %v743_v61, %v735_v49  ;;  %v750_v51 = vadd.f32 %v744_v52, %v736_v11 }
 0x17c   :  { %v751_v10 = vadd.f32 %v745_v28, %v737_v44  ;;  %v752_v5 = vadd.f32 %v746_v55, %v738_v27  ;;  %v753_v48 = vadd.f32 %v747_v32, %v739_v4  ;;  %v2864_v47 = vmul.f32 %v1111_v58, %v2618_v42 }
 0x17d   :  { %v1002_v54 = vadd.f32 %v1001_v53, %v1000_v31  ;;  %v756_v43 = vadd.f32 %v755_v37, %v748_v20  ;;  %v757_v46 = vadd.f32 %v755_v37, %v749_v21  ;;  %v758_v39 = vadd.f32 %v755_v37, %v750_v51 }
 0x17e   :  { %v759_v25 = vadd.f32 %v755_v37, %v751_v10  ;;  %v760_v35 = vadd.f32 %v755_v37, %v752_v5  ;;  %v761_v17 = vadd.f32 %v755_v37, %v753_v48  ;;  %v2867_v53 = vmul.f32 %v1111_v58, %v2622_v29 }
 0x17f   :  { %v1004_v40 = vadd.f32 %v1003_v36, %v1002_v54  ;;  %v762_v57 = vadd.f32 3.0, %v756_v43  ;;  %v763_v49 = vadd.f32 3.0, %v757_v46  ;;  %v764_v11 = vadd.f32 3.0, %v758_v39 }
 0x180   :  { %v765_v44 = vadd.f32 3.0, %v759_v25  ;;  %v766_v27 = vadd.f32 3.0, %v760_v35  ;;  %v767_v4 = vadd.f32 3.0, %v761_v17  ;;  %v2870_v52 = vmul.f32 %v1111_v58, %v2626_v14 }
 0x181   :  { %1005 = vadd.xlane.f32.xlu2 %v1004_v40  ;;  %v768_v18 = vmax.f32 %v762_v57, 0.0  ;;  %v769_v22 = vmax.f32 %v763_v49, 0.0  ;;  %v770_v61 = vmax.f32 %v764_v11, 0.0  ;;  %v1115_v55 = vmul.f32 %v1111_v58, %v2640_v3 }
 0x182   :  { %v771_v42 = vmax.f32 %v765_v44, 0.0  ;;  %v772_v28 = vmax.f32 %v766_v27, 0.0  ;;  %v773_v36 = vmax.f32 %v767_v4, 0.0  ;;  %v1116_v20 = vmul.f32 %v1111_v58, %v2648_v7 }
 0x183   :  { %v774_v32 = vmin.f32 %v768_v18, 6.0  ;;  %v775_v37 = vmin.f32 %v769_v22, 6.0  ;;  %v776_v31 = vmin.f32 %v770_v61, 6.0  ;;  %v1117_v10 = vmul.f32 %v1111_v58, %v2653_v45 }
 0x184   :  { %v777_v29 = vmin.f32 %v771_v42, 6.0  ;;  %v778_v21 = vmin.f32 %v772_v28, 6.0  ;;  %v779_v51 = vmin.f32 %v773_v36, 6.0  ;;  %v1119_v54 = vstv %s2861_s15  ;;  %s1933_s15 = sld [smem:[#allocation6 + $0x6]] }
 0x185   :  { %v780_v5 = vmul.f32 %v774_v32, %v756_v43  ;;  %v781_v48 = vmul.f32 %v775_v37, %v757_v46  ;;  %v782_v14 = vmul.f32 %v776_v31, %v758_v39  ;;  %v1120_v11 = vmul.f32 %v1119_v54, %v2658_v12 }
 0x186   :  { %v783_v40 = vmul.f32 %v777_v29, %v759_v25  ;;  %v784_v57 = vmul.f32 %v778_v21, %v760_v35  ;;  %v785_v49 = vmul.f32 %v779_v51, %v761_v17  ;;  %v1121_v7 = vmul.f32 %v1119_v54, %v2662_v62 }
 0x187   :  { %v2877_v3 = vmul.f32 0.16666667, %v780_v5  ;;  %v2879_v44 = vmul.f32 0.16666667, %v781_v48  ;;  %v2881_v27 = vmul.f32 0.16666667, %v782_v14  ;;  %v1122_v43 = vmul.f32 %v1119_v54, %v2666_v9 }
 0x188   :  { %v2884_v4 = vmul.f32 0.16666667, %v783_v40  ;;  %v2886_v45 = vmul.f32 0.16666667, %v784_v57  ;;  %v2888_v58 = vmul.f32 0.16666667, %v785_v49  ;;  %v1123_v35 = vmul.f32 %v1119_v54, %v2670_v60 }
 0x189   :  { %v792_v12 = vsel %vm2768_vm12, %v2877_v3, 0.0  ;;  %v793_v17 = vsel %vm2780_vm13, %v2879_v44, 0.0  ;;  %v794_v62 = vsel %vm2788_vm14, %v2881_v27, 0.0  ;;  %v1124_v14 = vmul.f32 %v1119_v54, %v2676_v16 }
 0x18a   :  { %v795_v46 = vsel %vm2768_vm12, %v2884_v4, 0.0  ;;  %v796_v9 = vsel %vm2780_vm13, %v2886_v45, 0.0  ;;  %v797_v39 = vsel %vm2788_vm14, %v2888_v58, 0.0  ;;  %v798_v25 = vsel %vm191_vm4, %v792_v12, 0.0 }
 0x18b   :  { %v799_v18 = vsel %vm191_vm4, %v793_v17, 0.0  ;;  %v801_v60 = vsel %vm195_vm5, %v794_v62, 0.0  ;;  %v803_v22 = vsel %vm191_vm4, %v795_v46, 0.0  ;;  %v805_v61 = vsel %vm191_vm4, %v796_v9, 0.0 }
 0x18c   :  { %v800_v42 = vadd.f32 %v799_v18, %v798_v25  ;;  %v807_v28 = vsel %vm195_vm5, %v797_v39, 0.0  ;;  %v819_v36 = vmul.f32 %v792_v12, %v792_v12  ;;  %v820_v32 = vmul.f32 %v793_v17, %v793_v17 }
 0x18d   :  { %v821_v37 = vmul.f32 %v794_v62, %v794_v62  ;;  %v822_v31 = vmul.f32 %v795_v46, %v795_v46  ;;  %v823_v29 = vmul.f32 %v796_v9, %v796_v9  ;;  %v824_v21 = vmul.f32 %v797_v39, %v797_v39 }
 0x18e   :  { %v802_v51 = vadd.f32 %v801_v60, %v800_v42  ;;  %v825_v5 = vsel %vm191_vm4, %v819_v36, 0.0  ;;  %v826_v48 = vsel %vm191_vm4, %v820_v32, 0.0  ;;  %v1125_v46 = vmul.f32 %v1119_v54, %v2680_v30 }
 0x18f   :  { %v827_v40 = vadd.f32 %v826_v48, %v825_v5  ;;  %v828_v57 = vsel %vm195_vm5, %v821_v37, 0.0  ;;  %v830_v49 = vsel %vm191_vm4, %v822_v31, 0.0  ;;  %v832_v12 = vsel %vm191_vm4, %v823_v29, 0.0 }
 0x190   :  { %v804_v17 = vadd.f32 %v803_v22, %v802_v51  ;;  %v834_v62 = vsel %vm195_vm5, %v824_v21, 0.0  ;;  %v1126_v9 = vadd.f32 %v1120_v11, %v2864_v47  ;;  %v1127_v16 = vadd.f32 %v1121_v7, %v2867_v53 }
 0x191   :  { %v829_v39 = vadd.f32 %v828_v57, %v827_v40  ;;  %v1128_v25 = vadd.f32 %v1122_v43, %v2870_v52  ;;  %v1129_v18 = vadd.f32 %v1123_v35, %v1115_v55  ;;  %v1130_v42 = vadd.f32 %v1124_v14, %v1116_v20 }
 0x192   :  { %v806_v60 = vadd.f32 %v805_v61, %v804_v17  ;;  %v1131_v36 = vadd.f32 %v1125_v46, %v1117_v10  ;;  %v1133_v32 = vstv %s2911_s16  ;;  %v1015_v40 = vmul.f32 %v2811_v15, %v2811_v15 }
 0x193   :  { %v831_v37 = vadd.f32 %v830_v49, %v829_v39  ;;  %v1134_v22 = vmul.f32 %v1133_v32, %v2697_v59  ;;  %v1135_v31 = vmul.f32 %v1133_v32, %v2701_v63  ;;  %v1136_v30 = vmul.f32 %v1133_v32, %v2708_v26 }
 0x194   :  { %v808_v54 = vadd.f32 %v807_v28, %v806_v60  ;;  %v1137_v47 = vmul.f32 %v1133_v32, %v2712_v13  ;;  %v1138_v53 = vmul.f32 %v1133_v32, %v2716_v38  ;;  %v1139_v52 = vmul.f32 %v1133_v32, %v2721_v2 }
 0x195   :  { %v833_v55 = vadd.f32 %v832_v12, %v831_v37  ;;  %v1140_v11 = vadd.f32 %v1134_v22, %v1126_v9  ;;  %v1141_v20 = vadd.f32 %v1135_v31, %v1127_v16  ;;  %v1142_v10 = vadd.f32 %v1136_v30, %v1128_v25 }
 0x196   :  { %809 = vadd.xlane.f32.xlu0 %v808_v54  ;;  %v1143_v7 = vadd.f32 %v1137_v47, %v1129_v18  ;;  %v1144_v43 = vadd.f32 %v1138_v53, %v1130_v42  ;;  %v1145_v35 = vadd.f32 %v1139_v52, %v1131_v36  ;;  %v1147_v59 = vstv %s2921_s17  ;;  %s1934_s17 = sld [smem:[#allocation7 + $0x6]] }
 0x197   :  { %v835_v61 = vadd.f32 %v834_v62, %v833_v55  ;;  %v1148_v63 = vadd.f32 %v1147_v59, %v1140_v11  ;;  %v1149_v29 = vadd.f32 %v1147_v59, %v1141_v20  ;;  %v1150_v26 = vadd.f32 %v1147_v59, %v1142_v10 }
 0x198   :  { %v1151_v28 = vadd.f32 %v1147_v59, %v1143_v7  ;;  %v1152_v21 = vadd.f32 %v1147_v59, %v1144_v43  ;;  %v1153_v13 = vadd.f32 %v1147_v59, %v1145_v35  ;;  %v1016_v17 = vmul.f32 %v2816_v33, %v2816_v33 }
 0x199   :  { %836 = vadd.xlane.f32.xlu1 %v835_v61  ;;  %v1154_v38 = vadd.f32 3.0, %v1148_v63  ;;  %v1155_v51 = vadd.f32 3.0, %v1149_v29  ;;  %v1156_v2 = vadd.f32 3.0, %v1150_v26  ;;  %v1021_v36 = vsel %vm191_vm4, %v1015_v40, 0.0 }
 0x19a   :  { %v1157_v5 = vadd.f32 3.0, %v1151_v28  ;;  %v1158_v48 = vadd.f32 3.0, %v1152_v21  ;;  %v1159_v14 = vadd.f32 3.0, %v1153_v13  ;;  %v1022_v22 = vsel %vm191_vm4, %v1016_v17, 0.0 }
 0x19b   :  { %v1160_v57 = vmax.f32 %v1154_v38, 0.0  ;;  %v1161_v49 = vmax.f32 %v1155_v51, 0.0  ;;  %v1162_v12 = vmax.f32 %v1156_v2, 0.0  ;;  %v1017_v52 = vmul.f32 %v2823_v23, %v2823_v23 }
 0x19c   :  { %v1163_v62 = vmax.f32 %v1157_v5, 0.0  ;;  %v1164_v46 = vmax.f32 %v1158_v48, 0.0  ;;  %v1165_v9 = vmax.f32 %v1159_v14, 0.0  ;;  %v1023_v20 = vadd.f32 %v1022_v22, %v1021_v36 }
 0x19d   :  { %v1166_v39 = vmin.f32 %v1160_v57, 6.0  ;;  %v1167_v16 = vmin.f32 %v1161_v49, 6.0  ;;  %v1168_v25 = vmin.f32 %v1162_v12, 6.0  ;;  %v1018_v23 = vmul.f32 %v2828_v41, %v2828_v41 }
 0x19e   :  { %v1169_v18 = vmin.f32 %v1163_v62, 6.0  ;;  %v1170_v60 = vmin.f32 %v1164_v46, 6.0  ;;  %v1171_v42 = vmin.f32 %v1165_v9, 6.0  ;;  %v1020_v2 = vmul.f32 %v2840_v56, %v2840_v56 }
 0x19f   :  { %v1172_v32 = vmul.f32 %v1166_v39, %v1148_v63  ;;  %v1173_v37 = vmul.f32 %v1167_v16, %v1149_v29  ;;  %v1174_v15 = vmul.f32 %v1168_v25, %v1150_v26  ;;  %v1019_v63 = vmul.f32 %v2833_v50, %v2833_v50 }
 0x1a0   :  { %v1175_v31 = vmul.f32 %v1169_v18, %v1151_v28  ;;  %v1176_v30 = vmul.f32 %v1170_v60, %v1152_v21  ;;  %v1177_v54 = vmul.f32 %v1171_v42, %v1153_v13  ;;  %v1024_v21 = vsel %vm195_vm5, %v1017_v52, 0.0 }
 0x1a1   :  { %v2945_v33 = vmul.f32 0.16666667, %v1172_v32  ;;  %v2947_v47 = vmul.f32 0.16666667, %v1173_v37  ;;  %v2949_v53 = vmul.f32 0.16666667, %v1174_v15  ;;  %v1025_v13 = vadd.f32 %v1024_v21, %v1023_v20 }
 0x1a2   :  { %v2953_v55 = vmul.f32 0.16666667, %v1175_v31  ;;  %v2955_v11 = vmul.f32 0.16666667, %v1176_v30  ;;  %v2968_v35 = vmul.f32 0.16666667, %v1177_v54 }
 0x1a3   :  { %v1184_v10 = vsel %vm2768_vm12, %v2945_v33, 0.0  ;;  %v1185_v7 = vsel %vm2780_vm13, %v2947_v47, 0.0  ;;  %v1186_v43 = vsel %vm2788_vm14, %v2949_v53, 0.0  ;;  %v1026_v5 = vsel %vm191_vm4, %v1018_v23, 0.0 }
 0x1a4   :  { %v1187_v59 = vsel %vm2768_vm12, %v2953_v55, 0.0  ;;  %v1211_v61 = vmul.f32 %v1184_v10, %v1184_v10  ;;  %v1188_v29 = vsel %vm2780_vm13, %v2955_v11, 0.0  ;;  %v1212_v26 = vmul.f32 %v1185_v7, %v1185_v7 }
 0x1a5   :  { %v1213_v28 = vmul.f32 %v1186_v43, %v1186_v43  ;;  %v1214_v38 = vmul.f32 %v1187_v59, %v1187_v59  ;;  %v1189_v50 = vsel %vm2788_vm14, %v2968_v35, 0.0  ;;  %v1215_v48 = vmul.f32 %v1188_v29, %v1188_v29 }
 0x1a6   :  { %v1217_v41 = vsel %vm191_vm4, %v1211_v61, 0.0  ;;  %v1218_v51 = vsel %vm191_vm4, %v1212_v26, 0.0  ;;  %v1027_v40 = vadd.f32 %v1026_v5, %v1025_v13  ;;  %v1028_v49 = vsel %vm191_vm4, %v1019_v63, 0.0 }
 0x1a7   :  { %v1219_v14 = vadd.f32 %v1218_v51, %v1217_v41  ;;  %v1220_v57 = vsel %vm195_vm5, %v1213_v28, 0.0  ;;  %v1190_v12 = vsel %vm191_vm4, %v1184_v10, 0.0  ;;  %v1191_v17 = vsel %vm191_vm4, %v1185_v7, 0.0 }
 0x1a8   :  { %v1029_v46 = vadd.f32 %v1028_v49, %v1027_v40  ;;  %v1192_v56 = vadd.f32 %v1191_v17, %v1190_v12  ;;  %v1216_v9 = vmul.f32 %v1189_v50, %v1189_v50  ;;  %v1222_v39 = vsel %vm191_vm4, %v1214_v38, 0.0 }
 0x1a9   :  { %v1221_v62 = vadd.f32 %v1220_v57, %v1219_v14  ;;  %v1030_v16 = vsel %vm195_vm5, %v1020_v2, 0.0  ;;  %v1193_v25 = vsel %vm195_vm5, %v1186_v43, 0.0  ;;  %v1224_v36 = vsel %vm191_vm4, %v1215_v48, 0.0 }
 0x1aa   :  { %v1031_v60 = vadd.f32 %v1030_v16, %v1029_v46  ;;  %v1194_v42 = vadd.f32 %v1193_v25, %v1192_v56  ;;  %v1195_v32 = vsel %vm191_vm4, %v1187_v59, 0.0  ;;  %v1226_v22 = vsel %vm195_vm5, %v1216_v9, 0.0 }
 0x1ab   :  { %v1223_v18 = vadd.f32 %v1222_v39, %v1221_v62  ;;  %v1197_v31 = vsel %vm191_vm4, %v1188_v29, 0.0  ;;  %v1199_v52 = vsel %vm195_vm5, %v1189_v50, 0.0 }
 0x1ac   :  { %1032 = vadd.xlane.f32.xlu0 %v1031_v60  ;;  %v1196_v15 = vadd.f32 %v1195_v32, %v1194_v42 }
 0x1ad   :  { %v1225_v37 = vadd.f32 %v1224_v36, %v1223_v18 }
 0x1ae   :  { %v1198_v54 = vadd.f32 %v1197_v31, %v1196_v15 }
 0x1af   :  { %v1227_v30 = vadd.f32 %v1226_v22, %v1225_v37 }
 0x1b0   :  { %v1200_v20 = vadd.f32 %v1199_v52, %v1198_v54 }
 0x1b1   :  { %1228 = vadd.xlane.f32.xlu2 %v1227_v30 }
 0x1b2   :  { %1201 = vadd.xlane.f32.xlu1 %v1200_v20 }
 0x1f4   :  { %v1006_v10 = vpop.xlane.xlu2 %1005 }
 0x1f5   :  { %v1007_v7 = vrot.slane %v1006_v10, 4 }
 0x1f7   :  { %v1008_v43 = vadd.f32 %v1007_v7, %v1006_v10 }
 0x1f9   :  { %v1009_v59 = vrot.slane %v1008_v43, 2 }
 0x1fb   :  { %v1010_v29 = vadd.f32 %v1009_v59, %v1008_v43 }
 0x1fd   :  { %v1011_v50 = vrot.slane %v1010_v29, 1 }
 0x1ff   :  { %v1012_v40 = vadd.f32 %v1011_v50, %v1010_v29  ;;  %v862_v29 = vstv %s3003_s20  ;;  %v877_v50 = vstv %s1916_s21  ;;  %s3541_s20 = sld [smem:[#allocation7 + $0x7]] }
 0x209   :  { %v810_v23 = vpop.xlane.xlu0 %809 }
 0x20a   :  { %v811_v61 = vrot.slane %v810_v23, 4 }
 0x20c   :  { %v812_v63 = vadd.f32 %v811_v61, %v810_v23  ;;  %v837_v26 = vpop.xlane.xlu1 %836 }
 0x20d   :  { %v838_v28 = vrot.slane %v837_v26, 4 }
 0x20e   :  { %v813_v21 = vrot.slane %v812_v63, 2 }
 0x20f   :  { %v839_v41 = vadd.f32 %v838_v28, %v837_v26 }
 0x210   :  { %v814_v13 = vadd.f32 %v813_v21, %v812_v63 }
 0x211   :  { %v840_v38 = vrot.slane %v839_v41, 2 }
 0x212   :  { %v815_v51 = vrot.slane %v814_v13, 1 }
 0x213   :  { %v841_v2 = vadd.f32 %v840_v38, %v839_v41 }
 0x214   :  { %v816_v5 = vadd.f32 %v815_v51, %v814_v13 }
 0x215   :  { %v842_v48 = vrot.slane %v841_v2, 1 }
 0x216   :  { %1971 = vpush %v816_v5 }
 0x217   :  { %v843_v14 = vadd.f32 %v842_v48, %v841_v2 }
 0x219   :  { %1973 = vpush %v843_v14 }
 0x21a   :  { %1975 = vpush %v1012_v40 }
 0x21f   :  { %v1033_v57 = vpop.xlane.xlu0 %1032 }
 0x220   :  { %v1034_v49 = vrot.slane %v1033_v57, 4 }
 0x222   :  { %v1035_v12 = vadd.f32 %v1034_v49, %v1033_v57 }
 0x224   :  { %v1229_v17 = vpop.xlane.xlu2 %1228  ;;  %v1036_v46 = vrot.slane %v1035_v12, 2 }
 0x225   :  { %v1230_v62 = vrot.slane %v1229_v17, 4  ;;  %v1202_v56 = vpop.xlane.xlu1 %1201 }
 0x226   :  { %v1203_v39 = vrot.slane %v1202_v56, 4  ;;  %v1037_v16 = vadd.f32 %v1036_v46, %v1035_v12 }
 0x227   :  { %v1231_v9 = vadd.f32 %v1230_v62, %v1229_v17 }
 0x228   :  { %v1204_v18 = vadd.f32 %v1203_v39, %v1202_v56  ;;  %v1038_v60 = vrot.slane %v1037_v16, 1 }
 0x229   :  { %v1232_v25 = vrot.slane %v1231_v9, 2 }
 0x22a   :  { %v1205_v42 = vrot.slane %v1204_v18, 2  ;;  %v1039_v36 = vadd.f32 %v1038_v60, %v1037_v16  ;;  %v3710_v60 = vld [vmem:[#allocation16_spill] sm:$0xff] }
 0x22b   :  { %v1233_v32 = vadd.f32 %v1232_v25, %v1231_v9  ;;  %v3709_v25 = vld [vmem:[#allocation15_spill] sm:$0xff] }
 0x22c   :  { %1977 = vpush %v1039_v36  ;;  %v1206_v37 = vadd.f32 %v1205_v42, %v1204_v18 }
 0x22d   :  { %v1234_v15 = vrot.slane %v1233_v32, 1 }
 0x22e   :  { %v1207_v22 = vrot.slane %v1206_v37, 1 }
 0x22f   :  { %v1235_v30 = vadd.f32 %v1234_v15, %v1233_v32 }
 0x230   :  { %v1208_v31 = vadd.f32 %v1207_v22, %v1206_v37  ;;  %v1058_v22 = vstv %s3007_s23 }
 0x232   :  { %1979 = vpush %v1208_v31 }
 0x233   :  { %1981 = vpush %v1235_v30 }
 0x247   :  { %s1972_s4 = spop %1971 }
 0x248   :  { %v818_v54 = vstv %s1972_s4 }
 0x249   :  { %v2999_v52 = vmul.f32 0.00125, %v818_v54 }
 0x24a   :  { %s1974_s18 = spop %1973 }
 0x24b   :  { %v845_v20 = vstv %s1974_s18  ;;  %v848_v10 = vmul.f32 %v2999_v52, %v2999_v52  ;;  %s1976_s19 = spop %1975  ;;  %v864_v2 = vsub.f32 %v2877_v3, %v2999_v52  ;;  %v865_v48 = vsub.f32 %v2879_v44, %v2999_v52  ;;  %s3533_s18 = sld [smem:[#allocation6 + $0x7]] }
 0x24c   :  { %v847_v7 = vmul.f32 0.00125, %v845_v20  ;;  %v1014_v63 = vstv %s1976_s19  ;;  %v866_v14 = vsub.f32 %v2881_v27, %v2999_v52  ;;  %v867_v40 = vsub.f32 %v2884_v4, %v2999_v52 }
 0x24d   :  { %v3005_v28 = vmul.f32 0.00125, %v1014_v63  ;;  %v868_v49 = vsub.f32 %v2886_v45, %v2999_v52  ;;  %v869_v12 = vsub.f32 %v2888_v58, %v2999_v52 }
 0x24e   :  { %v849_v43 = vsub.f32 %v847_v7, %v848_v10 }
 0x24f   :  { %v1044_v51 = vmul.f32 %v3005_v28, %v3005_v28  ;;  %v1060_v62 = vsub.f32 %v2792_v34, %v3005_v28  ;;  %v1061_v56 = vsub.f32 %v2794_v19, %v3005_v28  ;;  %v1062_v9 = vsub.f32 %v2800_v24, %v3005_v28 }
 0x250   :  { %v850_v23 = vadd.f32 1e-05, %v849_v43  ;;  %v1063_v16 = vsub.f32 %v2802_v6, %v3005_v28  ;;  %v1064_v18 = vsub.f32 %v3709_v25, %v3005_v28  ;;  %v1065_v42 = vsub.f32 %v3710_v60, %v3005_v28 }
 0x251   :  { %v3050_v43 = vstv %s3009_s24 }
 0x252   :  { %2005 = vrsqrt.f32 %v850_v23  ;;  %vm857_vm0 = vweird.f32 %v850_v23 }
 0x258   :  { %v2006_v61 = vpop.eup %2005 }
 0x259   :  { %v852_v59 = vmul.f32 %v2006_v61, %v850_v23  ;;  %vm858_vm15 = vweird.f32 %v2006_v61 }
 0x25a   :  { %vm859_vm1 = vmor %vm857_vm0, %vm858_vm15 }
 0x25b   :  { %v853_v26 = vmul.f32 %v2006_v61, %v852_v59  ;;  %v3056_v59 = vstv %s3018_s26 }
 0x25d   :  { %v854_v21 = vmul.f32 0.5, %v853_v26  ;;  %s1978_s22 = spop %1977 }
 0x25e   :  { %v1041_v13 = vstv %s1978_s22 }
 0x25f   :  { %v855_v41 = vsub.f32 1.5, %v854_v21  ;;  %v1043_v38 = vmul.f32 0.00125, %v1041_v13 }
 0x261   :  { %v856_v5 = vmul.f32 %v2006_v61, %v855_v41  ;;  %v1045_v57 = vsub.f32 %v1043_v38, %v1044_v51 }
 0x263   :  { %v860_v17 = vsel %vm859_vm1, %v2006_v61, %v856_v5  ;;  %v3037_v39 = vadd.f32 1e-05, %v1045_v57  ;;  %s1980_s27 = spop %1979  ;;  %v1254_v61 = vstv %s3014_s25 }
 0x264   :  { %v863_v46 = vmul.f32 %v862_v29, %v860_v17  ;;  %v1210_v36 = vstv %s1980_s27  ;;  %s1982_s28 = spop %1981 }
 0x265   :  { %2007 = vrsqrt.f32 %v3037_v39  ;;  %v3047_v54 = vmul.f32 0.00125, %v1210_v36  ;;  %v1237_v7 = vstv %s1982_s28  ;;  %vm1053_vm2 = vweird.f32 %v3037_v39 }
 0x266   :  { %v870_v32 = vmul.f32 %v864_v2, %v863_v46  ;;  %v871_v37 = vmul.f32 %v865_v48, %v863_v46  ;;  %v872_v15 = vmul.f32 %v866_v14, %v863_v46  ;;  %v873_v31 = vmul.f32 %v867_v40, %v863_v46 }
 0x267   :  { %v874_v30 = vmul.f32 %v868_v49, %v863_v46  ;;  %v1256_v23 = vsub.f32 %v2945_v33, %v3047_v54  ;;  %v1257_v21 = vsub.f32 %v2947_v47, %v3047_v54  ;;  %v1258_v41 = vsub.f32 %v2949_v53, %v3047_v54 }
 0x268   :  { %v878_v52 = vadd.f32 %v877_v50, %v870_v32  ;;  %v879_v20 = vadd.f32 %v877_v50, %v871_v37  ;;  %v880_v10 = vadd.f32 %v877_v50, %v872_v15  ;;  %v1239_v13 = vmul.f32 0.00125, %v1237_v7 }
 0x269   :  { %v1240_v29 = vmul.f32 %v3047_v54, %v3047_v54  ;;  %v875_v38 = vmul.f32 %v869_v12, %v863_v46  ;;  %v881_v51 = vadd.f32 %v877_v50, %v873_v31  ;;  %v882_v48 = vadd.f32 %v877_v50, %v874_v30 }
 0x26a   :  { %v884_v63 = vmax.f32 %v878_v52, 0.0  ;;  %v885_v26 = vmax.f32 %v879_v20, 0.0  ;;  %v886_v14 = vmax.f32 %v880_v10, 0.0  ;;  %v1259_v57 = vsub.f32 %v2953_v55, %v3047_v54 }
 0x26b   :  { %v2008_v40 = vpop.eup %2007  ;;  %v1241_v49 = vsub.f32 %v1239_v13, %v1240_v29  ;;  %v883_v17 = vadd.f32 %v877_v50, %v875_v38  ;;  %v887_v36 = vmax.f32 %v881_v51, 0.0  ;;  %v888_v46 = vmax.f32 %v882_v48, 0.0 }
 0x26c   :  { %v890_v2 = vmin.f32 %v884_v63, 6.0  ;;  %v891_v5 = vmin.f32 %v885_v26, 6.0  ;;  %v1048_v32 = vmul.f32 %v2008_v40, %v3037_v39  ;;  %v892_v37 = vmin.f32 %v886_v14, 6.0 }
 0x26d   :  { %v3074_v15 = vadd.f32 1e-05, %v1241_v49  ;;  %v889_v31 = vmax.f32 %v883_v17, 0.0  ;;  %v893_v30 = vmin.f32 %v887_v36, 6.0  ;;  %v894_v20 = vmin.f32 %v888_v46, 6.0 }
 0x26e   :  { %v896_v52 = vmul.f32 %v890_v2, %v2877_v3  ;;  %v1049_v50 = vmul.f32 %v2008_v40, %v1048_v32  ;;  %v897_v10 = vmul.f32 %v891_v5, %v2879_v44  ;;  %v898_v7 = vmul.f32 %v892_v37, %v2881_v27 }
 0x26f   :  { %vm1054_vm3 = vweird.f32 %v2008_v40  ;;  %2009 = vrsqrt.f32 %v3074_v15  ;;  %v895_v63 = vmin.f32 %v889_v31, 6.0  ;;  %v899_v26 = vmul.f32 %v893_v30, %v2884_v4 }
 0x270   :  { %v1050_v3 = vmul.f32 0.5, %v1049_v50  ;;  %v900_v13 = vmul.f32 %v894_v20, %v2886_v45  ;;  %v902_v29 = vmul.f32 0.16666667, %v896_v52  ;;  %v903_v38 = vmul.f32 0.16666667, %v897_v10  ;;  %vm1055_vm6 = vmor %vm1053_vm2, %vm1054_vm3 }
 0x271   :  { %v901_v51 = vmul.f32 %v895_v63, %v2888_v58  ;;  %v904_v44 = vmul.f32 0.16666667, %v898_v7  ;;  %v905_v2 = vmul.f32 0.16666667, %v899_v26  ;;  %v1491_v27 = vstv %s3064_s29 }
 0x272   :  { %v1051_v5 = vsub.f32 1.5, %v1050_v3  ;;  %v906_v48 = vmul.f32 0.16666667, %v900_v13  ;;  %v3092_v14 = vsel %vm2768_vm12, %v902_v29, 0.0  ;;  %v3096_v4 = vsel %vm2780_vm13, %v903_v38, 0.0 }
 0x273   :  { %v907_v49 = vmul.f32 0.16666667, %v901_v51  ;;  %v3102_v58 = vsel %vm2788_vm14, %v904_v44, 0.0  ;;  %v3106_v17 = vsel %vm2768_vm12, %v905_v2, 0.0  ;;  %v3113_v46 = vmul.f32 %v1491_v27, %v3092_v14 }
 0x274   :  { %v1052_v36 = vmul.f32 %v2008_v40, %v1051_v5  ;;  %v3110_v32 = vsel %vm2780_vm13, %v906_v48, 0.0  ;;  %v3116_v37 = vmul.f32 %v1491_v27, %v3096_v4  ;;  %v3126_v52 = vmul.f32 %v1491_v27, %v3102_v58 }
 0x275   :  { %v2010_v31 = vpop.eup %2009  ;;  %v3123_v30 = vsel %vm2788_vm14, %v907_v49, 0.0  ;;  %v3129_v50 = vmul.f32 %v1491_v27, %v3106_v17  ;;  %v3132_v20 = vmul.f32 %v1491_v27, %v3110_v32  ;;  %vm1249_vm7 = vweird.f32 %v3074_v15 }
 0x276   :  { %v1056_v10 = vsel %vm1055_vm6, %v2008_v40, %v1052_v36  ;;  %v1244_v7 = vmul.f32 %v2010_v31, %v3074_v15  ;;  %vm1250_vm8 = vweird.f32 %v2010_v31  ;;  %v3137_v39 = vstv %s3077_s1 }
 0x277   :  { %v1059_v63 = vmul.f32 %v1058_v22, %v1056_v10  ;;  %v3142_v26 = vmul.f32 %v1491_v27, %v3123_v30  ;;  %v3145_v3 = vstv %s3081_s6  ;;  %v1307_v13 = vstv %s3072_s30  ;;  %vm1251_vm9 = vmor %vm1249_vm7, %vm1250_vm8 }
 0x278   :  { %v1245_v29 = vmul.f32 %v2010_v31, %v1244_v7  ;;  %v3149_v38 = vstv %s3085_s7  ;;  %v3152_v40 = vmul.f32 %v1307_v13, %v3092_v14  ;;  %v3155_v51 = vmul.f32 %v1307_v13, %v3096_v4  ;;  %s1945_s7 = sld [smem:[#allocation6 + $0x8]] }
 0x279   :  { %v1066_v44 = vmul.f32 %v1060_v62, %v1059_v63  ;;  %v1067_v22 = vmul.f32 %v1061_v56, %v1059_v63  ;;  %v1068_v2 = vmul.f32 %v1062_v9, %v1059_v63  ;;  %v1069_v27 = vmul.f32 %v1063_v16, %v1059_v63 }
 0x27a   :  { %v1070_v5 = vmul.f32 %v1064_v18, %v1059_v63  ;;  %v1246_v48 = vmul.f32 0.5, %v1245_v29  ;;  %v1071_v62 = vmul.f32 %v1065_v42, %v1059_v63  ;;  %v3176_v49 = vmul.f32 %v1307_v13, %v3102_v58 }
 0x27b   :  { %v1074_v56 = vadd.f32 %v3050_v43, %v1066_v44  ;;  %v1075_v9 = vadd.f32 %v3050_v43, %v1067_v22  ;;  %v1076_v16 = vadd.f32 %v3050_v43, %v1068_v2  ;;  %v1077_v36 = vadd.f32 %v3050_v43, %v1069_v27 }
 0x27c   :  { %v1247_v10 = vsub.f32 1.5, %v1246_v48  ;;  %v1078_v18 = vadd.f32 %v3050_v43, %v1070_v5  ;;  %v1079_v7 = vadd.f32 %v3050_v43, %v1071_v62  ;;  %v3187_v28 = vmul.f32 %v1307_v13, %v3106_v17 }
 0x27d   :  { %v1080_v42 = vmax.f32 %v1074_v56, 0.0  ;;  %v1081_v63 = vmax.f32 %v1075_v9, 0.0  ;;  %v1082_v29 = vmax.f32 %v1076_v16, 0.0  ;;  %v1083_v45 = vmax.f32 %v1077_v36, 0.0 }
 0x27e   :  { %v1248_v44 = vmul.f32 %v2010_v31, %v1247_v10  ;;  %v1084_v12 = vmax.f32 %v1078_v18, 0.0  ;;  %v1085_v22 = vmax.f32 %v1079_v7, 0.0  ;;  %v3190_v2 = vmul.f32 %v1307_v13, %v3110_v32 }
 0x27f   :  { %v1086_v27 = vmin.f32 %v1080_v42, 6.0  ;;  %v1087_v48 = vmin.f32 %v1081_v63, 6.0  ;;  %v1088_v43 = vmin.f32 %v1082_v29, 6.0  ;;  %v1089_v5 = vmin.f32 %v1083_v45, 6.0 }
 0x280   :  { %v1252_v62 = vsel %vm1251_vm9, %v2010_v31, %v1248_v44  ;;  %v1090_v56 = vmin.f32 %v1084_v12, 6.0  ;;  %v1091_v9 = vmin.f32 %v1085_v22, 6.0  ;;  %v3196_v16 = vmul.f32 %v1307_v13, %v3123_v30 }
 0x281   :  { %v1255_v36 = vmul.f32 %v1254_v61, %v1252_v62  ;;  %v1092_v10 = vmul.f32 %v1086_v27, %v2792_v34  ;;  %v1093_v18 = vmul.f32 %v1087_v48, %v2794_v19  ;;  %v1094_v7 = vmul.f32 %v1088_v43, %v2800_v24 }
 0x282   :  { %v1095_v42 = vmul.f32 %v1089_v5, %v2802_v6  ;;  %v1096_v15 = vmul.f32 %v1090_v56, %v3709_v25  ;;  %v1097_v45 = vmul.f32 %v1091_v9, %v3710_v60  ;;  %v3207_v31 = vstv %s3178_s0 }
 0x283   :  { %v1262_v12 = vmul.f32 %v1256_v23, %v1255_v36  ;;  %v1263_v34 = vmul.f32 %v1257_v21, %v1255_v36  ;;  %v1264_v19 = vmul.f32 %v1258_v41, %v1255_v36  ;;  %v1265_v24 = vmul.f32 %v1259_v57, %v1255_v36 }
 0x284   :  { %v1098_v6 = vmul.f32 0.16666667, %v1092_v10  ;;  %v1099_v25 = vmul.f32 0.16666667, %v1093_v18  ;;  %v1100_v60 = vmul.f32 0.16666667, %v1094_v7  ;;  %v3711_v61 = vsub.f32 %v2955_v11, %v3047_v54 }
 0x285   :  { %v1270_v23 = vadd.f32 %v3056_v59, %v1262_v12  ;;  %v1271_v63 = vadd.f32 %v3056_v59, %v1263_v34  ;;  %v1101_v21 = vmul.f32 0.16666667, %v1095_v42  ;;  %v1102_v29 = vmul.f32 0.16666667, %v1096_v15 }
 0x286   :  { %v1266_v13 = vmul.f32 %v3711_v61, %v1255_v36  ;;  %v1103_v44 = vmul.f32 0.16666667, %v1097_v45  ;;  %v3228_v41 = vsel %vm2768_vm12, %v1098_v6, 0.0  ;;  %v3232_v57 = vsel %vm2780_vm13, %v1099_v25, 0.0 }
 0x287   :  { %v3236_v22 = vsel %vm2788_vm14, %v1100_v60, 0.0  ;;  %v3240_v27 = vsel %vm2768_vm12, %v1101_v21, 0.0  ;;  %v3244_v48 = vsel %vm2780_vm13, %v1102_v29, 0.0  ;;  %v3712_v43 = vsub.f32 %v2968_v35, %v3047_v54 }
 0x288   :  { %v1272_v62 = vadd.f32 %v3056_v59, %v1264_v19  ;;  %v3252_v56 = vsel %vm2788_vm14, %v1103_v44, 0.0  ;;  %v1273_v9 = vadd.f32 %v3056_v59, %v1265_v24  ;;  %v1274_v10 = vadd.f32 %v3056_v59, %v1266_v13 }
 0x289   :  { %v1267_v5 = vmul.f32 %v3712_v43, %v1255_v36  ;;  %v1276_v18 = vmax.f32 %v1270_v23, 0.0  ;;  %v1277_v42 = vmax.f32 %v1271_v63, 0.0  ;;  %v1500_v45 = vmul.f32 %v3137_v39, %v3228_v41 }
 0x28a   :  { %v1278_v15 = vmax.f32 %v1272_v62, 0.0  ;;  %v1279_v54 = vmax.f32 %v1273_v9, 0.0  ;;  %v1280_v36 = vmax.f32 %v1274_v10, 0.0  ;;  %v1501_v34 = vmul.f32 %v3137_v39, %v3232_v57 }
 0x28b   :  { %v1275_v7 = vadd.f32 %v3056_v59, %v1267_v5  ;;  %v1282_v12 = vmin.f32 %v1276_v18, 6.0  ;;  %v1283_v6 = vmin.f32 %v1277_v42, 6.0  ;;  %v1502_v24 = vmul.f32 %v3137_v39, %v3236_v22 }
 0x28c   :  { %v1284_v25 = vmin.f32 %v1278_v15, 6.0  ;;  %v1285_v60 = vmin.f32 %v1279_v54, 6.0  ;;  %v1286_v61 = vmin.f32 %v1280_v36, 6.0  ;;  %v1503_v13 = vmul.f32 %v3137_v39, %v3240_v27 }
 0x28d   :  { %v1281_v19 = vmax.f32 %v1275_v7, 0.0  ;;  %v1288_v59 = vmul.f32 %v1282_v12, %v2945_v33  ;;  %v1289_v63 = vmul.f32 %v1283_v6, %v2947_v47  ;;  %v1504_v29 = vmul.f32 %v3137_v39, %v3244_v48 }
 0x28e   :  { %v1290_v21 = vmul.f32 %v1284_v25, %v2949_v53  ;;  %v1291_v44 = vmul.f32 %v1285_v60, %v2953_v55  ;;  %v1292_v43 = vmul.f32 %v1286_v61, %v2955_v11  ;;  %v1505_v33 = vmul.f32 %v3137_v39, %v3252_v56 }
 0x28f   :  { %v1287_v23 = vmin.f32 %v1281_v19, 6.0  ;;  %v1294_v5 = vmul.f32 0.16666667, %v1288_v59  ;;  %v1295_v9 = vmul.f32 0.16666667, %v1289_v63  ;;  %v1506_v47 = vadd.f32 %v1500_v45, %v3113_v46 }
 0x290   :  { %v1296_v10 = vmul.f32 0.16666667, %v1290_v21  ;;  %v1297_v53 = vmul.f32 0.16666667, %v1291_v44  ;;  %v1298_v18 = vmul.f32 0.16666667, %v1292_v43  ;;  %v1507_v55 = vadd.f32 %v1501_v34, %v3116_v37 }
 0x291   :  { %v1293_v62 = vmul.f32 %v1287_v23, %v2968_v35  ;;  %v3280_v7 = vsel %vm2768_vm12, %v1294_v5, 0.0  ;;  %v3285_v11 = vsel %vm2780_vm13, %v1295_v9, 0.0  ;;  %v1508_v39 = vadd.f32 %v1502_v24, %v3126_v52 }
 0x292   :  { %v3289_v35 = vsel %vm2788_vm14, %v1296_v10, 0.0  ;;  %v3294_v46 = vsel %vm2768_vm12, %v1297_v53, 0.0  ;;  %v3298_v15 = vsel %vm2780_vm13, %v1298_v18, 0.0  ;;  %v1509_v37 = vadd.f32 %v1503_v13, %v3129_v50 }
 0x293   :  { %v1299_v42 = vmul.f32 0.16666667, %v1293_v62  ;;  %v1510_v45 = vadd.f32 %v1504_v29, %v3132_v20  ;;  %v1511_v36 = vadd.f32 %v1505_v33, %v3142_v26  ;;  %v1514_v8 = vmul.f32 %v3145_v3, %v3280_v7 }
 0x294   :  { %v1515_v52 = vmul.f32 %v3145_v3, %v3285_v11  ;;  %v1516_v1 = vmul.f32 %v3145_v3, %v3289_v35  ;;  %v1517_v50 = vmul.f32 %v3145_v3, %v3294_v46  ;;  %v1518_v20 = vmul.f32 %v3145_v3, %v3298_v15 }
 0x295   :  { %v3304_v54 = vsel %vm2788_vm14, %v1299_v42, 0.0  ;;  %v1520_v12 = vadd.f32 %v1514_v8, %v1506_v47  ;;  %v1316_v34 = vmul.f32 %v3207_v31, %v3228_v41  ;;  %v3322_v19 = vstv %s3270_s2 }
 0x296   :  { %v1519_v0 = vmul.f32 %v3145_v3, %v3304_v54  ;;  %v1521_v26 = vadd.f32 %v1515_v52, %v1507_v55  ;;  %v1522_v6 = vadd.f32 %v1516_v1, %v1508_v39  ;;  %v1523_v25 = vadd.f32 %v1517_v50, %v1509_v37 }
 0x297   :  { %v1524_v24 = vadd.f32 %v1518_v20, %v1510_v45  ;;  %v1528_v61 = vadd.f32 %v3149_v38, %v1520_v12  ;;  %v1317_v13 = vmul.f32 %v3207_v31, %v3232_v57  ;;  %v1318_v3 = vmul.f32 %v3207_v31, %v3236_v22 }
 0x298   :  { %v1525_v60 = vadd.f32 %v1519_v0, %v1511_v36  ;;  %v1529_v59 = vadd.f32 %v3149_v38, %v1521_v26  ;;  %v1530_v23 = vadd.f32 %v3149_v38, %v1522_v6  ;;  %v1531_v63 = vadd.f32 %v3149_v38, %v1523_v25 }
 0x299   :  { %v1532_v21 = vadd.f32 %v3149_v38, %v1524_v24  ;;  %v1534_v44 = vadd.f32 3.0, %v1528_v61  ;;  %v1319_v5 = vmul.f32 %v3207_v31, %v3240_v27  ;;  %v1320_v33 = vmul.f32 %v3207_v31, %v3244_v48 }
 0x29a   :  { %v1533_v29 = vadd.f32 %v3149_v38, %v1525_v60  ;;  %v1535_v43 = vadd.f32 3.0, %v1529_v59  ;;  %v1536_v62 = vadd.f32 3.0, %v1530_v23  ;;  %v1537_v9 = vadd.f32 3.0, %v1531_v63 }
 0x29b   :  { %v1538_v10 = vadd.f32 3.0, %v1532_v21  ;;  %v1540_v53 = vmax.f32 %v1534_v44, 0.0  ;;  %v1321_v55 = vmul.f32 %v3207_v31, %v3252_v56  ;;  %v1322_v42 = vadd.f32 %v1316_v34, %v3152_v40 }
 0x29c   :  { %v1539_v47 = vadd.f32 3.0, %v1533_v29  ;;  %v1541_v18 = vmax.f32 %v1535_v43, 0.0  ;;  %v1542_v38 = vmax.f32 %v1536_v62, 0.0  ;;  %v1543_v39 = vmax.f32 %v1537_v9, 0.0 }
 0x29d   :  { %v1544_v37 = vmax.f32 %v1538_v10, 0.0  ;;  %v1546_v36 = vmin.f32 %v1540_v53, 6.0  ;;  %v1323_v52 = vadd.f32 %v1317_v13, %v3155_v51  ;;  %v1324_v1 = vadd.f32 %v1318_v3, %v3176_v49 }
 0x29e   :  { %v1545_v45 = vmax.f32 %v1539_v47, 0.0  ;;  %v1547_v8 = vmin.f32 %v1541_v18, 6.0  ;;  %v1548_v50 = vmin.f32 %v1542_v38, 6.0  ;;  %v1549_v20 = vmin.f32 %v1543_v39, 6.0 }
 0x29f   :  { %v1550_v0 = vmin.f32 %v1544_v37, 6.0  ;;  %v1552_v26 = vmul.f32 %v1546_v36, %v1528_v61  ;;  %v1325_v40 = vadd.f32 %v1319_v5, %v3187_v28  ;;  %v1326_v34 = vadd.f32 %v1320_v33, %v3190_v2 }
 0x2a0   :  { %v1551_v12 = vmin.f32 %v1545_v45, 6.0  ;;  %v1553_v31 = vmul.f32 %v1547_v8, %v1529_v59  ;;  %v1554_v6 = vmul.f32 %v1548_v50, %v1530_v23  ;;  %v1555_v25 = vmul.f32 %v1549_v20, %v1531_v63 }
 0x2a1   :  { %v1556_v24 = vmul.f32 %v1550_v0, %v1532_v21  ;;  %v3349_v60 = vmul.f32 0.16666667, %v1552_v26  ;;  %v1330_v13 = vmul.f32 %v3322_v19, %v3280_v7  ;;  %v1331_v61 = vmul.f32 %v3322_v19, %v3285_v11 }
 0x2a2   :  { %v1557_v51 = vmul.f32 %v1551_v12, %v1533_v29  ;;  %v3351_v49 = vmul.f32 0.16666667, %v1553_v31  ;;  %v3357_v59 = vmul.f32 0.16666667, %v1554_v6  ;;  %v3359_v28 = vmul.f32 0.16666667, %v1555_v25 }
 0x2a3   :  { %v3361_v2 = vmul.f32 0.16666667, %v1556_v24  ;;  %v1332_v3 = vmul.f32 %v3322_v19, %v3289_v35  ;;  %v1564_v23 = vsel %vm191_vm4, %v3349_v60, 0.0  ;;  %v1327_v21 = vadd.f32 %v1321_v55, %v3196_v16 }
 0x2a4   :  { %v1565_v63 = vsel %vm191_vm4, %v3351_v49, 0.0  ;;  %v1333_v29 = vmul.f32 %v3322_v19, %v3294_v46  ;;  %v3372_v44 = vmul.f32 0.16666667, %v1557_v51  ;;  %v1567_v5 = vsel %vm195_vm5, %v3357_v59, 0.0 }
 0x2a5   :  { %v1566_v43 = vadd.f32 %v1565_v63, %v1564_v23  ;;  %v1569_v33 = vsel %vm191_vm4, %v3359_v28, 0.0  ;;  %v1571_v62 = vsel %vm191_vm4, %v3361_v2, 0.0  ;;  %v1334_v16 = vmul.f32 %v3322_v19, %v3298_v15 }
 0x2a6   :  { %v1335_v9 = vmul.f32 %v3322_v19, %v3304_v54  ;;  %v1336_v10 = vadd.f32 %v1330_v13, %v1322_v42  ;;  %v1337_v53 = vadd.f32 %v1331_v61, %v1323_v52  ;;  %v1338_v18 = vadd.f32 %v1332_v3, %v1324_v1 }
 0x2a7   :  { %v1568_v47 = vadd.f32 %v1567_v5, %v1566_v43  ;;  %v1339_v55 = vadd.f32 %v1333_v29, %v1325_v40  ;;  %v1340_v38 = vadd.f32 %v1334_v16, %v1326_v34  ;;  %v1343_v37 = vstv %s3347_s3 }
 0x2a8   :  { %v1341_v39 = vadd.f32 %v1335_v9, %v1327_v21  ;;  %v1675_v45 = vstv %s3343_s9  ;;  %v1344_v8 = vadd.f32 %v1343_v37, %v1336_v10  ;;  %v1345_v50 = vadd.f32 %v1343_v37, %v1337_v53  ;;  %s1946_s9 = sld [smem:[#allocation7 + $0x8]] }
 0x2a9   :  { %v1570_v36 = vadd.f32 %v1569_v33, %v1568_v47  ;;  %v1346_v20 = vadd.f32 %v1343_v37, %v1338_v18  ;;  %v1573_v0 = vsel %vm195_vm5, %v3372_v44, 0.0  ;;  %v1347_v12 = vadd.f32 %v1343_v37, %v1339_v55 }
 0x2aa   :  { %v1348_v26 = vadd.f32 %v1343_v37, %v1340_v38  ;;  %v1349_v31 = vadd.f32 %v1343_v37, %v1341_v39  ;;  %v1350_v42 = vadd.f32 3.0, %v1344_v8  ;;  %v1351_v52 = vadd.f32 3.0, %v1345_v50 }
 0x2ab   :  { %v1572_v19 = vadd.f32 %v1571_v62, %v1570_v36  ;;  %v1352_v1 = vadd.f32 3.0, %v1346_v20  ;;  %v1353_v40 = vadd.f32 3.0, %v1347_v12  ;;  %v1676_v25 = vmul.f32 %v1675_v45, %v3092_v14 }
 0x2ac   :  { %v1354_v34 = vadd.f32 3.0, %v1348_v26  ;;  %v1355_v6 = vadd.f32 3.0, %v1349_v31  ;;  %v1356_v51 = vmax.f32 %v1350_v42, 0.0  ;;  %v1357_v13 = vmax.f32 %v1351_v52, 0.0 }
 0x2ad   :  { %v1574_v24 = vadd.f32 %v1573_v0, %v1572_v19  ;;  %v1358_v61 = vmax.f32 %v1352_v1, 0.0  ;;  %v1359_v3 = vmax.f32 %v1353_v40, 0.0  ;;  %v1677_v21 = vmul.f32 %v1675_v45, %v3096_v4 }
 0x2ae   :  { %v1360_v23 = vmax.f32 %v1354_v34, 0.0  ;;  %v1361_v63 = vmax.f32 %v1355_v6, 0.0  ;;  %v1362_v29 = vmin.f32 %v1356_v51, 6.0  ;;  %v1363_v43 = vmin.f32 %v1357_v13, 6.0 }
 0x2af   :  { %1575 = vadd.xlane.f32.xlu2 %v1574_v24  ;;  %v1364_v5 = vmin.f32 %v1358_v61, 6.0  ;;  %v1678_v33 = vmul.f32 %v1675_v45, %v3102_v58  ;;  %v1365_v62 = vmin.f32 %v1359_v3, 6.0  ;;  %v1679_v14 = vmul.f32 %v1675_v45, %v3106_v17 }
 0x2b0   :  { %v1366_v16 = vmin.f32 %v1360_v23, 6.0  ;;  %v1367_v9 = vmin.f32 %v1361_v63, 6.0  ;;  %v1368_v10 = vmul.f32 %v1362_v29, %v1344_v8  ;;  %v1369_v47 = vmul.f32 %v1363_v43, %v1345_v50 }
 0x2b1   :  { %v1370_v53 = vmul.f32 %v1364_v5, %v1346_v20  ;;  %v1680_v18 = vmul.f32 %v1675_v45, %v3110_v32  ;;  %v1371_v55 = vmul.f32 %v1365_v62, %v1347_v12  ;;  %v1683_v39 = vstv %s3388_s8 }
 0x2b2   :  { %v1372_v38 = vmul.f32 %v1366_v16, %v1348_v26  ;;  %v1373_v4 = vmul.f32 %v1367_v9, %v1349_v31  ;;  %v3398_v37 = vmul.f32 0.16666667, %v1368_v10  ;;  %v3400_v36 = vmul.f32 0.16666667, %v1369_v47 }
 0x2b3   :  { %v3402_v58 = vmul.f32 0.16666667, %v1370_v53  ;;  %v1681_v0 = vmul.f32 %v1675_v45, %v3123_v30  ;;  %v3405_v17 = vmul.f32 0.16666667, %v1371_v55  ;;  %v1684_v32 = vmul.f32 %v1683_v39, %v3228_v41 }
 0x2b4   :  { %v3407_v8 = vmul.f32 0.16666667, %v1372_v38  ;;  %v3409_v50 = vmul.f32 0.16666667, %v1373_v4  ;;  %v1380_v20 = vsel %vm191_vm4, %v3398_v37, 0.0  ;;  %v1381_v12 = vsel %vm191_vm4, %v3400_v36, 0.0 }
 0x2b5   :  { %v1401_v26 = vmul.f32 %v3398_v37, %v3398_v37  ;;  %v1685_v31 = vmul.f32 %v1683_v39, %v3232_v57  ;;  %v1382_v30 = vadd.f32 %v1381_v12, %v1380_v20  ;;  %v1383_v45 = vsel %vm195_vm5, %v3402_v58, 0.0 }
 0x2b6   :  { %v1385_v41 = vsel %vm191_vm4, %v3405_v17, 0.0  ;;  %v1387_v19 = vsel %vm191_vm4, %v3407_v8, 0.0  ;;  %v1402_v42 = vmul.f32 %v3400_v36, %v3400_v36  ;;  %v1403_v52 = vmul.f32 %v3402_v58, %v3402_v58 }
 0x2b7   :  { %v1404_v57 = vmul.f32 %v3405_v17, %v3405_v17  ;;  %v1405_v1 = vmul.f32 %v3407_v8, %v3407_v8  ;;  %v1384_v40 = vadd.f32 %v1383_v45, %v1382_v30  ;;  %v1389_v34 = vsel %vm195_vm5, %v3409_v50, 0.0 }
 0x2b8   :  { %v1407_v6 = vsel %vm191_vm4, %v1401_v26, 0.0  ;;  %v1686_v24 = vmul.f32 %v1683_v39, %v3236_v22  ;;  %v1406_v51 = vmul.f32 %v3409_v50, %v3409_v50  ;;  %v1408_v13 = vsel %vm191_vm4, %v1402_v42, 0.0 }
 0x2b9   :  { %v1410_v61 = vsel %vm195_vm5, %v1403_v52, 0.0  ;;  %v1412_v3 = vsel %vm191_vm4, %v1404_v57, 0.0  ;;  %v1386_v23 = vadd.f32 %v1385_v41, %v1384_v40  ;;  %v1409_v63 = vadd.f32 %v1408_v13, %v1407_v6 }
 0x2ba   :  { %v1414_v29 = vsel %vm191_vm4, %v1405_v1, 0.0  ;;  %v1687_v43 = vmul.f32 %v1683_v39, %v3240_v27  ;;  %v1688_v5 = vmul.f32 %v1683_v39, %v3244_v48  ;;  %v1689_v22 = vmul.f32 %v1683_v39, %v3252_v56 }
 0x2bb   :  { %v1690_v62 = vadd.f32 %v1684_v32, %v1676_v25  ;;  %v1691_v16 = vadd.f32 %v1685_v31, %v1677_v21  ;;  %v1388_v9 = vadd.f32 %v1387_v19, %v1386_v23  ;;  %v1411_v10 = vadd.f32 %v1410_v61, %v1409_v63 }
 0x2bc   :  { %v1692_v47 = vadd.f32 %v1686_v24, %v1678_v33  ;;  %v1693_v53 = vadd.f32 %v1687_v43, %v1679_v14  ;;  %v1694_v55 = vadd.f32 %v1688_v5, %v1680_v18  ;;  %v1695_v38 = vadd.f32 %v1689_v22, %v1681_v0 }
 0x2bd   :  { %v1697_v4 = vstv %s3396_s10  ;;  %v1711_v20 = vstv %s3419_s11  ;;  %v1390_v12 = vadd.f32 %v1389_v34, %v1388_v9  ;;  %v1413_v26 = vadd.f32 %v1412_v3, %v1411_v10 }
 0x2be   :  { %v1698_v30 = vmul.f32 %v1697_v4, %v3280_v7  ;;  %v1699_v27 = vmul.f32 %v1697_v4, %v3285_v11  ;;  %v1700_v48 = vmul.f32 %v1697_v4, %v3289_v35  ;;  %v1701_v56 = vmul.f32 %v1697_v4, %v3294_v46 }
 0x2bf   :  { %v1702_v25 = vmul.f32 %v1697_v4, %v3298_v15  ;;  %v1703_v21 = vmul.f32 %v1697_v4, %v3304_v54  ;;  %1391 = vadd.xlane.f32.xlu0 %v1390_v12  ;;  %v1415_v33 = vadd.f32 %v1414_v29, %v1413_v26  ;;  %v1416_v14 = vsel %vm195_vm5, %v1406_v51, 0.0 }
 0x2c0   :  { %v1704_v18 = vadd.f32 %v1698_v30, %v1690_v62  ;;  %v1705_v39 = vadd.f32 %v1699_v27, %v1691_v16  ;;  %v1706_v0 = vadd.f32 %v1700_v48, %v1692_v47  ;;  %v1707_v32 = vadd.f32 %v1701_v56, %v1693_v53 }
 0x2c1   :  { %v1708_v31 = vadd.f32 %v1702_v25, %v1694_v55  ;;  %v1709_v7 = vadd.f32 %v1703_v21, %v1695_v38  ;;  %v1417_v45 = vadd.f32 %v1416_v14, %v1415_v33  ;;  %v1585_v35 = vmul.f32 %v3349_v60, %v3349_v60 }
 0x2c2   :  { %v1712_v11 = vadd.f32 %v1711_v20, %v1704_v18  ;;  %v1713_v41 = vadd.f32 %v1711_v20, %v1705_v39  ;;  %v1714_v46 = vadd.f32 %v1711_v20, %v1706_v0  ;;  %v1715_v15 = vadd.f32 %v1711_v20, %v1707_v32 }
 0x2c3   :  { %v1716_v19 = vadd.f32 %v1711_v20, %v1708_v31  ;;  %v1717_v54 = vadd.f32 %v1711_v20, %v1709_v7  ;;  %1418 = vadd.xlane.f32.xlu1 %v1417_v45  ;;  %v1586_v57 = vmul.f32 %v3351_v49, %v3351_v49  ;;  %v1587_v1 = vmul.f32 %v3357_v59, %v3357_v59 }
 0x2c4   :  { %v1718_v42 = vadd.f32 3.0, %v1712_v11  ;;  %v1719_v52 = vadd.f32 3.0, %v1713_v41  ;;  %v1720_v40 = vadd.f32 3.0, %v1714_v46  ;;  %v1721_v34 = vadd.f32 3.0, %v1715_v15 }
 0x2c5   :  { %v1722_v6 = vadd.f32 3.0, %v1716_v19  ;;  %v1723_v24 = vadd.f32 3.0, %v1717_v54  ;;  %v1588_v61 = vmul.f32 %v3359_v28, %v3359_v28  ;;  %v1589_v3 = vmul.f32 %v3361_v2, %v3361_v2 }
 0x2c6   :  { %v1724_v51 = vmax.f32 %v1718_v42, 0.0  ;;  %v1725_v13 = vmax.f32 %v1719_v52, 0.0  ;;  %v1726_v23 = vmax.f32 %v1720_v40, 0.0  ;;  %v1727_v63 = vmax.f32 %v1721_v34, 0.0 }
 0x2c7   :  { %v1728_v29 = vmax.f32 %v1722_v6, 0.0  ;;  %v1729_v43 = vmax.f32 %v1723_v24, 0.0  ;;  %v1591_v62 = vsel %vm191_vm4, %v1585_v35, 0.0  ;;  %v1592_v16 = vsel %vm191_vm4, %v1586_v57, 0.0 }
 0x2c8   :  { %v1730_v5 = vmin.f32 %v1724_v51, 6.0  ;;  %v1731_v22 = vmin.f32 %v1725_v13, 6.0  ;;  %v1732_v9 = vmin.f32 %v1726_v23, 6.0  ;;  %v1733_v10 = vmin.f32 %v1727_v63, 6.0 }
 0x2c9   :  { %v1734_v47 = vmin.f32 %v1728_v29, 6.0  ;;  %v1735_v53 = vmin.f32 %v1729_v43, 6.0  ;;  %v1593_v4 = vadd.f32 %v1592_v16, %v1591_v62  ;;  %v1594_v20 = vsel %vm195_vm5, %v1587_v1, 0.0 }
 0x2ca   :  { %v1736_v55 = vmul.f32 %v1730_v5, %v1712_v11  ;;  %v1737_v38 = vmul.f32 %v1731_v22, %v1713_v41  ;;  %v1738_v12 = vmul.f32 %v1732_v9, %v1714_v46  ;;  %v1739_v26 = vmul.f32 %v1733_v10, %v1715_v15 }
 0x2cb   :  { %v1740_v30 = vmul.f32 %v1734_v47, %v1716_v19  ;;  %v1741_v27 = vmul.f32 %v1735_v53, %v1717_v54  ;;  %v1595_v25 = vadd.f32 %v1594_v20, %v1593_v4  ;;  %v1596_v21 = vsel %vm191_vm4, %v1588_v61, 0.0 }
 0x2cc   :  { %v3470_v48 = vmul.f32 0.16666667, %v1736_v55  ;;  %v3472_v56 = vmul.f32 0.16666667, %v1737_v38  ;;  %v3475_v33 = vmul.f32 0.16666667, %v1738_v12  ;;  %v1590_v32 = vmul.f32 %v3372_v44, %v3372_v44 }
 0x2cd   :  { %v3477_v14 = vmul.f32 0.16666667, %v1739_v26  ;;  %v3479_v18 = vmul.f32 0.16666667, %v1740_v30  ;;  %v1597_v31 = vadd.f32 %v1596_v21, %v1595_v25  ;;  %v3487_v7 = vmul.f32 0.16666667, %v1741_v27 }
 0x2ce   :  { %v1769_v39 = vmul.f32 %v3470_v48, %v3470_v48  ;;  %v1770_v0 = vmul.f32 %v3472_v56, %v3472_v56  ;;  %v1771_v45 = vmul.f32 %v3475_v33, %v3475_v33  ;;  %v1598_v11 = vsel %vm191_vm4, %v1589_v3, 0.0 }
 0x2cf   :  { %v1772_v41 = vmul.f32 %v3477_v14, %v3477_v14  ;;  %v1599_v15 = vadd.f32 %v1598_v11, %v1597_v31  ;;  %v1773_v19 = vmul.f32 %v3479_v18, %v3479_v18  ;;  %v1600_v52 = vsel %vm195_vm5, %v1590_v32, 0.0 }
 0x2d0   :  { %v1775_v35 = vsel %vm191_vm4, %v1769_v39, 0.0  ;;  %v1776_v46 = vsel %vm191_vm4, %v1770_v0, 0.0  ;;  %v1778_v42 = vsel %vm195_vm5, %v1771_v45, 0.0  ;;  %v1748_v57 = vsel %vm191_vm4, %v3470_v48, 0.0 }
 0x2d1   :  { %v1777_v54 = vadd.f32 %v1776_v46, %v1775_v35  ;;  %v1749_v1 = vsel %vm191_vm4, %v3472_v56, 0.0  ;;  %v1601_v34 = vadd.f32 %v1600_v52, %v1599_v15  ;;  %v1774_v24 = vmul.f32 %v3487_v7, %v3487_v7 }
 0x2d2   :  { %v1750_v6 = vadd.f32 %v1749_v1, %v1748_v57  ;;  %v1780_v51 = vsel %vm191_vm4, %v1772_v41, 0.0  ;;  %v1751_v13 = vsel %vm195_vm5, %v3475_v33, 0.0  ;;  %v1782_v23 = vsel %vm191_vm4, %v1773_v19, 0.0 }
 0x2d3   :  { %v1779_v40 = vadd.f32 %v1778_v42, %v1777_v54  ;;  %1602 = vadd.xlane.f32.xlu0 %v1601_v34  ;;  %v1753_v63 = vsel %vm191_vm4, %v3477_v14, 0.0  ;;  %v1784_v5 = vsel %vm195_vm5, %v1774_v24, 0.0  ;;  %v1755_v22 = vsel %vm191_vm4, %v3479_v18, 0.0 }
 0x2d4   :  { %v1752_v3 = vadd.f32 %v1751_v13, %v1750_v6  ;;  %v1757_v9 = vsel %vm195_vm5, %v3487_v7, 0.0 }
 0x2d5   :  { %v1781_v61 = vadd.f32 %v1780_v51, %v1779_v40 }
 0x2d6   :  { %v1754_v43 = vadd.f32 %v1753_v63, %v1752_v3 }
 0x2d7   :  { %v1783_v29 = vadd.f32 %v1782_v23, %v1781_v61 }
 0x2d8   :  { %v1756_v16 = vadd.f32 %v1755_v22, %v1754_v43 }
 0x2d9   :  { %v1785_v62 = vadd.f32 %v1784_v5, %v1783_v29 }
 0x2da   :  { %v1758_v10 = vadd.f32 %v1757_v9, %v1756_v16 }
 0x2db   :  { %1786 = vadd.xlane.f32.xlu2 %v1785_v62 }
 0x2dc   :  { %1759 = vadd.xlane.f32.xlu1 %v1758_v10 }
 0x322   :  { %v1576_v47 = vpop.xlane.xlu2 %1575 }
 0x323   :  { %v1577_v53 = vrot.slane %v1576_v47, 4 }
 0x325   :  { %v1578_v55 = vadd.f32 %v1577_v53, %v1576_v47 }
 0x327   :  { %v1579_v12 = vrot.slane %v1578_v55, 2 }
 0x329   :  { %v1580_v39 = vadd.f32 %v1579_v12, %v1578_v55 }
 0x32b   :  { %v1581_v11 = vrot.slane %v1580_v39, 1 }
 0x32d   :  { %v1582_v46 = vadd.f32 %v1581_v11, %v1580_v39 }
 0x332   :  { %v1392_v38 = vpop.xlane.xlu0 %1391 }
 0x333   :  { %v1393_v4 = vrot.slane %v1392_v38, 4 }
 0x335   :  { %v1394_v20 = vadd.f32 %v1393_v4, %v1392_v38 }
 0x336   :  { %v1419_v26 = vpop.xlane.xlu1 %1418 }
 0x337   :  { %v1395_v30 = vrot.slane %v1394_v20, 2  ;;  %v1420_v27 = vrot.slane %v1419_v26, 4 }
 0x339   :  { %v1421_v25 = vadd.f32 %v1420_v27, %v1419_v26  ;;  %v1396_v21 = vadd.f32 %v1395_v30, %v1394_v20 }
 0x33b   :  { %v1422_v0 = vrot.slane %v1421_v25, 2  ;;  %v1397_v32 = vrot.slane %v1396_v21, 1 }
 0x33d   :  { %v1398_v31 = vadd.f32 %v1397_v32, %v1396_v21  ;;  %v1423_v45 = vadd.f32 %v1422_v0, %v1421_v25 }
 0x33f   :  { %1983 = vpush %v1398_v31  ;;  %v1424_v41 = vrot.slane %v1423_v45, 1  ;;  %v1444_v31 = vstv %s1933_s15 }
 0x341   :  { %v1425_v35 = vadd.f32 %v1424_v41, %v1423_v45 }
 0x343   :  { %1985 = vpush %v1425_v35 }
 0x344   :  { %1987 = vpush %v1582_v46 }
 0x346   :  { %v1603_v15 = vpop.xlane.xlu0 %1602 }
 0x347   :  { %v1604_v19 = vrot.slane %v1603_v15, 4 }
 0x349   :  { %v1605_v54 = vadd.f32 %v1604_v19, %v1603_v15 }
 0x34b   :  { %v1606_v42 = vrot.slane %v1605_v54, 2 }
 0x34d   :  { %v1607_v1 = vadd.f32 %v1606_v42, %v1605_v54 }
 0x34e   :  { %v1787_v52 = vpop.xlane.xlu2 %1786 }
 0x34f   :  { %v1788_v57 = vrot.slane %v1787_v52, 4  ;;  %v1760_v40 = vpop.xlane.xlu1 %1759  ;;  %v1608_v24 = vrot.slane %v1607_v1, 1 }
 0x350   :  { %v1761_v6 = vrot.slane %v1760_v40, 4 }
 0x351   :  { %v1789_v34 = vadd.f32 %v1788_v57, %v1787_v52  ;;  %v1609_v61 = vadd.f32 %v1608_v24, %v1607_v1  ;;  %v1459_v52 = vstv %s1934_s17 }
 0x352   :  { %v1762_v13 = vadd.f32 %v1761_v6, %v1760_v40 }
 0x353   :  { %v1790_v51 = vrot.slane %v1789_v34, 2  ;;  %1989 = vpush %v1609_v61 }
 0x354   :  { %v1763_v23 = vrot.slane %v1762_v13, 2 }
 0x355   :  { %v1791_v3 = vadd.f32 %v1790_v51, %v1789_v34 }
 0x356   :  { %v1764_v63 = vadd.f32 %v1763_v23, %v1762_v13 }
 0x357   :  { %v1792_v29 = vrot.slane %v1791_v3, 1 }
 0x358   :  { %v1765_v43 = vrot.slane %v1764_v63, 1 }
 0x359   :  { %v1793_v22 = vadd.f32 %v1792_v29, %v1791_v3 }
 0x35a   :  { %v1766_v5 = vadd.f32 %v1765_v43, %v1764_v63 }
 0x35c   :  { %1991 = vpush %v1766_v5 }
 0x35d   :  { %1993 = vpush %v1793_v22 }
 0x370   :  { %s1984_s12 = spop %1983 }
 0x371   :  { %v1400_v62 = vstv %s1984_s12 }
 0x372   :  { %v1428_v16 = vmul.f32 0.0010330578, %v1400_v62 }
 0x374   :  { %s1986_s13 = spop %1985  ;;  %v1430_v10 = vmul.f32 %v1428_v16, %v1428_v16  ;;  %v1446_v11 = vsub.f32 %v3398_v37, %v1428_v16  ;;  %v1447_v35 = vsub.f32 %v3400_v36, %v1428_v16  ;;  %v1448_v46 = vsub.f32 %v3402_v58, %v1428_v16 }
 0x375   :  { %v1427_v9 = vstv %s1986_s13  ;;  %s1988_s14 = spop %1987  ;;  %v1449_v15 = vsub.f32 %v3405_v17, %v1428_v16  ;;  %v1450_v54 = vsub.f32 %v3407_v8, %v1428_v16  ;;  %v1451_v42 = vsub.f32 %v3409_v50, %v1428_v16 }
 0x376   :  { %v1429_v47 = vmul.f32 0.0010330578, %v1427_v9  ;;  %v1584_v38 = vstv %s1988_s14 }
 0x377   :  { %v3517_v12 = vmul.f32 0.0010330578, %v1584_v38 }
 0x378   :  { %v1431_v53 = vsub.f32 %v1429_v47, %v1430_v10 }
 0x379   :  { %v1614_v21 = vmul.f32 %v3517_v12, %v3517_v12 }
 0x37a   :  { %v1432_v55 = vadd.f32 1e-05, %v1431_v53 }
 0x37c   :  { %2011 = vrsqrt.f32 %v1432_v55  ;;  %vm1439_vm11 = vweird.f32 %v1432_v55 }
 0x382   :  { %v2012_v4 = vpop.eup %2011 }
 0x383   :  { %v1434_v20 = vmul.f32 %v2012_v4, %v1432_v55  ;;  %vm1440_vm10 = vweird.f32 %v2012_v4 }
 0x384   :  { %s1990_s16 = spop %1989  ;;  %vm1441_vm12 = vmor %vm1439_vm11, %vm1440_vm10 }
 0x385   :  { %v1435_v26 = vmul.f32 %v2012_v4, %v1434_v20  ;;  %v1611_v30 = vstv %s1990_s16 }
 0x386   :  { %v1613_v25 = vmul.f32 0.0010330578, %v1611_v30 }
 0x387   :  { %v1436_v27 = vmul.f32 0.5, %v1435_v26 }
 0x388   :  { %v1615_v0 = vsub.f32 %v1613_v25, %v1614_v21 }
 0x389   :  { %v1437_v39 = vsub.f32 1.5, %v1436_v27 }
 0x38a   :  { %v3521_v45 = vadd.f32 1e-05, %v1615_v0 }
 0x38b   :  { %v1438_v32 = vmul.f32 %v2012_v4, %v1437_v39 }
 0x38c   :  { %2013 = vrsqrt.f32 %v3521_v45  ;;  %vm1623_vm14 = vweird.f32 %v3521_v45 }
 0x38d   :  { %v1442_v41 = vsel %vm1441_vm12, %v2012_v4, %v1438_v32  ;;  %s1992_s4 = spop %1991 }
 0x38e   :  { %v1445_v19 = vmul.f32 %v1444_v31, %v1442_v41  ;;  %v1768_v51 = vstv %s1992_s4  ;;  %s1994_s19 = spop %1993 }
 0x38f   :  { %v3531_v53 = vmul.f32 0.0010330578, %v1768_v51  ;;  %v1795_v41 = vstv %s1994_s19  ;;  %v1635_v51 = vsub.f32 %v3372_v44, %v3517_v12 }
 0x390   :  { %v1452_v57 = vmul.f32 %v1446_v11, %v1445_v19  ;;  %v1453_v1 = vmul.f32 %v1447_v35, %v1445_v19  ;;  %v1454_v40 = vmul.f32 %v1448_v46, %v1445_v19  ;;  %v1455_v34 = vmul.f32 %v1449_v15, %v1445_v19 }
 0x391   :  { %v1456_v6 = vmul.f32 %v1450_v54, %v1445_v19  ;;  %v1457_v24 = vmul.f32 %v1451_v42, %v1445_v19  ;;  %v1628_v54 = vstv %s3533_s18 }
 0x392   :  { %v1460_v13 = vadd.f32 %v1459_v52, %v1452_v57  ;;  %v1461_v61 = vadd.f32 %v1459_v52, %v1453_v1  ;;  %v1462_v3 = vadd.f32 %v1459_v52, %v1454_v40  ;;  %v1463_v23 = vadd.f32 %v1459_v52, %v1455_v34  ;;  %v2014_v63 = vpop.eup %2013 }
 0x393   :  { %v1464_v29 = vadd.f32 %v1459_v52, %v1456_v6  ;;  %v1465_v43 = vadd.f32 %v1459_v52, %v1457_v24  ;;  %v1618_v47 = vmul.f32 %v2014_v63, %v3521_v45  ;;  %vm1624_vm13 = vweird.f32 %v2014_v63 }
 0x394   :  { %v1466_v5 = vmax.f32 %v1460_v13, 0.0  ;;  %v1467_v22 = vmax.f32 %v1461_v61, 0.0  ;;  %v1468_v62 = vmax.f32 %v1462_v3, 0.0  ;;  %v1469_v9 = vmax.f32 %v1463_v23, 0.0  ;;  %vm1625_vm15 = vmor %vm1623_vm14, %vm1624_vm13 }
 0x395   :  { %v1470_v16 = vmax.f32 %v1464_v29, 0.0  ;;  %v1471_v10 = vmax.f32 %v1465_v43, 0.0  ;;  %v1619_v27 = vmul.f32 %v2014_v63, %v1618_v47  ;;  %v1630_v52 = vsub.f32 %v3349_v60, %v3517_v12 }
 0x396   :  { %v1472_v55 = vmin.f32 %v1466_v5, 6.0  ;;  %v1473_v38 = vmin.f32 %v1467_v22, 6.0  ;;  %v1474_v4 = vmin.f32 %v1468_v62, 6.0  ;;  %v1475_v20 = vmin.f32 %v1469_v9, 6.0 }
 0x397   :  { %v1476_v26 = vmin.f32 %v1470_v16, 6.0  ;;  %v1477_v30 = vmin.f32 %v1471_v10, 6.0  ;;  %v1620_v11 = vmul.f32 0.5, %v1619_v27  ;;  %v1631_v45 = vsub.f32 %v3351_v49, %v3517_v12 }
 0x398   :  { %v1478_v25 = vmul.f32 %v1472_v55, %v3398_v37  ;;  %v1479_v21 = vmul.f32 %v1473_v38, %v3400_v36  ;;  %v1480_v39 = vmul.f32 %v1474_v4, %v3402_v58  ;;  %v1481_v0 = vmul.f32 %v1475_v20, %v3405_v17 }
 0x399   :  { %v1482_v32 = vmul.f32 %v1476_v26, %v3407_v8  ;;  %v1483_v31 = vmul.f32 %v1477_v30, %v3409_v50  ;;  %v1798_v37 = vmul.f32 %v3531_v53, %v3531_v53  ;;  %v1621_v58 = vsub.f32 1.5, %v1620_v11 }
 0x39a   :  { %v1484_v35 = vmul.f32 0.16666667, %v1478_v25  ;;  %v1485_v46 = vmul.f32 0.16666667, %v1479_v21  ;;  %v1486_v15 = vmul.f32 0.16666667, %v1480_v39  ;;  %v1632_v40 = vsub.f32 %v3357_v59, %v3517_v12 }
 0x39b   :  { %v1487_v36 = vmul.f32 0.16666667, %v1481_v0  ;;  %v1488_v19 = vmul.f32 0.16666667, %v1482_v32  ;;  %v1797_v17 = vmul.f32 0.0010330578, %v1795_v41  ;;  %v1622_v50 = vmul.f32 %v2014_v63, %v1621_v58 }
 0x39c   :  { %1858 = vst.msk [vmem:[%s3666_s5] sm:$0xff] %vm191_vm4, %v1484_v35  ;;  %v1489_v8 = vmul.f32 0.16666667, %v1483_v31  ;;  %v1633_v34 = vsub.f32 %v3359_v28, %v3517_v12  ;;  %v1634_v24 = vsub.f32 %v3361_v2, %v3517_v12  ;;  %v1643_v13 = vstv %s3541_s20 }
 0x39d   :  { %1859 = vst.msk [vmem:[%s3666_s5 + $0x8] sm:$0xff] %vm191_vm4, %v1485_v46  ;;  %v1799_v42 = vsub.f32 %v1797_v17, %v1798_v37  ;;  %v1626_v57 = vsel %vm1625_vm15, %v2014_v63, %v1622_v50 }
 0x39e   :  { %1860 = vst.msk [vmem:[%s3666_s5 + $0x10] sm:$0x3f] %vm195_vm5, %v1486_v15  ;;  %v1629_v6 = vmul.f32 %v1628_v54, %v1626_v57  ;;  %v1815_v54 = vsub.f32 %v3472_v56, %v3531_v53 }
 0x39f   :  { %1861 = vst.msk [vmem:[%s3666_s5 + $0x18] sm:$0xff] %vm191_vm4, %v1487_v36  ;;  %v3569_v1 = vadd.f32 1e-05, %v1799_v42  ;;  %v1816_v42 = vsub.f32 %v3475_v33, %v3531_v53 }
 0x3a0   :  { %1862 = vst.msk [vmem:[%s3666_s5 + $0x20] sm:$0xff] %vm191_vm4, %v1488_v19  ;;  %v1636_v61 = vmul.f32 %v1630_v52, %v1629_v6  ;;  %v1637_v3 = vmul.f32 %v1631_v45, %v1629_v6  ;;  %v1638_v23 = vmul.f32 %v1632_v40, %v1629_v6  ;;  %v1639_v63 = vmul.f32 %v1633_v34, %v1629_v6 }
 0x3a1   :  { %1863 = vst.msk [vmem:[%s3666_s5 + $0x28] sm:$0x3f] %vm195_vm5, %v1489_v8  ;;  %2015 = vrsqrt.f32 %v3569_v1  ;;  %v1640_v29 = vmul.f32 %v1634_v24, %v1629_v6  ;;  %v1641_v43 = vmul.f32 %v1635_v51, %v1629_v6  ;;  %vm1807_vm1 = vweird.f32 %v3569_v1 }
 0x3a2   :  { %v1644_v5 = vadd.f32 %v1643_v13, %v1636_v61  ;;  %v1645_v22 = vadd.f32 %v1643_v13, %v1637_v3  ;;  %v1646_v62 = vadd.f32 %v1643_v13, %v1638_v23  ;;  %v1647_v9 = vadd.f32 %v1643_v13, %v1639_v63 }
 0x3a3   :  { %v1648_v16 = vadd.f32 %v1643_v13, %v1640_v29  ;;  %v1649_v10 = vadd.f32 %v1643_v13, %v1641_v43  ;;  %v1817_v52 = vsub.f32 %v3477_v14, %v3531_v53  ;;  %v1819_v45 = vsub.f32 %v3487_v7, %v3531_v53 }
 0x3a4   :  { %v1650_v47 = vmax.f32 %v1644_v5, 0.0  ;;  %v1651_v55 = vmax.f32 %v1645_v22, 0.0  ;;  %v1652_v38 = vmax.f32 %v1646_v62, 0.0  ;;  %v1653_v4 = vmax.f32 %v1647_v9, 0.0 }
 0x3a5   :  { %v1654_v20 = vmax.f32 %v1648_v16, 0.0  ;;  %v1655_v26 = vmax.f32 %v1649_v10, 0.0  ;;  %v1827_v40 = vstv %s1946_s9 }
 0x3a6   :  { %v1656_v30 = vmin.f32 %v1650_v47, 6.0  ;;  %v1657_v27 = vmin.f32 %v1651_v55, 6.0  ;;  %v1658_v25 = vmin.f32 %v1652_v38, 6.0  ;;  %v1659_v21 = vmin.f32 %v1653_v4, 6.0 }
 0x3a7   :  { %v2016_v12 = vpop.eup %2015  ;;  %v1660_v39 = vmin.f32 %v1654_v20, 6.0  ;;  %v1661_v0 = vmin.f32 %v1655_v26, 6.0 }
 0x3a8   :  { %v1802_v32 = vmul.f32 %v2016_v12, %v3569_v1  ;;  %v1662_v31 = vmul.f32 %v1656_v30, %v3349_v60  ;;  %v1663_v11 = vmul.f32 %v1657_v27, %v3351_v49  ;;  %v1664_v41 = vmul.f32 %v1658_v25, %v3357_v59 }
 0x3a9   :  { %v1665_v35 = vmul.f32 %v1659_v21, %v3359_v28  ;;  %v1666_v46 = vmul.f32 %v1660_v39, %v3361_v2  ;;  %v1667_v15 = vmul.f32 %v1661_v0, %v3372_v44  ;;  %vm1808_vm0 = vweird.f32 %v2016_v12 }
 0x3aa   :  { %v1803_v37 = vmul.f32 %v2016_v12, %v1802_v32  ;;  %v1668_v36 = vmul.f32 0.16666667, %v1662_v31  ;;  %v1669_v19 = vmul.f32 0.16666667, %v1663_v11  ;;  %v1670_v58 = vmul.f32 0.16666667, %v1664_v41  ;;  %vm1809_vm2 = vmor %vm1807_vm1, %vm1808_vm0 }
 0x3ab   :  { %v1671_v17 = vmul.f32 0.16666667, %v1665_v35  ;;  %v1672_v8 = vmul.f32 0.16666667, %v1666_v46  ;;  %v1673_v49 = vmul.f32 0.16666667, %v1667_v15  ;;  %v1812_v2 = vstv %s1945_s7 }
 0x3ac   :  { %1947 = vst.msk [vmem:[%s3666_s5 + $0x30] sm:$0xff] %vm191_vm4, %v1668_v36  ;;  %v1804_v60 = vmul.f32 0.5, %v1803_v37  ;;  %v1814_v44 = vsub.f32 %v3470_v48, %v3531_v53  ;;  %v1818_v1 = vsub.f32 %v3479_v18, %v3531_v53 }
 0x3ad   :  { %1948 = vst.msk [vmem:[%s3666_s5 + $0x38] sm:$0xff] %vm191_vm4, %v1669_v19 }
 0x3ae   :  { %1949 = vst.msk [vmem:[%s3666_s5 + $0x40] sm:$0x3f] %vm195_vm5, %v1670_v58  ;;  %v1805_v59 = vsub.f32 1.5, %v1804_v60 }
 0x3af   :  { %1950 = vst.msk [vmem:[%s3666_s5 + $0x48] sm:$0xff] %vm191_vm4, %v1671_v17 }
 0x3b0   :  { %1951 = vst.msk [vmem:[%s3666_s5 + $0x50] sm:$0xff] %vm191_vm4, %v1672_v8  ;;  %v1806_v28 = vmul.f32 %v2016_v12, %v1805_v59 }
 0x3b1   :  { %1952 = vst.msk [vmem:[%s3666_s5 + $0x58] sm:$0x3f] %vm195_vm5, %v1673_v49 }
 0x3b2   :  { %v1810_v50 = vsel %vm1809_vm2, %v2016_v12, %v1806_v28 }
 0x3b3   :  { %v1813_v57 = vmul.f32 %v1812_v2, %v1810_v50 }
 0x3b5   :  { %v1820_v34 = vmul.f32 %v1814_v44, %v1813_v57  ;;  %v1821_v6 = vmul.f32 %v1815_v54, %v1813_v57  ;;  %v1822_v24 = vmul.f32 %v1816_v42, %v1813_v57  ;;  %v1823_v51 = vmul.f32 %v1817_v52, %v1813_v57 }
 0x3b6   :  { %v1824_v13 = vmul.f32 %v1818_v1, %v1813_v57  ;;  %v1825_v61 = vmul.f32 %v1819_v45, %v1813_v57 }
 0x3b7   :  { %v1828_v3 = vadd.f32 %v1827_v40, %v1820_v34  ;;  %v1829_v23 = vadd.f32 %v1827_v40, %v1821_v6  ;;  %v1830_v63 = vadd.f32 %v1827_v40, %v1822_v24  ;;  %v1831_v29 = vadd.f32 %v1827_v40, %v1823_v51 }
 0x3b8   :  { %v1832_v43 = vadd.f32 %v1827_v40, %v1824_v13  ;;  %v1833_v5 = vadd.f32 %v1827_v40, %v1825_v61 }
 0x3b9   :  { %v1834_v22 = vmax.f32 %v1828_v3, 0.0  ;;  %v1835_v62 = vmax.f32 %v1829_v23, 0.0  ;;  %v1836_v9 = vmax.f32 %v1830_v63, 0.0  ;;  %v1837_v16 = vmax.f32 %v1831_v29, 0.0 }
 0x3ba   :  { %v1838_v10 = vmax.f32 %v1832_v43, 0.0  ;;  %v1839_v47 = vmax.f32 %v1833_v5, 0.0 }
 0x3bb   :  { %v1840_v53 = vmin.f32 %v1834_v22, 6.0  ;;  %v1841_v55 = vmin.f32 %v1835_v62, 6.0  ;;  %v1842_v38 = vmin.f32 %v1836_v9, 6.0  ;;  %v1843_v4 = vmin.f32 %v1837_v16, 6.0 }
 0x3bc   :  { %v1844_v12 = vmin.f32 %v1838_v10, 6.0  ;;  %v1845_v20 = vmin.f32 %v1839_v47, 6.0 }
 0x3bd   :  { %v1846_v26 = vmul.f32 %v1840_v53, %v3470_v48  ;;  %v1847_v30 = vmul.f32 %v1841_v55, %v3472_v56  ;;  %v1848_v27 = vmul.f32 %v1842_v38, %v3475_v33  ;;  %v1849_v25 = vmul.f32 %v1843_v4, %v3477_v14 }
 0x3be   :  { %v1850_v21 = vmul.f32 %v1844_v12, %v3479_v18  ;;  %v1851_v39 = vmul.f32 %v1845_v20, %v3487_v7 }
 0x3bf   :  { %v1852_v0 = vmul.f32 0.16666667, %v1846_v26  ;;  %v1853_v32 = vmul.f32 0.16666667, %v1847_v30  ;;  %v1854_v31 = vmul.f32 0.16666667, %v1848_v27 }
 0x3c0   :  { %v1855_v11 = vmul.f32 0.16666667, %v1849_v25  ;;  %v1856_v41 = vmul.f32 0.16666667, %v1850_v21  ;;  %v1857_v48 = vmul.f32 0.16666667, %v1851_v39 }
 0x3c1   :  { %1953 = vst.msk [vmem:[%s3666_s5 + $0x60] sm:$0xff] %vm191_vm4, %v1852_v0 }
 0x3c2   :  { %1954 = vst.msk [vmem:[%s3666_s5 + $0x68] sm:$0xff] %vm191_vm4, %v1853_v32 }
 0x3c3   :  { %1955 = vst.msk [vmem:[%s3666_s5 + $0x70] sm:$0x3f] %vm195_vm5, %v1854_v31 }
 0x3c4   :  { %1956 = vst.msk [vmem:[%s3666_s5 + $0x78] sm:$0xff] %vm191_vm4, %v1855_v11 }
 0x3c5   :  { %1957 = vst.msk [vmem:[%s3666_s5 + $0x80] sm:$0xff] %vm191_vm4, %v1856_v41 }
 0x3c6   :  { %1958 = vst.msk [vmem:[%s3666_s5 + $0x88] sm:$0x3f] %vm195_vm5, %v1857_v48 }
 0x3c7   :  { %1882 = vsyncpa [#allocation3], 1 }
 0x3c8   :  { %1883 = vsyncpa [#allocation5], 1 }
 0x3c9   :  { %1884 = vsyncpa [#allocation8], 1 }

</bundles_post_ra>
